<compile_context>
chip_gen: v6e
topology: v6e:2x2x1
jax: 0.10.0
libtpu: 0.0.40
codegen_flags: <defaults>
</compile_context>

<pallas_src>
import functools

import jax
import jax.numpy as jnp
from jax.experimental import pallas as pl
from jax.experimental.pallas import tpu as pltpu

EMB = 32                      # node_feats / embedding_dim
NUM_LAYERS = 2                # HKGE num_layers
NODE_COUNTS = {"item": 16, "user": 8}
NI = NODE_COUNTS["item"]
NU = NODE_COUNTS["user"]
D = EMB
CANONICAL_ETYPES = [          # (utype, etype, vtype)
    ("user", "buys", "item"),
    ("item", "similar", "item"),
    ("item", "bought_by", "user"),
]
VTYPE2EUTYPES = {}
for _u, _e, _v in CANONICAL_ETYPES:
    VTYPE2EUTYPES.setdefault(_v, []).append((_e, _u))

_VMEM = pl.BlockSpec(memory_space=pltpu.MemorySpace.VMEM)

# ---- packed projection column maps (static; kernel slices with these) ------------
# user-src packed projection:  [ q-slab(buys, Ni*D) | v(buys, D) | k(bought_by, D) ]
U_QSL = (0, NI * D)
U_V_BUYS = (NI * D, NI * D + D)
U_K_BB = (NI * D + D, NI * D + 2 * D)
U_COLS = NI * D + 2 * D                                  # 576
# item-src packed projection:
#   [ q-slab(similar, Ni*D) | q-slab(bought_by, Nu*D) | k(buys,D) | k(similar,D)
#     | v(similar,D) | v(bought_by,D) ]
I_QSL_SIM = (0, NI * D)
I_QSL_BB = (NI * D, NI * D + NU * D)
I_K_BUYS = (NI * D + NU * D, NI * D + NU * D + D)
I_K_SIM = (NI * D + NU * D + D, NI * D + NU * D + 2 * D)
I_V_SIM = (NI * D + NU * D + 2 * D, NI * D + NU * D + 3 * D)
I_V_BB = (NI * D + NU * D + 3 * D, NI * D + NU * D + 4 * D)
I_COLS = NI * D + NU * D + 4 * D                         # 896


# ---------------------------------------------------------------------------
# Fully fused HKGE forward kernel (all layers in one invocation)
# ---------------------------------------------------------------------------

def _make_hkge_kernel(residual, num_layers):

    def kernel(feat_item_ref, feat_user_ref, masks_ref,
               w_user_ref, w_item_ref, pbias_ref,
               ae_item_ref, ae_user_ref, wo_ref, small_ref,
               out_item_ref, out_user_ref):

        def bn(x, g, b):  # BatchNorm1d, training-mode (biased) batch statistics
            mean = jnp.mean(x, axis=0, keepdims=True)
            var = jnp.mean(jnp.square(x - mean), axis=0, keepdims=True)
            return (x - mean) * jax.lax.rsqrt(var + 1e-5) * g + b

        def flat_rows(k):
            # (n, D) -> (1, n*D): row-major flatten via lane concat of static slices.
            return jnp.concatenate([k[i:i + 1, :] for i in range(k.shape[0])], axis=1)

        def score(e_slab, ae_rhs):
            # (Ns, Nd*D) x (Nd, Nd*D) -> (Ns, Nd); contraction over the slab lanes
            # runs on the MXU (lane-dense RHS with attn_e on its block diagonal).
            return jax.lax.dot_general(e_slab, ae_rhs, (((1,), (1,)), ((), ())),
                                       preferred_element_type=jnp.float32)

        def attT_v(a, v):
            # agg[dst, :] = sum_src a[src, dst] * v[src, :]
            return jax.lax.dot_general(a, v, (((0,), (0,)), ((), ())),
                                       preferred_element_type=jnp.float32)

        masks = masks_ref[...]
        m_buys = masks[0][0:NU, :]      # (Nu, Ni)
        m_sim = masks[1]                # (Ni, Ni)
        m_bb = masks[2][:, 0:NU]        # (Ni, Nu)

        f_item = feat_item_ref[...]     # (Ni, D)
        f_user = feat_user_ref[...]     # (Nu, D)

        for l in range(num_layers):     # unrolled; feats stay in vregs between layers
            sp = small_ref[l]           # (8, D): [g_i, b_i, g_u, b_u, ba_i, ba_u, al_i, al_u]
            pb = pbias_ref[l]           # (2, I_COLS) packed projection biases
            wo = wo_ref[l]              # (D, 4D):  [w_agg_i | w_self_i | w_agg_u | w_self_u]
            ae_i = ae_item_ref[l]       # (2*Ni, Ni*D): rows 0:Ni buys, Ni:2Ni similar
            ae_u = ae_user_ref[l]       # (Nu, Nu*D)

            h_item = bn(f_item, sp[0:1, :], sp[1:2, :])
            h_user = bn(f_user, sp[2:3, :], sp[3:4, :])

            # One lane-dense MXU matmul per source ntype (q-slabs, k's and v's at once).
            p_user = jnp.dot(h_user, w_user_ref[l],
                             preferred_element_type=jnp.float32) + pb[0:1, 0:U_COLS]
            p_item = jnp.dot(h_item, w_item_ref[l],
                             preferred_element_type=jnp.float32) + pb[1:2, :]

            qsl_buys = p_user[:, U_QSL[0]:U_QSL[1]]          # (Nu, Ni*D)
            v_buys = p_user[:, U_V_BUYS[0]:U_V_BUYS[1]]      # (Nu, D)
            k_bb = p_user[:, U_K_BB[0]:U_K_BB[1]]            # (Nu, D)

            qsl_sim = p_item[:, I_QSL_SIM[0]:I_QSL_SIM[1]]   # (Ni, Ni*D)
            qsl_bb = p_item[:, I_QSL_BB[0]:I_QSL_BB[1]]      # (Ni, Nu*D)
            k_buys = p_item[:, I_K_BUYS[0]:I_K_BUYS[1]]      # (Ni, D)
            k_sim = p_item[:, I_K_SIM[0]:I_K_SIM[1]]         # (Ni, D)
            v_sim = p_item[:, I_V_SIM[0]:I_V_SIM[1]]         # (Ni, D)
            v_bb = p_item[:, I_V_BB[0]:I_V_BB[1]]            # (Ni, D)

            # Lane-dense sigmoid slabs: slab[u, v*D+f] = sigmoid(q[u,f] + k[v,f]).
            e_buys = jax.nn.sigmoid(qsl_buys + flat_rows(k_buys))   # (Nu, Ni*D)
            e_sim = jax.nn.sigmoid(qsl_sim + flat_rows(k_sim))      # (Ni, Ni*D)
            e_bb = jax.nn.sigmoid(qsl_bb + flat_rows(k_bb))         # (Ni, Nu*D)

            s_buys = score(e_buys, ae_i[0:NI, :])        # (Nu, Ni)
            s_sim = score(e_sim, ae_i[NI:2 * NI, :])     # (Ni, Ni)
            s_bb = score(e_bb, ae_u)                     # (Ni, Nu)

            # Cross-etype edge-softmax per dst node.  Non-edges are zeroed by *mask
            # (shift-invariant, so the unmasked column max is exact).
            cmax_i = jnp.maximum(jnp.max(s_buys, axis=0, keepdims=True),
                                 jnp.max(s_sim, axis=0, keepdims=True))
            p_buys = jnp.exp(s_buys - cmax_i) * m_buys
            p_sim = jnp.exp(s_sim - cmax_i) * m_sim
            den_i = (jnp.sum(p_buys, axis=0, keepdims=True)
                     + jnp.sum(p_sim, axis=0, keepdims=True))
            inv_i = pl.reciprocal(jnp.where(den_i > 0.0, den_i, 1.0), approx=True)
            agg_item = attT_v(p_buys * inv_i, v_buys) + attT_v(p_sim * inv_i, v_sim)

            cmax_u = jnp.max(s_bb, axis=0, keepdims=True)
            p_bb = jnp.exp(s_bb - cmax_u) * m_bb
            den_u = jnp.sum(p_bb, axis=0, keepdims=True)
            inv_u = pl.reciprocal(jnp.where(den_u > 0.0, den_u, 1.0), approx=True)
            agg_user = attT_v(p_bb * inv_u, v_bb)

            # PReLU(linear_agg(agg) + linear_self(ft_dst)): two MXU matmuls + VPU add.
            y_item = (jnp.dot(agg_item, wo[:, 0:D], preferred_element_type=jnp.float32)
                      + jnp.dot(h_item, wo[:, D:2 * D], preferred_element_type=jnp.float32)
                      + sp[4:5, :])
            y_item = jnp.where(y_item >= 0.0, y_item, sp[6:7, :] * y_item)
            y_user = (jnp.dot(agg_user, wo[:, 2 * D:3 * D], preferred_element_type=jnp.float32)
                      + jnp.dot(h_user, wo[:, 3 * D:4 * D], preferred_element_type=jnp.float32)
                      + sp[5:6, :])
            y_user = jnp.where(y_user >= 0.0, y_user, sp[7:8, :] * y_user)

            if residual:
                y_item = y_item + f_item
                y_user = y_user + f_user
            f_item, f_user = y_item, y_user

        out_item_ref[...] = f_item
        out_user_ref[...] = f_user

    return kernel


@functools.partial(jax.jit, static_argnames=("residual",))
def hkge_forward_pallas(packed, masks_packed, feats, residual=True):
    n_item, d = feats["item"].shape
    n_user = feats["user"].shape[0]
    num_layers = packed["small"].shape[0]
    out_item, out_user = pl.pallas_call(
        _make_hkge_kernel(residual, num_layers),
        out_shape=(jax.ShapeDtypeStruct((n_item, d), jnp.float32),
                   jax.ShapeDtypeStruct((n_user, d), jnp.float32)),
        in_specs=[_VMEM] * 10,
        out_specs=(_VMEM, _VMEM),
        input_output_aliases={0: 0, 1: 1},   # final residual written over input feats
        cost_estimate=pl.CostEstimate(flops=4_000_000, transcendentals=35_000,
                                      bytes_accessed=600_000),
    )(feats["item"], feats["user"], masks_packed,
      packed["w_user"], packed["w_item"], packed["pbias"],
      packed["ae_item"], packed["ae_user"], packed["wo"], packed["small"])
    return {"item": out_item, "user": out_user}


# ---------------------------------------------------------------------------
# Weight packing (done once, outside the hot path)
# ---------------------------------------------------------------------------

def _tile_cols(w, reps):
    return jnp.concatenate([w] * reps, axis=1)


def _attn_rhs(attn_e, nd):
    # Lane-dense (nd, nd*D): row c carries attn_e in column block c, zeros elsewhere.
    d = attn_e.shape[-1]
    eye = jnp.eye(nd, dtype=jnp.float32)
    return (eye[:, :, None] * attn_e.reshape(1, 1, d)).reshape(nd, nd * d)


def pack_layer_weights(lp):
    e, v, bn = lp["edges"], lp["verts"], lp["bn"]
    w_user = jnp.concatenate(
        [_tile_cols(e["buys"]["wq"], NI), e["buys"]["wv"], e["bought_by"]["wk"]], axis=1)
    b_user = jnp.concatenate(
        [_tile_cols(e["buys"]["bq"], NI), jnp.zeros((1, 2 * D), jnp.float32)], axis=1)
    w_item = jnp.concatenate(
        [_tile_cols(e["similar"]["wq"], NI), _tile_cols(e["bought_by"]["wq"], NU),
         e["buys"]["wk"], e["similar"]["wk"], e["similar"]["wv"], e["bought_by"]["wv"]],
        axis=1)
    b_item = jnp.concatenate(
        [_tile_cols(e["similar"]["bq"], NI), _tile_cols(e["bought_by"]["bq"], NU),
         jnp.zeros((1, 4 * D), jnp.float32)], axis=1)
    pbias = jnp.concatenate(
        [jnp.pad(b_user, ((0, 0), (0, I_COLS - U_COLS))), b_item], axis=0)
    ae_item = jnp.concatenate([_attn_rhs(e["buys"]["attn_e"], NI),
                               _attn_rhs(e["similar"]["attn_e"], NI)], axis=0)
    ae_user = _attn_rhs(e["bought_by"]["attn_e"], NU)
    wo = jnp.concatenate([v["item"]["w_agg"], v["item"]["w_self"],
                          v["user"]["w_agg"], v["user"]["w_self"]], axis=1)
    small = jnp.concatenate([bn["item"]["gamma"], bn["item"]["beta"],
                             bn["user"]["gamma"], bn["user"]["beta"],
                             v["item"]["b_agg"], v["user"]["b_agg"],
                             v["item"]["alpha"], v["user"]["alpha"]], axis=0)
    return dict(w_user=w_user, w_item=w_item, pbias=pbias, ae_item=ae_item,
                ae_user=ae_user, wo=wo, small=small)


def pack_hkge_weights(params):
    per_layer = [pack_layer_weights(lp) for lp in params]
    return {k: jnp.stack([p[k] for p in per_layer], axis=0) for k in per_layer[0]}


def pack_masks(masks):
    m_buys = jnp.pad(masks["buys"], ((0, NI - NU), (0, 0)))         # (16,16)
    m_bb = jnp.pad(masks["bought_by"], ((0, 0), (0, NI - NU)))      # (16,16)
    return jnp.stack([m_buys, masks["similar"], m_bb], axis=0)      # (3,16,16)


# ---------------------------------------------------------------------------
# Pure-JAX reference (numerical sanity check, uses the unpacked params)
# ---------------------------------------------------------------------------

def _ref_bn(x, g, b):
    mean = jnp.mean(x, axis=0, keepdims=True)
    var = jnp.mean(jnp.square(x - mean), axis=0, keepdims=True)
    return (x - mean) * jax.lax.rsqrt(var + 1e-5) * g + b


def _ref_layer(lp, masks, ft):
    ft_src = {nt: _ref_bn(ft[nt], lp["bn"][nt]["gamma"], lp["bn"][nt]["beta"]) for nt in ft}
    ft_dst = ft_src
    out = {}
    for vtype, eutypes in VTYPE2EUTYPES.items():
        ss, vv, mm = [], [], []
        for etype, utype in eutypes:
            ep = lp["edges"][etype]
            q = ft_src[utype] @ ep["wq"] + ep["bq"]
            k = ft_dst[vtype] @ ep["wk"]
            v = ft_src[utype] @ ep["wv"]
            s = jnp.sum(ep["attn_e"][None, :, :] *
                        jax.nn.sigmoid(q[:, None, :] + k[None, :, :]), axis=-1)
            s = jnp.where(masks[etype] > 0, s, -1e30)
            ss.append(s); vv.append(v); mm.append(masks[etype])
        s = jnp.concatenate(ss, 0); v = jnp.concatenate(vv, 0); m = jnp.concatenate(mm, 0)
        p = jnp.exp(s - jnp.max(s, axis=0, keepdims=True)) * m
        denom = jnp.sum(p, axis=0, keepdims=True)
        a = p / jnp.where(denom > 0, denom, 1.0)
        agg = a.T @ v
        vp = lp["verts"][vtype]
        y = agg @ vp["w_agg"] + vp["b_agg"] + ft_dst[vtype] @ vp["w_self"]
        out[vtype] = jnp.where(y >= 0, y, vp["alpha"] * y)
    return out


def hkge_forward_ref(params, masks, feats, residual=True):
    for lp in params:
        out = _ref_layer(lp, masks, feats)
        if residual:
            feats = {nt: out[nt] + feats[nt][: out[nt].shape[0]] for nt in feats}
        else:
            feats = out
    return feats


# ---------------------------------------------------------------------------
# Deterministic parameter / graph construction
# ---------------------------------------------------------------------------

def init_params(key):
    keys = iter(jax.random.split(key, 1024))
    nxt = lambda: next(keys)
    scale = 1.0 / (EMB ** 0.5)
    layers = []
    for _ in range(NUM_LAYERS):
        edges = {}
        for _u, etype, _v in CANONICAL_ETYPES:
            edges[etype] = dict(
                wq=scale * jax.random.normal(nxt(), (EMB, EMB), jnp.float32),
                bq=0.1 * jax.random.normal(nxt(), (1, EMB), jnp.float32),
                wk=scale * jax.random.normal(nxt(), (EMB, EMB), jnp.float32),
                wv=scale * jax.random.normal(nxt(), (EMB, EMB), jnp.float32),
                attn_e=jax.random.normal(nxt(), (1, EMB), jnp.float32),  # th.randn(1, D)
            )
        verts, bn = {}, {}
        for vtype in VTYPE2EUTYPES:
            verts[vtype] = dict(
                w_agg=scale * jax.random.normal(nxt(), (EMB, EMB), jnp.float32),
                b_agg=0.1 * jax.random.normal(nxt(), (1, EMB), jnp.float32),
                w_self=scale * jax.random.normal(nxt(), (EMB, EMB), jnp.float32),
                alpha=0.25 * jnp.ones((1, EMB), jnp.float32),   # nn.PReLU default init
            )
        for ntype in NODE_COUNTS:
            bn[ntype] = dict(gamma=jnp.ones((1, EMB), jnp.float32),
                             beta=jnp.zeros((1, EMB), jnp.float32))
        layers.append(dict(edges=edges, verts=verts, bn=bn))
    return layers


def init_masks(key):
    masks = {}
    for kk, (u, e, v) in zip(jax.random.split(key, len(CANONICAL_ETYPES)), CANONICAL_ETYPES):
        m = jax.random.bernoulli(kk, 0.35, (NODE_COUNTS[u], NODE_COUNTS[v]))
        masks[e] = m.astype(jnp.float32)
    return masks


if __name__ == "__main__":
    root = jax.random.PRNGKey(0)
    k_feat, k_par, k_mask = jax.random.split(root, 3)

    feats = {nt: jax.random.normal(jax.random.fold_in(k_feat, i), (n, EMB), jnp.float32)
             for i, (nt, n) in enumerate(NODE_COUNTS.items())}
    params = init_params(k_par)
    masks = init_masks(k_mask)

    packed = pack_hkge_weights(params)
    masks_packed = pack_masks(masks)

    out = hkge_forward_pallas(packed, masks_packed, feats, residual=True)
    out = {nt: jax.block_until_ready(x) for nt, x in out.items()}

    ref = hkge_forward_ref(params, masks, feats, residual=True)
    max_err = max(float(jnp.max(jnp.abs(out[nt] - ref[nt]))) for nt in out)
    assert max_err < 5e-2, f"mismatch vs reference: max abs err = {max_err}"
    print("KERNEL_OK")
</pallas_src>

<mosaic_0001>
module attributes {stable_mosaic.version = 11 : i64} {
  func.func @kernel(%arg0: memref<16x32xf32, #tpu.memory_space<vmem>>, %arg1: memref<8x32xf32, #tpu.memory_space<vmem>>, %arg2: memref<3x16x16xf32, #tpu.memory_space<vmem>>, %arg3: memref<2x32x576xf32, #tpu.memory_space<vmem>>, %arg4: memref<2x32x896xf32, #tpu.memory_space<vmem>>, %arg5: memref<2x2x896xf32, #tpu.memory_space<vmem>>, %arg6: memref<2x32x512xf32, #tpu.memory_space<vmem>>, %arg7: memref<2x8x256xf32, #tpu.memory_space<vmem>>, %arg8: memref<2x32x128xf32, #tpu.memory_space<vmem>>, %arg9: memref<2x8x32xf32, #tpu.memory_space<vmem>>, %arg10: memref<16x32xf32, #tpu.memory_space<vmem>>, %arg11: memref<8x32xf32, #tpu.memory_space<vmem>>) attributes {dimension_semantics = [], scalar_prefetch = 0 : i64, scratch_operands = 0 : i64, tpu.core_type = #tpu.core_type<tc>} {
    %c0 = arith.constant 0 : index
    %c0_0 = arith.constant 0 : index
    %c0_1 = arith.constant 0 : index
    %0 = vector.load %arg2[%c0, %c0_0, %c0_1] : memref<3x16x16xf32, #tpu.memory_space<vmem>>, vector<3x16x16xf32>
    %1 = vector.extract_strided_slice %0 {offsets = [0, 0, 0], sizes = [1, 16, 16], strides = [1, 1, 1]} : vector<3x16x16xf32> to vector<1x16x16xf32>
    %2 = vector.shape_cast %1 : vector<1x16x16xf32> to vector<16x16xf32>
    %3 = vector.extract_strided_slice %2 {offsets = [0, 0], sizes = [8, 16], strides = [1, 1]} : vector<16x16xf32> to vector<8x16xf32>
    %4 = vector.extract_strided_slice %0 {offsets = [1, 0, 0], sizes = [1, 16, 16], strides = [1, 1, 1]} : vector<3x16x16xf32> to vector<1x16x16xf32>
    %5 = vector.shape_cast %4 : vector<1x16x16xf32> to vector<16x16xf32>
    %6 = vector.extract_strided_slice %0 {offsets = [2, 0, 0], sizes = [1, 16, 16], strides = [1, 1, 1]} : vector<3x16x16xf32> to vector<1x16x16xf32>
    %7 = vector.shape_cast %6 : vector<1x16x16xf32> to vector<16x16xf32>
    %8 = vector.extract_strided_slice %7 {offsets = [0, 0], sizes = [16, 8], strides = [1, 1]} : vector<16x16xf32> to vector<16x8xf32>
    %c0_2 = arith.constant 0 : index
    %c0_3 = arith.constant 0 : index
    %9 = vector.load %arg0[%c0_2, %c0_3] : memref<16x32xf32, #tpu.memory_space<vmem>>, vector<16x32xf32>
    %c0_4 = arith.constant 0 : index
    %c0_5 = arith.constant 0 : index
    %10 = vector.load %arg1[%c0_4, %c0_5] : memref<8x32xf32, #tpu.memory_space<vmem>>, vector<8x32xf32>
    %c0_6 = arith.constant 0 : index
    %c0_7 = arith.constant 0 : index
    %c0_8 = arith.constant 0 : index
    %11 = vector.load %arg9[%c0_6, %c0_7, %c0_8] : memref<2x8x32xf32, #tpu.memory_space<vmem>>, vector<1x8x32xf32>
    %12 = vector.shape_cast %11 : vector<1x8x32xf32> to vector<8x32xf32>
    %c0_9 = arith.constant 0 : index
    %c0_10 = arith.constant 0 : index
    %c0_11 = arith.constant 0 : index
    %13 = vector.load %arg5[%c0_9, %c0_10, %c0_11] : memref<2x2x896xf32, #tpu.memory_space<vmem>>, vector<1x2x896xf32>
    %14 = vector.shape_cast %13 : vector<1x2x896xf32> to vector<2x896xf32>
    %c0_12 = arith.constant 0 : index
    %c0_13 = arith.constant 0 : index
    %c0_14 = arith.constant 0 : index
    %15 = vector.load %arg8[%c0_12, %c0_13, %c0_14] : memref<2x32x128xf32, #tpu.memory_space<vmem>>, vector<1x32x128xf32>
    %16 = vector.shape_cast %15 : vector<1x32x128xf32> to vector<32x128xf32>
    %c0_15 = arith.constant 0 : index
    %c0_16 = arith.constant 0 : index
    %c0_17 = arith.constant 0 : index
    %17 = vector.load %arg6[%c0_15, %c0_16, %c0_17] : memref<2x32x512xf32, #tpu.memory_space<vmem>>, vector<1x32x512xf32>
    %18 = vector.shape_cast %17 : vector<1x32x512xf32> to vector<32x512xf32>
    %c0_18 = arith.constant 0 : index
    %c0_19 = arith.constant 0 : index
    %c0_20 = arith.constant 0 : index
    %19 = vector.load %arg7[%c0_18, %c0_19, %c0_20] : memref<2x8x256xf32, #tpu.memory_space<vmem>>, vector<1x8x256xf32>
    %20 = vector.shape_cast %19 : vector<1x8x256xf32> to vector<8x256xf32>
    %21 = vector.extract_strided_slice %12 {offsets = [0, 0], sizes = [1, 32], strides = [1, 1]} : vector<8x32xf32> to vector<1x32xf32>
    %22 = vector.extract_strided_slice %12 {offsets = [1, 0], sizes = [1, 32], strides = [1, 1]} : vector<8x32xf32> to vector<1x32xf32>
    %cst = arith.constant dense<0.000000e+00> : vector<32xf32>
    %23 = vector.multi_reduction <add>, %9, %cst [0] : vector<16x32xf32> to vector<32xf32>
    %24 = vector.shape_cast %23 : vector<32xf32> to vector<1x32xf32>
    %cst_21 = arith.constant 1.600000e+01 : f32
    %25 = vector.broadcast %cst_21 : f32 to vector<1x32xf32>
    %26 = arith.divf %24, %25 : vector<1x32xf32>
    %27 = vector.broadcast %26 : vector<1x32xf32> to vector<16x32xf32>
    %28 = arith.subf %9, %27 : vector<16x32xf32>
    %29 = arith.mulf %28, %28 : vector<16x32xf32>
    %cst_22 = arith.constant dense<0.000000e+00> : vector<32xf32>
    %30 = vector.multi_reduction <add>, %29, %cst_22 [0] : vector<16x32xf32> to vector<32xf32>
    %31 = vector.shape_cast %30 : vector<32xf32> to vector<1x32xf32>
    %cst_23 = arith.constant 1.600000e+01 : f32
    %32 = vector.broadcast %cst_23 : f32 to vector<1x32xf32>
    %33 = arith.divf %31, %32 : vector<1x32xf32>
    %34 = vector.broadcast %26 : vector<1x32xf32> to vector<16x32xf32>
    %35 = arith.subf %9, %34 : vector<16x32xf32>
    %cst_24 = arith.constant 9.99999974E-6 : f32
    %36 = vector.broadcast %cst_24 : f32 to vector<1x32xf32>
    %37 = arith.addf %33, %36 : vector<1x32xf32>
    %38 = math.rsqrt %37 : vector<1x32xf32>
    %39 = vector.broadcast %38 : vector<1x32xf32> to vector<16x32xf32>
    %40 = arith.mulf %35, %39 : vector<16x32xf32>
    %41 = vector.broadcast %21 : vector<1x32xf32> to vector<16x32xf32>
    %42 = arith.mulf %40, %41 : vector<16x32xf32>
    %43 = vector.broadcast %22 : vector<1x32xf32> to vector<16x32xf32>
    %44 = arith.addf %42, %43 : vector<16x32xf32>
    %45 = vector.extract_strided_slice %12 {offsets = [2, 0], sizes = [1, 32], strides = [1, 1]} : vector<8x32xf32> to vector<1x32xf32>
    %46 = vector.extract_strided_slice %12 {offsets = [3, 0], sizes = [1, 32], strides = [1, 1]} : vector<8x32xf32> to vector<1x32xf32>
    %cst_25 = arith.constant dense<0.000000e+00> : vector<32xf32>
    %47 = vector.multi_reduction <add>, %10, %cst_25 [0] : vector<8x32xf32> to vector<32xf32>
    %48 = vector.shape_cast %47 : vector<32xf32> to vector<1x32xf32>
    %cst_26 = arith.constant 8.000000e+00 : f32
    %49 = vector.broadcast %cst_26 : f32 to vector<1x32xf32>
    %50 = arith.divf %48, %49 : vector<1x32xf32>
    %51 = vector.broadcast %50 : vector<1x32xf32> to vector<8x32xf32>
    %52 = arith.subf %10, %51 : vector<8x32xf32>
    %53 = arith.mulf %52, %52 : vector<8x32xf32>
    %cst_27 = arith.constant dense<0.000000e+00> : vector<32xf32>
    %54 = vector.multi_reduction <add>, %53, %cst_27 [0] : vector<8x32xf32> to vector<32xf32>
    %55 = vector.shape_cast %54 : vector<32xf32> to vector<1x32xf32>
    %cst_28 = arith.constant 8.000000e+00 : f32
    %56 = vector.broadcast %cst_28 : f32 to vector<1x32xf32>
    %57 = arith.divf %55, %56 : vector<1x32xf32>
    %58 = vector.broadcast %50 : vector<1x32xf32> to vector<8x32xf32>
    %59 = arith.subf %10, %58 : vector<8x32xf32>
    %cst_29 = arith.constant 9.99999974E-6 : f32
    %60 = vector.broadcast %cst_29 : f32 to vector<1x32xf32>
    %61 = arith.addf %57, %60 : vector<1x32xf32>
    %62 = math.rsqrt %61 : vector<1x32xf32>
    %63 = vector.broadcast %62 : vector<1x32xf32> to vector<8x32xf32>
    %64 = arith.mulf %59, %63 : vector<8x32xf32>
    %65 = vector.broadcast %45 : vector<1x32xf32> to vector<8x32xf32>
    %66 = arith.mulf %64, %65 : vector<8x32xf32>
    %67 = vector.broadcast %46 : vector<1x32xf32> to vector<8x32xf32>
    %68 = arith.addf %66, %67 : vector<8x32xf32>
    %c0_30 = arith.constant 0 : index
    %c0_31 = arith.constant 0 : index
    %c0_32 = arith.constant 0 : index
    %69 = vector.load %arg3[%c0_30, %c0_31, %c0_32] : memref<2x32x576xf32, #tpu.memory_space<vmem>>, vector<1x32x576xf32>
    %70 = vector.shape_cast %69 : vector<1x32x576xf32> to vector<32x576xf32>
    %cst_33 = arith.constant dense<0.000000e+00> : vector<8x576xf32>
    %71 = tpu.matmul %68, %70, %cst_33 {dimension_numbers = #tpu.dot_dimension_numbers<[1], [0], [0], [1], [0, 0, 1, 1], [], []>} : vector<8x32xf32>, vector<32x576xf32>, vector<8x576xf32> -> vector<8x576xf32>
    %72 = vector.extract_strided_slice %14 {offsets = [0, 0], sizes = [1, 576], strides = [1, 1]} : vector<2x896xf32> to vector<1x576xf32>
    %73 = vector.broadcast %72 : vector<1x576xf32> to vector<8x576xf32>
    %74 = arith.addf %71, %73 : vector<8x576xf32>
    %c0_34 = arith.constant 0 : index
    %c0_35 = arith.constant 0 : index
    %c0_36 = arith.constant 0 : index
    %75 = vector.load %arg4[%c0_34, %c0_35, %c0_36] : memref<2x32x896xf32, #tpu.memory_space<vmem>>, vector<1x32x896xf32>
    %76 = vector.shape_cast %75 : vector<1x32x896xf32> to vector<32x896xf32>
    %cst_37 = arith.constant dense<0.000000e+00> : vector<16x896xf32>
    %77 = tpu.matmul %44, %76, %cst_37 {dimension_numbers = #tpu.dot_dimension_numbers<[1], [0], [0], [1], [0, 0, 1, 1], [], []>} : vector<16x32xf32>, vector<32x896xf32>, vector<16x896xf32> -> vector<16x896xf32>
    %78 = vector.extract_strided_slice %14 {offsets = [1, 0], sizes = [1, 896], strides = [1, 1]} : vector<2x896xf32> to vector<1x896xf32>
    %79 = vector.broadcast %78 : vector<1x896xf32> to vector<16x896xf32>
    %80 = arith.addf %77, %79 : vector<16x896xf32>
    %81 = vector.extract_strided_slice %74 {offsets = [0, 0], sizes = [8, 512], strides = [1, 1]} : vector<8x576xf32> to vector<8x512xf32>
    %82 = vector.extract_strided_slice %74 {offsets = [0, 512], sizes = [8, 32], strides = [1, 1]} : vector<8x576xf32> to vector<8x32xf32>
    %83 = vector.extract_strided_slice %74 {offsets = [0, 544], sizes = [8, 32], strides = [1, 1]} : vector<8x576xf32> to vector<8x32xf32>
    %84 = vector.extract_strided_slice %80 {offsets = [0, 0], sizes = [16, 512], strides = [1, 1]} : vector<16x896xf32> to vector<16x512xf32>
    %85 = vector.extract_strided_slice %80 {offsets = [0, 512], sizes = [16, 256], strides = [1, 1]} : vector<16x896xf32> to vector<16x256xf32>
    %86 = vector.extract_strided_slice %80 {offsets = [0, 768], sizes = [16, 32], strides = [1, 1]} : vector<16x896xf32> to vector<16x32xf32>
    %87 = vector.extract_strided_slice %80 {offsets = [0, 800], sizes = [16, 32], strides = [1, 1]} : vector<16x896xf32> to vector<16x32xf32>
    %88 = vector.extract_strided_slice %80 {offsets = [0, 832], sizes = [16, 32], strides = [1, 1]} : vector<16x896xf32> to vector<16x32xf32>
    %89 = vector.extract_strided_slice %80 {offsets = [0, 864], sizes = [16, 32], strides = [1, 1]} : vector<16x896xf32> to vector<16x32xf32>
    %90 = vector.extract_strided_slice %86 {offsets = [0, 0], sizes = [1, 32], strides = [1, 1]} : vector<16x32xf32> to vector<1x32xf32>
    %91 = vector.extract_strided_slice %86 {offsets = [1, 0], sizes = [1, 32], strides = [1, 1]} : vector<16x32xf32> to vector<1x32xf32>
    %92 = vector.extract_strided_slice %86 {offsets = [2, 0], sizes = [1, 32], strides = [1, 1]} : vector<16x32xf32> to vector<1x32xf32>
    %93 = vector.extract_strided_slice %86 {offsets = [3, 0], sizes = [1, 32], strides = [1, 1]} : vector<16x32xf32> to vector<1x32xf32>
    %94 = vector.extract_strided_slice %86 {offsets = [4, 0], sizes = [1, 32], strides = [1, 1]} : vector<16x32xf32> to vector<1x32xf32>
    %95 = vector.extract_strided_slice %86 {offsets = [5, 0], sizes = [1, 32], strides = [1, 1]} : vector<16x32xf32> to vector<1x32xf32>
    %96 = vector.extract_strided_slice %86 {offsets = [6, 0], sizes = [1, 32], strides = [1, 1]} : vector<16x32xf32> to vector<1x32xf32>
    %97 = vector.extract_strided_slice %86 {offsets = [7, 0], sizes = [1, 32], strides = [1, 1]} : vector<16x32xf32> to vector<1x32xf32>
    %98 = vector.extract_strided_slice %86 {offsets = [8, 0], sizes = [1, 32], strides = [1, 1]} : vector<16x32xf32> to vector<1x32xf32>
    %99 = vector.extract_strided_slice %86 {offsets = [9, 0], sizes = [1, 32], strides = [1, 1]} : vector<16x32xf32> to vector<1x32xf32>
    %100 = vector.extract_strided_slice %86 {offsets = [10, 0], sizes = [1, 32], strides = [1, 1]} : vector<16x32xf32> to vector<1x32xf32>
    %101 = vector.extract_strided_slice %86 {offsets = [11, 0], sizes = [1, 32], strides = [1, 1]} : vector<16x32xf32> to vector<1x32xf32>
    %102 = vector.extract_strided_slice %86 {offsets = [12, 0], sizes = [1, 32], strides = [1, 1]} : vector<16x32xf32> to vector<1x32xf32>
    %103 = vector.extract_strided_slice %86 {offsets = [13, 0], sizes = [1, 32], strides = [1, 1]} : vector<16x32xf32> to vector<1x32xf32>
    %104 = vector.extract_strided_slice %86 {offsets = [14, 0], sizes = [1, 32], strides = [1, 1]} : vector<16x32xf32> to vector<1x32xf32>
    %105 = vector.extract_strided_slice %86 {offsets = [15, 0], sizes = [1, 32], strides = [1, 1]} : vector<16x32xf32> to vector<1x32xf32>
    %106 = tpu.concatenate %90, %91, %92, %93, %94, %95, %96, %97, %98, %99, %100, %101, %102, %103, %104, %105 in 1 : vector<1x32xf32>, vector<1x32xf32>, vector<1x32xf32>, vector<1x32xf32>, vector<1x32xf32>, vector<1x32xf32>, vector<1x32xf32>, vector<1x32xf32>, vector<1x32xf32>, vector<1x32xf32>, vector<1x32xf32>, vector<1x32xf32>, vector<1x32xf32>, vector<1x32xf32>, vector<1x32xf32>, vector<1x32xf32> -> vector<1x512xf32>
    %107 = vector.broadcast %106 : vector<1x512xf32> to vector<8x512xf32>
    %108 = arith.addf %81, %107 : vector<8x512xf32>
    %109 = arith.negf %108 : vector<8x512xf32>
    %110 = math.exp %109 : vector<8x512xf32>
    %cst_38 = arith.constant 1.000000e+00 : f32
    %111 = vector.broadcast %cst_38 : f32 to vector<8x512xf32>
    %112 = arith.addf %111, %110 : vector<8x512xf32>
    %113 = arith.divf %111, %112 : vector<8x512xf32>
    %114 = vector.extract_strided_slice %87 {offsets = [0, 0], sizes = [1, 32], strides = [1, 1]} : vector<16x32xf32> to vector<1x32xf32>
    %115 = vector.extract_strided_slice %87 {offsets = [1, 0], sizes = [1, 32], strides = [1, 1]} : vector<16x32xf32> to vector<1x32xf32>
    %116 = vector.extract_strided_slice %87 {offsets = [2, 0], sizes = [1, 32], strides = [1, 1]} : vector<16x32xf32> to vector<1x32xf32>
    %117 = vector.extract_strided_slice %87 {offsets = [3, 0], sizes = [1, 32], strides = [1, 1]} : vector<16x32xf32> to vector<1x32xf32>
    %118 = vector.extract_strided_slice %87 {offsets = [4, 0], sizes = [1, 32], strides = [1, 1]} : vector<16x32xf32> to vector<1x32xf32>
    %119 = vector.extract_strided_slice %87 {offsets = [5, 0], sizes = [1, 32], strides = [1, 1]} : vector<16x32xf32> to vector<1x32xf32>
    %120 = vector.extract_strided_slice %87 {offsets = [6, 0], sizes = [1, 32], strides = [1, 1]} : vector<16x32xf32> to vector<1x32xf32>
    %121 = vector.extract_strided_slice %87 {offsets = [7, 0], sizes = [1, 32], strides = [1, 1]} : vector<16x32xf32> to vector<1x32xf32>
    %122 = vector.extract_strided_slice %87 {offsets = [8, 0], sizes = [1, 32], strides = [1, 1]} : vector<16x32xf32> to vector<1x32xf32>
    %123 = vector.extract_strided_slice %87 {offsets = [9, 0], sizes = [1, 32], strides = [1, 1]} : vector<16x32xf32> to vector<1x32xf32>
    %124 = vector.extract_strided_slice %87 {offsets = [10, 0], sizes = [1, 32], strides = [1, 1]} : vector<16x32xf32> to vector<1x32xf32>
    %125 = vector.extract_strided_slice %87 {offsets = [11, 0], sizes = [1, 32], strides = [1, 1]} : vector<16x32xf32> to vector<1x32xf32>
    %126 = vector.extract_strided_slice %87 {offsets = [12, 0], sizes = [1, 32], strides = [1, 1]} : vector<16x32xf32> to vector<1x32xf32>
    %127 = vector.extract_strided_slice %87 {offsets = [13, 0], sizes = [1, 32], strides = [1, 1]} : vector<16x32xf32> to vector<1x32xf32>
    %128 = vector.extract_strided_slice %87 {offsets = [14, 0], sizes = [1, 32], strides = [1, 1]} : vector<16x32xf32> to vector<1x32xf32>
    %129 = vector.extract_strided_slice %87 {offsets = [15, 0], sizes = [1, 32], strides = [1, 1]} : vector<16x32xf32> to vector<1x32xf32>
    %130 = tpu.concatenate %114, %115, %116, %117, %118, %119, %120, %121, %122, %123, %124, %125, %126, %127, %128, %129 in 1 : vector<1x32xf32>, vector<1x32xf32>, vector<1x32xf32>, vector<1x32xf32>, vector<1x32xf32>, vector<1x32xf32>, vector<1x32xf32>, vector<1x32xf32>, vector<1x32xf32>, vector<1x32xf32>, vector<1x32xf32>, vector<1x32xf32>, vector<1x32xf32>, vector<1x32xf32>, vector<1x32xf32>, vector<1x32xf32> -> vector<1x512xf32>
    %131 = vector.broadcast %130 : vector<1x512xf32> to vector<16x512xf32>
    %132 = arith.addf %84, %131 : vector<16x512xf32>
    %133 = arith.negf %132 : vector<16x512xf32>
    %134 = math.exp %133 : vector<16x512xf32>
    %cst_39 = arith.constant 1.000000e+00 : f32
    %135 = vector.broadcast %cst_39 : f32 to vector<16x512xf32>
    %136 = arith.addf %135, %134 : vector<16x512xf32>
    %137 = arith.divf %135, %136 : vector<16x512xf32>
    %138 = vector.extract_strided_slice %83 {offsets = [0, 0], sizes = [1, 32], strides = [1, 1]} : vector<8x32xf32> to vector<1x32xf32>
    %139 = vector.extract_strided_slice %83 {offsets = [1, 0], sizes = [1, 32], strides = [1, 1]} : vector<8x32xf32> to vector<1x32xf32>
    %140 = vector.extract_strided_slice %83 {offsets = [2, 0], sizes = [1, 32], strides = [1, 1]} : vector<8x32xf32> to vector<1x32xf32>
    %141 = vector.extract_strided_slice %83 {offsets = [3, 0], sizes = [1, 32], strides = [1, 1]} : vector<8x32xf32> to vector<1x32xf32>
    %142 = vector.extract_strided_slice %83 {offsets = [4, 0], sizes = [1, 32], strides = [1, 1]} : vector<8x32xf32> to vector<1x32xf32>
    %143 = vector.extract_strided_slice %83 {offsets = [5, 0], sizes = [1, 32], strides = [1, 1]} : vector<8x32xf32> to vector<1x32xf32>
    %144 = vector.extract_strided_slice %83 {offsets = [6, 0], sizes = [1, 32], strides = [1, 1]} : vector<8x32xf32> to vector<1x32xf32>
    %145 = vector.extract_strided_slice %83 {offsets = [7, 0], sizes = [1, 32], strides = [1, 1]} : vector<8x32xf32> to vector<1x32xf32>
    %146 = tpu.concatenate %138, %139, %140, %141, %142, %143, %144, %145 in 1 : vector<1x32xf32>, vector<1x32xf32>, vector<1x32xf32>, vector<1x32xf32>, vector<1x32xf32>, vector<1x32xf32>, vector<1x32xf32>, vector<1x32xf32> -> vector<1x256xf32>
    %147 = vector.broadcast %146 : vector<1x256xf32> to vector<16x256xf32>
    %148 = arith.addf %85, %147 : vector<16x256xf32>
    %149 = arith.negf %148 : vector<16x256xf32>
    %150 = math.exp %149 : vector<16x256xf32>
    %cst_40 = arith.constant 1.000000e+00 : f32
    %151 = vector.broadcast %cst_40 : f32 to vector<16x256xf32>
    %152 = arith.addf %151, %150 : vector<16x256xf32>
    %153 = arith.divf %151, %152 : vector<16x256xf32>
    %154 = vector.extract_strided_slice %18 {offsets = [0, 0], sizes = [16, 512], strides = [1, 1]} : vector<32x512xf32> to vector<16x512xf32>
    %cst_41 = arith.constant dense<0.000000e+00> : vector<8x16xf32>
    %155 = tpu.matmul %113, %154, %cst_41 {dimension_numbers = #tpu.dot_dimension_numbers<[1], [1], [0], [0], [0, 0, 1, 0], [], []>} : vector<8x512xf32>, vector<16x512xf32>, vector<8x16xf32> -> vector<8x16xf32>
    %156 = vector.extract_strided_slice %18 {offsets = [16, 0], sizes = [16, 512], strides = [1, 1]} : vector<32x512xf32> to vector<16x512xf32>
    %cst_42 = arith.constant dense<0.000000e+00> : vector<16x16xf32>
    %157 = tpu.matmul %137, %156, %cst_42 {dimension_numbers = #tpu.dot_dimension_numbers<[1], [1], [0], [0], [0, 0, 1, 0], [], []>} : vector<16x512xf32>, vector<16x512xf32>, vector<16x16xf32> -> vector<16x16xf32>
    %cst_43 = arith.constant dense<0.000000e+00> : vector<16x8xf32>
    %158 = tpu.matmul %153, %20, %cst_43 {dimension_numbers = #tpu.dot_dimension_numbers<[1], [1], [0], [0], [0, 0, 1, 0], [], []>} : vector<16x256xf32>, vector<8x256xf32>, vector<16x8xf32> -> vector<16x8xf32>
    %cst_44 = arith.constant dense<0xFF800000> : vector<16xf32>
    %159 = vector.multi_reduction <maximumf>, %155, %cst_44 [0] : vector<8x16xf32> to vector<16xf32>
    %160 = vector.shape_cast %159 : vector<16xf32> to vector<1x16xf32>
    %cst_45 = arith.constant dense<0xFF800000> : vector<16xf32>
    %161 = vector.multi_reduction <maximumf>, %157, %cst_45 [0] : vector<16x16xf32> to vector<16xf32>
    %162 = vector.shape_cast %161 : vector<16xf32> to vector<1x16xf32>
    %163 = arith.maximumf %160, %162 : vector<1x16xf32>
    %164 = vector.broadcast %163 : vector<1x16xf32> to vector<8x16xf32>
    %165 = arith.subf %155, %164 : vector<8x16xf32>
    %166 = math.exp %165 : vector<8x16xf32>
    %167 = arith.mulf %166, %3 : vector<8x16xf32>
    %168 = vector.broadcast %163 : vector<1x16xf32> to vector<16x16xf32>
    %169 = arith.subf %157, %168 : vector<16x16xf32>
    %170 = math.exp %169 : vector<16x16xf32>
    %171 = arith.mulf %170, %5 : vector<16x16xf32>
    %cst_46 = arith.constant dense<0.000000e+00> : vector<16xf32>
    %172 = vector.multi_reduction <add>, %167, %cst_46 [0] : vector<8x16xf32> to vector<16xf32>
    %173 = vector.shape_cast %172 : vector<16xf32> to vector<1x16xf32>
    %cst_47 = arith.constant dense<0.000000e+00> : vector<16xf32>
    %174 = vector.multi_reduction <add>, %171, %cst_47 [0] : vector<16x16xf32> to vector<16xf32>
    %175 = vector.shape_cast %174 : vector<16xf32> to vector<1x16xf32>
    %176 = arith.addf %173, %175 : vector<1x16xf32>
    %cst_48 = arith.constant 0.000000e+00 : f32
    %177 = vector.broadcast %cst_48 : f32 to vector<1x16xf32>
    %178 = arith.cmpf ogt, %176, %177 : vector<1x16xf32>
    %cst_49 = arith.constant 1.000000e+00 : f32
    %179 = vector.broadcast %cst_49 : f32 to vector<1x16xf32>
    %180 = arith.select %178, %176, %179 : vector<1x16xi1>, vector<1x16xf32>
    %181 = tpu.reciprocal %180 {approx = true} : vector<1x16xf32> -> vector<1x16xf32>
    %182 = vector.broadcast %181 : vector<1x16xf32> to vector<8x16xf32>
    %183 = arith.mulf %167, %182 : vector<8x16xf32>
    %cst_50 = arith.constant dense<0.000000e+00> : vector<16x32xf32>
    %184 = tpu.matmul %183, %82, %cst_50 {dimension_numbers = #tpu.dot_dimension_numbers<[0], [0], [1], [1], [0, 1, 1, 1], [], []>} : vector<8x16xf32>, vector<8x32xf32>, vector<16x32xf32> -> vector<16x32xf32>
    %185 = vector.broadcast %181 : vector<1x16xf32> to vector<16x16xf32>
    %186 = arith.mulf %171, %185 : vector<16x16xf32>
    %cst_51 = arith.constant dense<0.000000e+00> : vector<16x32xf32>
    %187 = tpu.matmul %186, %88, %cst_51 {dimension_numbers = #tpu.dot_dimension_numbers<[0], [0], [1], [1], [0, 1, 1, 1], [], []>} : vector<16x16xf32>, vector<16x32xf32>, vector<16x32xf32> -> vector<16x32xf32>
    %188 = arith.addf %184, %187 : vector<16x32xf32>
    %cst_52 = arith.constant dense<0xFF800000> : vector<8xf32>
    %189 = vector.multi_reduction <maximumf>, %158, %cst_52 [0] : vector<16x8xf32> to vector<8xf32>
    %190 = vector.shape_cast %189 : vector<8xf32> to vector<1x8xf32>
    %191 = vector.broadcast %190 : vector<1x8xf32> to vector<16x8xf32>
    %192 = arith.subf %158, %191 : vector<16x8xf32>
    %193 = math.exp %192 : vector<16x8xf32>
    %194 = arith.mulf %193, %8 : vector<16x8xf32>
    %cst_53 = arith.constant dense<0.000000e+00> : vector<8xf32>
    %195 = vector.multi_reduction <add>, %194, %cst_53 [0] : vector<16x8xf32> to vector<8xf32>
    %196 = vector.shape_cast %195 : vector<8xf32> to vector<1x8xf32>
    %cst_54 = arith.constant 0.000000e+00 : f32
    %197 = vector.broadcast %cst_54 : f32 to vector<1x8xf32>
    %198 = arith.cmpf ogt, %196, %197 : vector<1x8xf32>
    %cst_55 = arith.constant 1.000000e+00 : f32
    %199 = vector.broadcast %cst_55 : f32 to vector<1x8xf32>
    %200 = arith.select %198, %196, %199 : vector<1x8xi1>, vector<1x8xf32>
    %201 = tpu.reciprocal %200 {approx = true} : vector<1x8xf32> -> vector<1x8xf32>
    %202 = vector.broadcast %201 : vector<1x8xf32> to vector<16x8xf32>
    %203 = arith.mulf %194, %202 : vector<16x8xf32>
    %cst_56 = arith.constant dense<0.000000e+00> : vector<8x32xf32>
    %204 = tpu.matmul %203, %89, %cst_56 {dimension_numbers = #tpu.dot_dimension_numbers<[0], [0], [1], [1], [0, 1, 1, 1], [], []>} : vector<16x8xf32>, vector<16x32xf32>, vector<8x32xf32> -> vector<8x32xf32>
    %205 = vector.extract_strided_slice %16 {offsets = [0, 0], sizes = [32, 32], strides = [1, 1]} : vector<32x128xf32> to vector<32x32xf32>
    %cst_57 = arith.constant dense<0.000000e+00> : vector<16x32xf32>
    %206 = tpu.matmul %188, %205, %cst_57 {dimension_numbers = #tpu.dot_dimension_numbers<[1], [0], [0], [1], [0, 0, 1, 1], [], []>} : vector<16x32xf32>, vector<32x32xf32>, vector<16x32xf32> -> vector<16x32xf32>
    %207 = vector.extract_strided_slice %16 {offsets = [0, 32], sizes = [32, 32], strides = [1, 1]} : vector<32x128xf32> to vector<32x32xf32>
    %cst_58 = arith.constant dense<0.000000e+00> : vector<16x32xf32>
    %208 = tpu.matmul %44, %207, %cst_58 {dimension_numbers = #tpu.dot_dimension_numbers<[1], [0], [0], [1], [0, 0, 1, 1], [], []>} : vector<16x32xf32>, vector<32x32xf32>, vector<16x32xf32> -> vector<16x32xf32>
    %209 = arith.addf %206, %208 : vector<16x32xf32>
    %210 = vector.extract_strided_slice %12 {offsets = [4, 0], sizes = [1, 32], strides = [1, 1]} : vector<8x32xf32> to vector<1x32xf32>
    %211 = vector.broadcast %210 : vector<1x32xf32> to vector<16x32xf32>
    %212 = arith.addf %209, %211 : vector<16x32xf32>
    %cst_59 = arith.constant 0.000000e+00 : f32
    %213 = vector.broadcast %cst_59 : f32 to vector<16x32xf32>
    %214 = arith.cmpf oge, %212, %213 : vector<16x32xf32>
    %215 = vector.extract_strided_slice %12 {offsets = [6, 0], sizes = [1, 32], strides = [1, 1]} : vector<8x32xf32> to vector<1x32xf32>
    %216 = vector.broadcast %215 : vector<1x32xf32> to vector<16x32xf32>
    %217 = arith.mulf %216, %212 : vector<16x32xf32>
    %218 = arith.select %214, %212, %217 : vector<16x32xi1>, vector<16x32xf32>
    %219 = vector.extract_strided_slice %16 {offsets = [0, 64], sizes = [32, 32], strides = [1, 1]} : vector<32x128xf32> to vector<32x32xf32>
    %cst_60 = arith.constant dense<0.000000e+00> : vector<8x32xf32>
    %220 = tpu.matmul %204, %219, %cst_60 {dimension_numbers = #tpu.dot_dimension_numbers<[1], [0], [0], [1], [0, 0, 1, 1], [], []>} : vector<8x32xf32>, vector<32x32xf32>, vector<8x32xf32> -> vector<8x32xf32>
    %221 = vector.extract_strided_slice %16 {offsets = [0, 96], sizes = [32, 32], strides = [1, 1]} : vector<32x128xf32> to vector<32x32xf32>
    %cst_61 = arith.constant dense<0.000000e+00> : vector<8x32xf32>
    %222 = tpu.matmul %68, %221, %cst_61 {dimension_numbers = #tpu.dot_dimension_numbers<[1], [0], [0], [1], [0, 0, 1, 1], [], []>} : vector<8x32xf32>, vector<32x32xf32>, vector<8x32xf32> -> vector<8x32xf32>
    %223 = arith.addf %220, %222 : vector<8x32xf32>
    %224 = vector.extract_strided_slice %12 {offsets = [5, 0], sizes = [1, 32], strides = [1, 1]} : vector<8x32xf32> to vector<1x32xf32>
    %225 = vector.broadcast %224 : vector<1x32xf32> to vector<8x32xf32>
    %226 = arith.addf %223, %225 : vector<8x32xf32>
    %cst_62 = arith.constant 0.000000e+00 : f32
    %227 = vector.broadcast %cst_62 : f32 to vector<8x32xf32>
    %228 = arith.cmpf oge, %226, %227 : vector<8x32xf32>
    %229 = vector.extract_strided_slice %12 {offsets = [7, 0], sizes = [1, 32], strides = [1, 1]} : vector<8x32xf32> to vector<1x32xf32>
    %230 = vector.broadcast %229 : vector<1x32xf32> to vector<8x32xf32>
    %231 = arith.mulf %230, %226 : vector<8x32xf32>
    %232 = arith.select %228, %226, %231 : vector<8x32xi1>, vector<8x32xf32>
    %233 = arith.addf %218, %9 : vector<16x32xf32>
    %234 = arith.addf %232, %10 : vector<8x32xf32>
    %c1 = arith.constant 1 : index
    %c0_63 = arith.constant 0 : index
    %c0_64 = arith.constant 0 : index
    %235 = vector.load %arg9[%c1, %c0_63, %c0_64] : memref<2x8x32xf32, #tpu.memory_space<vmem>>, vector<1x8x32xf32>
    %236 = vector.shape_cast %235 : vector<1x8x32xf32> to vector<8x32xf32>
    %c1_65 = arith.constant 1 : index
    %c0_66 = arith.constant 0 : index
    %c0_67 = arith.constant 0 : index
    %237 = vector.load %arg5[%c1_65, %c0_66, %c0_67] : memref<2x2x896xf32, #tpu.memory_space<vmem>>, vector<1x2x896xf32>
    %238 = vector.shape_cast %237 : vector<1x2x896xf32> to vector<2x896xf32>
    %c1_68 = arith.constant 1 : index
    %c0_69 = arith.constant 0 : index
    %c0_70 = arith.constant 0 : index
    %239 = vector.load %arg8[%c1_68, %c0_69, %c0_70] : memref<2x32x128xf32, #tpu.memory_space<vmem>>, vector<1x32x128xf32>
    %240 = vector.shape_cast %239 : vector<1x32x128xf32> to vector<32x128xf32>
    %c1_71 = arith.constant 1 : index
    %c0_72 = arith.constant 0 : index
    %c0_73 = arith.constant 0 : index
    %241 = vector.load %arg6[%c1_71, %c0_72, %c0_73] : memref<2x32x512xf32, #tpu.memory_space<vmem>>, vector<1x32x512xf32>
    %242 = vector.shape_cast %241 : vector<1x32x512xf32> to vector<32x512xf32>
    %c1_74 = arith.constant 1 : index
    %c0_75 = arith.constant 0 : index
    %c0_76 = arith.constant 0 : index
    %243 = vector.load %arg7[%c1_74, %c0_75, %c0_76] : memref<2x8x256xf32, #tpu.memory_space<vmem>>, vector<1x8x256xf32>
    %244 = vector.shape_cast %243 : vector<1x8x256xf32> to vector<8x256xf32>
    %245 = vector.extract_strided_slice %236 {offsets = [0, 0], sizes = [1, 32], strides = [1, 1]} : vector<8x32xf32> to vector<1x32xf32>
    %246 = vector.extract_strided_slice %236 {offsets = [1, 0], sizes = [1, 32], strides = [1, 1]} : vector<8x32xf32> to vector<1x32xf32>
    %cst_77 = arith.constant dense<0.000000e+00> : vector<32xf32>
    %247 = vector.multi_reduction <add>, %233, %cst_77 [0] : vector<16x32xf32> to vector<32xf32>
    %248 = vector.shape_cast %247 : vector<32xf32> to vector<1x32xf32>
    %cst_78 = arith.constant 1.600000e+01 : f32
    %249 = vector.broadcast %cst_78 : f32 to vector<1x32xf32>
    %250 = arith.divf %248, %249 : vector<1x32xf32>
    %251 = vector.broadcast %250 : vector<1x32xf32> to vector<16x32xf32>
    %252 = arith.subf %233, %251 : vector<16x32xf32>
    %253 = arith.mulf %252, %252 : vector<16x32xf32>
    %cst_79 = arith.constant dense<0.000000e+00> : vector<32xf32>
    %254 = vector.multi_reduction <add>, %253, %cst_79 [0] : vector<16x32xf32> to vector<32xf32>
    %255 = vector.shape_cast %254 : vector<32xf32> to vector<1x32xf32>
    %cst_80 = arith.constant 1.600000e+01 : f32
    %256 = vector.broadcast %cst_80 : f32 to vector<1x32xf32>
    %257 = arith.divf %255, %256 : vector<1x32xf32>
    %258 = vector.broadcast %250 : vector<1x32xf32> to vector<16x32xf32>
    %259 = arith.subf %233, %258 : vector<16x32xf32>
    %cst_81 = arith.constant 9.99999974E-6 : f32
    %260 = vector.broadcast %cst_81 : f32 to vector<1x32xf32>
    %261 = arith.addf %257, %260 : vector<1x32xf32>
    %262 = math.rsqrt %261 : vector<1x32xf32>
    %263 = vector.broadcast %262 : vector<1x32xf32> to vector<16x32xf32>
    %264 = arith.mulf %259, %263 : vector<16x32xf32>
    %265 = vector.broadcast %245 : vector<1x32xf32> to vector<16x32xf32>
    %266 = arith.mulf %264, %265 : vector<16x32xf32>
    %267 = vector.broadcast %246 : vector<1x32xf32> to vector<16x32xf32>
    %268 = arith.addf %266, %267 : vector<16x32xf32>
    %269 = vector.extract_strided_slice %236 {offsets = [2, 0], sizes = [1, 32], strides = [1, 1]} : vector<8x32xf32> to vector<1x32xf32>
    %270 = vector.extract_strided_slice %236 {offsets = [3, 0], sizes = [1, 32], strides = [1, 1]} : vector<8x32xf32> to vector<1x32xf32>
    %cst_82 = arith.constant dense<0.000000e+00> : vector<32xf32>
    %271 = vector.multi_reduction <add>, %234, %cst_82 [0] : vector<8x32xf32> to vector<32xf32>
    %272 = vector.shape_cast %271 : vector<32xf32> to vector<1x32xf32>
    %cst_83 = arith.constant 8.000000e+00 : f32
    %273 = vector.broadcast %cst_83 : f32 to vector<1x32xf32>
    %274 = arith.divf %272, %273 : vector<1x32xf32>
    %275 = vector.broadcast %274 : vector<1x32xf32> to vector<8x32xf32>
    %276 = arith.subf %234, %275 : vector<8x32xf32>
    %277 = arith.mulf %276, %276 : vector<8x32xf32>
    %cst_84 = arith.constant dense<0.000000e+00> : vector<32xf32>
    %278 = vector.multi_reduction <add>, %277, %cst_84 [0] : vector<8x32xf32> to vector<32xf32>
    %279 = vector.shape_cast %278 : vector<32xf32> to vector<1x32xf32>
    %cst_85 = arith.constant 8.000000e+00 : f32
    %280 = vector.broadcast %cst_85 : f32 to vector<1x32xf32>
    %281 = arith.divf %279, %280 : vector<1x32xf32>
    %282 = vector.broadcast %274 : vector<1x32xf32> to vector<8x32xf32>
    %283 = arith.subf %234, %282 : vector<8x32xf32>
    %cst_86 = arith.constant 9.99999974E-6 : f32
    %284 = vector.broadcast %cst_86 : f32 to vector<1x32xf32>
    %285 = arith.addf %281, %284 : vector<1x32xf32>
    %286 = math.rsqrt %285 : vector<1x32xf32>
    %287 = vector.broadcast %286 : vector<1x32xf32> to vector<8x32xf32>
    %288 = arith.mulf %283, %287 : vector<8x32xf32>
    %289 = vector.broadcast %269 : vector<1x32xf32> to vector<8x32xf32>
    %290 = arith.mulf %288, %289 : vector<8x32xf32>
    %291 = vector.broadcast %270 : vector<1x32xf32> to vector<8x32xf32>
    %292 = arith.addf %290, %291 : vector<8x32xf32>
    %c1_87 = arith.constant 1 : index
    %c0_88 = arith.constant 0 : index
    %c0_89 = arith.constant 0 : index
    %293 = vector.load %arg3[%c1_87, %c0_88, %c0_89] : memref<2x32x576xf32, #tpu.memory_space<vmem>>, vector<1x32x576xf32>
    %294 = vector.shape_cast %293 : vector<1x32x576xf32> to vector<32x576xf32>
    %cst_90 = arith.constant dense<0.000000e+00> : vector<8x576xf32>
    %295 = tpu.matmul %292, %294, %cst_90 {dimension_numbers = #tpu.dot_dimension_numbers<[1], [0], [0], [1], [0, 0, 1, 1], [], []>} : vector<8x32xf32>, vector<32x576xf32>, vector<8x576xf32> -> vector<8x576xf32>
    %296 = vector.extract_strided_slice %238 {offsets = [0, 0], sizes = [1, 576], strides = [1, 1]} : vector<2x896xf32> to vector<1x576xf32>
    %297 = vector.broadcast %296 : vector<1x576xf32> to vector<8x576xf32>
    %298 = arith.addf %295, %297 : vector<8x576xf32>
    %c1_91 = arith.constant 1 : index
    %c0_92 = arith.constant 0 : index
    %c0_93 = arith.constant 0 : index
    %299 = vector.load %arg4[%c1_91, %c0_92, %c0_93] : memref<2x32x896xf32, #tpu.memory_space<vmem>>, vector<1x32x896xf32>
    %300 = vector.shape_cast %299 : vector<1x32x896xf32> to vector<32x896xf32>
    %cst_94 = arith.constant dense<0.000000e+00> : vector<16x896xf32>
    %301 = tpu.matmul %268, %300, %cst_94 {dimension_numbers = #tpu.dot_dimension_numbers<[1], [0], [0], [1], [0, 0, 1, 1], [], []>} : vector<16x32xf32>, vector<32x896xf32>, vector<16x896xf32> -> vector<16x896xf32>
    %302 = vector.extract_strided_slice %238 {offsets = [1, 0], sizes = [1, 896], strides = [1, 1]} : vector<2x896xf32> to vector<1x896xf32>
    %303 = vector.broadcast %302 : vector<1x896xf32> to vector<16x896xf32>
    %304 = arith.addf %301, %303 : vector<16x896xf32>
    %305 = vector.extract_strided_slice %298 {offsets = [0, 0], sizes = [8, 512], strides = [1, 1]} : vector<8x576xf32> to vector<8x512xf32>
    %306 = vector.extract_strided_slice %298 {offsets = [0, 512], sizes = [8, 32], strides = [1, 1]} : vector<8x576xf32> to vector<8x32xf32>
    %307 = vector.extract_strided_slice %298 {offsets = [0, 544], sizes = [8, 32], strides = [1, 1]} : vector<8x576xf32> to vector<8x32xf32>
    %308 = vector.extract_strided_slice %304 {offsets = [0, 0], sizes = [16, 512], strides = [1, 1]} : vector<16x896xf32> to vector<16x512xf32>
    %309 = vector.extract_strided_slice %304 {offsets = [0, 512], sizes = [16, 256], strides = [1, 1]} : vector<16x896xf32> to vector<16x256xf32>
    %310 = vector.extract_strided_slice %304 {offsets = [0, 768], sizes = [16, 32], strides = [1, 1]} : vector<16x896xf32> to vector<16x32xf32>
    %311 = vector.extract_strided_slice %304 {offsets = [0, 800], sizes = [16, 32], strides = [1, 1]} : vector<16x896xf32> to vector<16x32xf32>
    %312 = vector.extract_strided_slice %304 {offsets = [0, 832], sizes = [16, 32], strides = [1, 1]} : vector<16x896xf32> to vector<16x32xf32>
    %313 = vector.extract_strided_slice %304 {offsets = [0, 864], sizes = [16, 32], strides = [1, 1]} : vector<16x896xf32> to vector<16x32xf32>
    %314 = vector.extract_strided_slice %310 {offsets = [0, 0], sizes = [1, 32], strides = [1, 1]} : vector<16x32xf32> to vector<1x32xf32>
    %315 = vector.extract_strided_slice %310 {offsets = [1, 0], sizes = [1, 32], strides = [1, 1]} : vector<16x32xf32> to vector<1x32xf32>
    %316 = vector.extract_strided_slice %310 {offsets = [2, 0], sizes = [1, 32], strides = [1, 1]} : vector<16x32xf32> to vector<1x32xf32>
    %317 = vector.extract_strided_slice %310 {offsets = [3, 0], sizes = [1, 32], strides = [1, 1]} : vector<16x32xf32> to vector<1x32xf32>
    %318 = vector.extract_strided_slice %310 {offsets = [4, 0], sizes = [1, 32], strides = [1, 1]} : vector<16x32xf32> to vector<1x32xf32>
    %319 = vector.extract_strided_slice %310 {offsets = [5, 0], sizes = [1, 32], strides = [1, 1]} : vector<16x32xf32> to vector<1x32xf32>
    %320 = vector.extract_strided_slice %310 {offsets = [6, 0], sizes = [1, 32], strides = [1, 1]} : vector<16x32xf32> to vector<1x32xf32>
    %321 = vector.extract_strided_slice %310 {offsets = [7, 0], sizes = [1, 32], strides = [1, 1]} : vector<16x32xf32> to vector<1x32xf32>
    %322 = vector.extract_strided_slice %310 {offsets = [8, 0], sizes = [1, 32], strides = [1, 1]} : vector<16x32xf32> to vector<1x32xf32>
    %323 = vector.extract_strided_slice %310 {offsets = [9, 0], sizes = [1, 32], strides = [1, 1]} : vector<16x32xf32> to vector<1x32xf32>
    %324 = vector.extract_strided_slice %310 {offsets = [10, 0], sizes = [1, 32], strides = [1, 1]} : vector<16x32xf32> to vector<1x32xf32>
    %325 = vector.extract_strided_slice %310 {offsets = [11, 0], sizes = [1, 32], strides = [1, 1]} : vector<16x32xf32> to vector<1x32xf32>
    %326 = vector.extract_strided_slice %310 {offsets = [12, 0], sizes = [1, 32], strides = [1, 1]} : vector<16x32xf32> to vector<1x32xf32>
    %327 = vector.extract_strided_slice %310 {offsets = [13, 0], sizes = [1, 32], strides = [1, 1]} : vector<16x32xf32> to vector<1x32xf32>
    %328 = vector.extract_strided_slice %310 {offsets = [14, 0], sizes = [1, 32], strides = [1, 1]} : vector<16x32xf32> to vector<1x32xf32>
    %329 = vector.extract_strided_slice %310 {offsets = [15, 0], sizes = [1, 32], strides = [1, 1]} : vector<16x32xf32> to vector<1x32xf32>
    %330 = tpu.concatenate %314, %315, %316, %317, %318, %319, %320, %321, %322, %323, %324, %325, %326, %327, %328, %329 in 1 : vector<1x32xf32>, vector<1x32xf32>, vector<1x32xf32>, vector<1x32xf32>, vector<1x32xf32>, vector<1x32xf32>, vector<1x32xf32>, vector<1x32xf32>, vector<1x32xf32>, vector<1x32xf32>, vector<1x32xf32>, vector<1x32xf32>, vector<1x32xf32>, vector<1x32xf32>, vector<1x32xf32>, vector<1x32xf32> -> vector<1x512xf32>
    %331 = vector.broadcast %330 : vector<1x512xf32> to vector<8x512xf32>
    %332 = arith.addf %305, %331 : vector<8x512xf32>
    %333 = arith.negf %332 : vector<8x512xf32>
    %334 = math.exp %333 : vector<8x512xf32>
    %cst_95 = arith.constant 1.000000e+00 : f32
    %335 = vector.broadcast %cst_95 : f32 to vector<8x512xf32>
    %336 = arith.addf %335, %334 : vector<8x512xf32>
    %337 = arith.divf %335, %336 : vector<8x512xf32>
    %338 = vector.extract_strided_slice %311 {offsets = [0, 0], sizes = [1, 32], strides = [1, 1]} : vector<16x32xf32> to vector<1x32xf32>
    %339 = vector.extract_strided_slice %311 {offsets = [1, 0], sizes = [1, 32], strides = [1, 1]} : vector<16x32xf32> to vector<1x32xf32>
    %340 = vector.extract_strided_slice %311 {offsets = [2, 0], sizes = [1, 32], strides = [1, 1]} : vector<16x32xf32> to vector<1x32xf32>
    %341 = vector.extract_strided_slice %311 {offsets = [3, 0], sizes = [1, 32], strides = [1, 1]} : vector<16x32xf32> to vector<1x32xf32>
    %342 = vector.extract_strided_slice %311 {offsets = [4, 0], sizes = [1, 32], strides = [1, 1]} : vector<16x32xf32> to vector<1x32xf32>
    %343 = vector.extract_strided_slice %311 {offsets = [5, 0], sizes = [1, 32], strides = [1, 1]} : vector<16x32xf32> to vector<1x32xf32>
    %344 = vector.extract_strided_slice %311 {offsets = [6, 0], sizes = [1, 32], strides = [1, 1]} : vector<16x32xf32> to vector<1x32xf32>
    %345 = vector.extract_strided_slice %311 {offsets = [7, 0], sizes = [1, 32], strides = [1, 1]} : vector<16x32xf32> to vector<1x32xf32>
    %346 = vector.extract_strided_slice %311 {offsets = [8, 0], sizes = [1, 32], strides = [1, 1]} : vector<16x32xf32> to vector<1x32xf32>
    %347 = vector.extract_strided_slice %311 {offsets = [9, 0], sizes = [1, 32], strides = [1, 1]} : vector<16x32xf32> to vector<1x32xf32>
    %348 = vector.extract_strided_slice %311 {offsets = [10, 0], sizes = [1, 32], strides = [1, 1]} : vector<16x32xf32> to vector<1x32xf32>
    %349 = vector.extract_strided_slice %311 {offsets = [11, 0], sizes = [1, 32], strides = [1, 1]} : vector<16x32xf32> to vector<1x32xf32>
    %350 = vector.extract_strided_slice %311 {offsets = [12, 0], sizes = [1, 32], strides = [1, 1]} : vector<16x32xf32> to vector<1x32xf32>
    %351 = vector.extract_strided_slice %311 {offsets = [13, 0], sizes = [1, 32], strides = [1, 1]} : vector<16x32xf32> to vector<1x32xf32>
    %352 = vector.extract_strided_slice %311 {offsets = [14, 0], sizes = [1, 32], strides = [1, 1]} : vector<16x32xf32> to vector<1x32xf32>
    %353 = vector.extract_strided_slice %311 {offsets = [15, 0], sizes = [1, 32], strides = [1, 1]} : vector<16x32xf32> to vector<1x32xf32>
    %354 = tpu.concatenate %338, %339, %340, %341, %342, %343, %344, %345, %346, %347, %348, %349, %350, %351, %352, %353 in 1 : vector<1x32xf32>, vector<1x32xf32>, vector<1x32xf32>, vector<1x32xf32>, vector<1x32xf32>, vector<1x32xf32>, vector<1x32xf32>, vector<1x32xf32>, vector<1x32xf32>, vector<1x32xf32>, vector<1x32xf32>, vector<1x32xf32>, vector<1x32xf32>, vector<1x32xf32>, vector<1x32xf32>, vector<1x32xf32> -> vector<1x512xf32>
    %355 = vector.broadcast %354 : vector<1x512xf32> to vector<16x512xf32>
    %356 = arith.addf %308, %355 : vector<16x512xf32>
    %357 = arith.negf %356 : vector<16x512xf32>
    %358 = math.exp %357 : vector<16x512xf32>
    %cst_96 = arith.constant 1.000000e+00 : f32
    %359 = vector.broadcast %cst_96 : f32 to vector<16x512xf32>
    %360 = arith.addf %359, %358 : vector<16x512xf32>
    %361 = arith.divf %359, %360 : vector<16x512xf32>
    %362 = vector.extract_strided_slice %307 {offsets = [0, 0], sizes = [1, 32], strides = [1, 1]} : vector<8x32xf32> to vector<1x32xf32>
    %363 = vector.extract_strided_slice %307 {offsets = [1, 0], sizes = [1, 32], strides = [1, 1]} : vector<8x32xf32> to vector<1x32xf32>
    %364 = vector.extract_strided_slice %307 {offsets = [2, 0], sizes = [1, 32], strides = [1, 1]} : vector<8x32xf32> to vector<1x32xf32>
    %365 = vector.extract_strided_slice %307 {offsets = [3, 0], sizes = [1, 32], strides = [1, 1]} : vector<8x32xf32> to vector<1x32xf32>
    %366 = vector.extract_strided_slice %307 {offsets = [4, 0], sizes = [1, 32], strides = [1, 1]} : vector<8x32xf32> to vector<1x32xf32>
    %367 = vector.extract_strided_slice %307 {offsets = [5, 0], sizes = [1, 32], strides = [1, 1]} : vector<8x32xf32> to vector<1x32xf32>
    %368 = vector.extract_strided_slice %307 {offsets = [6, 0], sizes = [1, 32], strides = [1, 1]} : vector<8x32xf32> to vector<1x32xf32>
    %369 = vector.extract_strided_slice %307 {offsets = [7, 0], sizes = [1, 32], strides = [1, 1]} : vector<8x32xf32> to vector<1x32xf32>
    %370 = tpu.concatenate %362, %363, %364, %365, %366, %367, %368, %369 in 1 : vector<1x32xf32>, vector<1x32xf32>, vector<1x32xf32>, vector<1x32xf32>, vector<1x32xf32>, vector<1x32xf32>, vector<1x32xf32>, vector<1x32xf32> -> vector<1x256xf32>
    %371 = vector.broadcast %370 : vector<1x256xf32> to vector<16x256xf32>
    %372 = arith.addf %309, %371 : vector<16x256xf32>
    %373 = arith.negf %372 : vector<16x256xf32>
    %374 = math.exp %373 : vector<16x256xf32>
    %cst_97 = arith.constant 1.000000e+00 : f32
    %375 = vector.broadcast %cst_97 : f32 to vector<16x256xf32>
    %376 = arith.addf %375, %374 : vector<16x256xf32>
    %377 = arith.divf %375, %376 : vector<16x256xf32>
    %378 = vector.extract_strided_slice %242 {offsets = [0, 0], sizes = [16, 512], strides = [1, 1]} : vector<32x512xf32> to vector<16x512xf32>
    %cst_98 = arith.constant dense<0.000000e+00> : vector<8x16xf32>
    %379 = tpu.matmul %337, %378, %cst_98 {dimension_numbers = #tpu.dot_dimension_numbers<[1], [1], [0], [0], [0, 0, 1, 0], [], []>} : vector<8x512xf32>, vector<16x512xf32>, vector<8x16xf32> -> vector<8x16xf32>
    %380 = vector.extract_strided_slice %242 {offsets = [16, 0], sizes = [16, 512], strides = [1, 1]} : vector<32x512xf32> to vector<16x512xf32>
    %cst_99 = arith.constant dense<0.000000e+00> : vector<16x16xf32>
    %381 = tpu.matmul %361, %380, %cst_99 {dimension_numbers = #tpu.dot_dimension_numbers<[1], [1], [0], [0], [0, 0, 1, 0], [], []>} : vector<16x512xf32>, vector<16x512xf32>, vector<16x16xf32> -> vector<16x16xf32>
    %cst_100 = arith.constant dense<0.000000e+00> : vector<16x8xf32>
    %382 = tpu.matmul %377, %244, %cst_100 {dimension_numbers = #tpu.dot_dimension_numbers<[1], [1], [0], [0], [0, 0, 1, 0], [], []>} : vector<16x256xf32>, vector<8x256xf32>, vector<16x8xf32> -> vector<16x8xf32>
    %cst_101 = arith.constant dense<0xFF800000> : vector<16xf32>
    %383 = vector.multi_reduction <maximumf>, %379, %cst_101 [0] : vector<8x16xf32> to vector<16xf32>
    %384 = vector.shape_cast %383 : vector<16xf32> to vector<1x16xf32>
    %cst_102 = arith.constant dense<0xFF800000> : vector<16xf32>
    %385 = vector.multi_reduction <maximumf>, %381, %cst_102 [0] : vector<16x16xf32> to vector<16xf32>
    %386 = vector.shape_cast %385 : vector<16xf32> to vector<1x16xf32>
    %387 = arith.maximumf %384, %386 : vector<1x16xf32>
    %388 = vector.broadcast %387 : vector<1x16xf32> to vector<8x16xf32>
    %389 = arith.subf %379, %388 : vector<8x16xf32>
    %390 = math.exp %389 : vector<8x16xf32>
    %391 = arith.mulf %390, %3 : vector<8x16xf32>
    %392 = vector.broadcast %387 : vector<1x16xf32> to vector<16x16xf32>
    %393 = arith.subf %381, %392 : vector<16x16xf32>
    %394 = math.exp %393 : vector<16x16xf32>
    %395 = arith.mulf %394, %5 : vector<16x16xf32>
    %cst_103 = arith.constant dense<0.000000e+00> : vector<16xf32>
    %396 = vector.multi_reduction <add>, %391, %cst_103 [0] : vector<8x16xf32> to vector<16xf32>
    %397 = vector.shape_cast %396 : vector<16xf32> to vector<1x16xf32>
    %cst_104 = arith.constant dense<0.000000e+00> : vector<16xf32>
    %398 = vector.multi_reduction <add>, %395, %cst_104 [0] : vector<16x16xf32> to vector<16xf32>
    %399 = vector.shape_cast %398 : vector<16xf32> to vector<1x16xf32>
    %400 = arith.addf %397, %399 : vector<1x16xf32>
    %cst_105 = arith.constant 0.000000e+00 : f32
    %401 = vector.broadcast %cst_105 : f32 to vector<1x16xf32>
    %402 = arith.cmpf ogt, %400, %401 : vector<1x16xf32>
    %cst_106 = arith.constant 1.000000e+00 : f32
    %403 = vector.broadcast %cst_106 : f32 to vector<1x16xf32>
    %404 = arith.select %402, %400, %403 : vector<1x16xi1>, vector<1x16xf32>
    %405 = tpu.reciprocal %404 {approx = true} : vector<1x16xf32> -> vector<1x16xf32>
    %406 = vector.broadcast %405 : vector<1x16xf32> to vector<8x16xf32>
    %407 = arith.mulf %391, %406 : vector<8x16xf32>
    %cst_107 = arith.constant dense<0.000000e+00> : vector<16x32xf32>
    %408 = tpu.matmul %407, %306, %cst_107 {dimension_numbers = #tpu.dot_dimension_numbers<[0], [0], [1], [1], [0, 1, 1, 1], [], []>} : vector<8x16xf32>, vector<8x32xf32>, vector<16x32xf32> -> vector<16x32xf32>
    %409 = vector.broadcast %405 : vector<1x16xf32> to vector<16x16xf32>
    %410 = arith.mulf %395, %409 : vector<16x16xf32>
    %cst_108 = arith.constant dense<0.000000e+00> : vector<16x32xf32>
    %411 = tpu.matmul %410, %312, %cst_108 {dimension_numbers = #tpu.dot_dimension_numbers<[0], [0], [1], [1], [0, 1, 1, 1], [], []>} : vector<16x16xf32>, vector<16x32xf32>, vector<16x32xf32> -> vector<16x32xf32>
    %412 = arith.addf %408, %411 : vector<16x32xf32>
    %cst_109 = arith.constant dense<0xFF800000> : vector<8xf32>
    %413 = vector.multi_reduction <maximumf>, %382, %cst_109 [0] : vector<16x8xf32> to vector<8xf32>
    %414 = vector.shape_cast %413 : vector<8xf32> to vector<1x8xf32>
    %415 = vector.broadcast %414 : vector<1x8xf32> to vector<16x8xf32>
    %416 = arith.subf %382, %415 : vector<16x8xf32>
    %417 = math.exp %416 : vector<16x8xf32>
    %418 = arith.mulf %417, %8 : vector<16x8xf32>
    %cst_110 = arith.constant dense<0.000000e+00> : vector<8xf32>
    %419 = vector.multi_reduction <add>, %418, %cst_110 [0] : vector<16x8xf32> to vector<8xf32>
    %420 = vector.shape_cast %419 : vector<8xf32> to vector<1x8xf32>
    %cst_111 = arith.constant 0.000000e+00 : f32
    %421 = vector.broadcast %cst_111 : f32 to vector<1x8xf32>
    %422 = arith.cmpf ogt, %420, %421 : vector<1x8xf32>
    %cst_112 = arith.constant 1.000000e+00 : f32
    %423 = vector.broadcast %cst_112 : f32 to vector<1x8xf32>
    %424 = arith.select %422, %420, %423 : vector<1x8xi1>, vector<1x8xf32>
    %425 = tpu.reciprocal %424 {approx = true} : vector<1x8xf32> -> vector<1x8xf32>
    %426 = vector.broadcast %425 : vector<1x8xf32> to vector<16x8xf32>
    %427 = arith.mulf %418, %426 : vector<16x8xf32>
    %cst_113 = arith.constant dense<0.000000e+00> : vector<8x32xf32>
    %428 = tpu.matmul %427, %313, %cst_113 {dimension_numbers = #tpu.dot_dimension_numbers<[0], [0], [1], [1], [0, 1, 1, 1], [], []>} : vector<16x8xf32>, vector<16x32xf32>, vector<8x32xf32> -> vector<8x32xf32>
    %429 = vector.extract_strided_slice %240 {offsets = [0, 0], sizes = [32, 32], strides = [1, 1]} : vector<32x128xf32> to vector<32x32xf32>
    %cst_114 = arith.constant dense<0.000000e+00> : vector<16x32xf32>
    %430 = tpu.matmul %412, %429, %cst_114 {dimension_numbers = #tpu.dot_dimension_numbers<[1], [0], [0], [1], [0, 0, 1, 1], [], []>} : vector<16x32xf32>, vector<32x32xf32>, vector<16x32xf32> -> vector<16x32xf32>
    %431 = vector.extract_strided_slice %240 {offsets = [0, 32], sizes = [32, 32], strides = [1, 1]} : vector<32x128xf32> to vector<32x32xf32>
    %cst_115 = arith.constant dense<0.000000e+00> : vector<16x32xf32>
    %432 = tpu.matmul %268, %431, %cst_115 {dimension_numbers = #tpu.dot_dimension_numbers<[1], [0], [0], [1], [0, 0, 1, 1], [], []>} : vector<16x32xf32>, vector<32x32xf32>, vector<16x32xf32> -> vector<16x32xf32>
    %433 = arith.addf %430, %432 : vector<16x32xf32>
    %434 = vector.extract_strided_slice %236 {offsets = [4, 0], sizes = [1, 32], strides = [1, 1]} : vector<8x32xf32> to vector<1x32xf32>
    %435 = vector.broadcast %434 : vector<1x32xf32> to vector<16x32xf32>
    %436 = arith.addf %433, %435 : vector<16x32xf32>
    %cst_116 = arith.constant 0.000000e+00 : f32
    %437 = vector.broadcast %cst_116 : f32 to vector<16x32xf32>
    %438 = arith.cmpf oge, %436, %437 : vector<16x32xf32>
    %439 = vector.extract_strided_slice %236 {offsets = [6, 0], sizes = [1, 32], strides = [1, 1]} : vector<8x32xf32> to vector<1x32xf32>
    %440 = vector.broadcast %439 : vector<1x32xf32> to vector<16x32xf32>
    %441 = arith.mulf %440, %436 : vector<16x32xf32>
    %442 = arith.select %438, %436, %441 : vector<16x32xi1>, vector<16x32xf32>
    %443 = vector.extract_strided_slice %240 {offsets = [0, 64], sizes = [32, 32], strides = [1, 1]} : vector<32x128xf32> to vector<32x32xf32>
    %cst_117 = arith.constant dense<0.000000e+00> : vector<8x32xf32>
    %444 = tpu.matmul %428, %443, %cst_117 {dimension_numbers = #tpu.dot_dimension_numbers<[1], [0], [0], [1], [0, 0, 1, 1], [], []>} : vector<8x32xf32>, vector<32x32xf32>, vector<8x32xf32> -> vector<8x32xf32>
    %445 = vector.extract_strided_slice %240 {offsets = [0, 96], sizes = [32, 32], strides = [1, 1]} : vector<32x128xf32> to vector<32x32xf32>
    %cst_118 = arith.constant dense<0.000000e+00> : vector<8x32xf32>
    %446 = tpu.matmul %292, %445, %cst_118 {dimension_numbers = #tpu.dot_dimension_numbers<[1], [0], [0], [1], [0, 0, 1, 1], [], []>} : vector<8x32xf32>, vector<32x32xf32>, vector<8x32xf32> -> vector<8x32xf32>
    %447 = arith.addf %444, %446 : vector<8x32xf32>
    %448 = vector.extract_strided_slice %236 {offsets = [5, 0], sizes = [1, 32], strides = [1, 1]} : vector<8x32xf32> to vector<1x32xf32>
    %449 = vector.broadcast %448 : vector<1x32xf32> to vector<8x32xf32>
    %450 = arith.addf %447, %449 : vector<8x32xf32>
    %cst_119 = arith.constant 0.000000e+00 : f32
    %451 = vector.broadcast %cst_119 : f32 to vector<8x32xf32>
    %452 = arith.cmpf oge, %450, %451 : vector<8x32xf32>
    %453 = vector.extract_strided_slice %236 {offsets = [7, 0], sizes = [1, 32], strides = [1, 1]} : vector<8x32xf32> to vector<1x32xf32>
    %454 = vector.broadcast %453 : vector<1x32xf32> to vector<8x32xf32>
    %455 = arith.mulf %454, %450 : vector<8x32xf32>
    %456 = arith.select %452, %450, %455 : vector<8x32xi1>, vector<8x32xf32>
    %457 = arith.addf %442, %233 : vector<16x32xf32>
    %458 = arith.addf %456, %234 : vector<8x32xf32>
    %c0_120 = arith.constant 0 : index
    %c0_121 = arith.constant 0 : index
    %459 = vector.load %arg10[%c0_120, %c0_121] : memref<16x32xf32, #tpu.memory_space<vmem>>, vector<16x32xf32>
    tpu.vector_store %arg10[%c0_120, %c0_121], %457 {strides = array<i32>} : memref<16x32xf32, #tpu.memory_space<vmem>>, vector<16x32xf32>,
    %c0_122 = arith.constant 0 : index
    %c0_123 = arith.constant 0 : index
    %460 = vector.load %arg11[%c0_122, %c0_123] : memref<8x32xf32, #tpu.memory_space<vmem>>, vector<8x32xf32>
    tpu.vector_store %arg11[%c0_122, %c0_123], %458 {strides = array<i32>} : memref<8x32xf32, #tpu.memory_space<vmem>>, vector<8x32xf32>,
    return
  }
}

</mosaic_0001>

<bundles_post_ra>
// kernel: hkge_forward_pallas.1
= control target key start
LH: loop header
LB: loop body
LE: loop exit
PB: predicated region body
PF: predicated region fallthrough
CT: control target
= control target key end

     0   :  { %17 = vsyncpa [#allocation3], 0  ;;  %s6331_s0 = inlined_call_operand.hbm [shape: f32[16,32], index: 0, kind: input, shape index: {}, may-alias: {0,10}]   ;;  %s6332_s1 = inlined_call_operand.hbm [shape: f32[8,32], index: 1, kind: input, shape index: {}, may-alias: {1,11}]   ;;  %s6333_s2 = inlined_call_operand.vmem [shape: f32[3,16,16], index: 2, kind: input, shape index: {}]   ;;  %s6334_s3 = inlined_call_operand.hbm [shape: f32[2,32,576], index: 3, kind: input, shape index: {}]   ;;  %s6335_s4 = inlined_call_operand.hbm [shape: f32[2,32,896], index: 4, kind: input, shape index: {}]   ;;  %s6336_s5 = inlined_call_operand.hbm [shape: f32[2,2,896], index: 5, kind: input, shape index: {}]   ;;  %s6337_s6 = inlined_call_operand.hbm [shape: f32[2,32,512], index: 6, kind: input, shape index: {}]   ;;  %s6338_s7 = inlined_call_operand.hbm [shape: f32[2,8,256], index: 7, kind: input, shape index: {}]   ;;  %s6339_s8 = inlined_call_operand.hbm [shape: f32[2,32,128], index: 8, kind: input, shape index: {}]   ;;  %s6340_s9 = inlined_call_operand.hbm [shape: f32[2,8,32], index: 9, kind: input, shape index: {}]   ;;  %s6341_s10 = inlined_call_operand.hbm [shape: f32[16,32], index: 10, kind: output, shape index: {0}, may-alias: {0,10}]   ;;  %s6342_s11 = inlined_call_operand.hbm [shape: f32[8,32], index: 11, kind: output, shape index: {1}, may-alias: {1,11}]  }
   0x1   :  { %18 = vsyncpa [#allocation6], 0 }
   0x2   :  { %19 = vsyncpa [#allocation9], 0 }
   0x3   :  { %20 = vsyncpa [#allocation12], 0 }
   0x4   :  { %21 = vsyncpa [#allocation15], 0 }
   0x5   :  { %22 = vsyncpa [#allocation4], 0 }
   0x6   :  { %23 = vsyncpa [#allocation19], 0  ;;  %s5478_s17 = smov [#allocation5]   ;;  %s5479_s19 = smov [#allocation8]  }
   0x7   :  { %s42_s18 = sshll.u32 %s5478_s17, 4  ;;  %s65_s20 = sshll.u32 %s5479_s19, 4  ;;  %s43_s18 = int_to_ptr.vmem [resolvable:$true] %s42_s18  ;;  %s66_s20 = int_to_ptr.vmem [resolvable:$true] %s65_s20 }
   0x8   :  { %s5252_s21 = scalar_lea.vmem %s43_s18, 128  ;;  %p5257_p1 = scmp.lt.s32.totalorder %s43_s18, %s43_s18 }
   0x9   :  { %p5253_p0 = scmp.ne.s32.totalorder %s43_s18, %s5252_s21  ;;  %p5258_p2 = scmp.lt.s32.totalorder %s5252_s21, %s5252_s21 }
   0xb   :  { %p5259_p3 = por %p5258_p2, %p5257_p1 }
   0xd   :  { %p5260_p4 = pnand %p5259_p3, %p5253_p0 }
   0xf   :  { %5263 = shalt.err (!%p5260_p4)
}
  0x10   :  { %45 = dma.hbm_to_vmem [thread:$0]  %s6332_s1, 128, %s43_s18, [#allocation6]  }
  0x11   :  { %s5272_s24 = scalar_lea.vmem %s66_s20, 7168  ;;  %p5277_p6 = scmp.lt.s32.totalorder %s66_s20, %s66_s20 }
  0x12   :  { %p5273_p5 = scmp.ne.s32.totalorder %s66_s20, %s5272_s24  ;;  %p5278_p7 = scmp.lt.s32.totalorder %s5272_s24, %s5272_s24 }
  0x14   :  { %p5279_p8 = por %p5278_p7, %p5277_p6 }
  0x16   :  { %p5280_p9 = pnand %p5279_p8, %p5273_p5 }
  0x18   :  { %5283 = shalt.err (!%p5280_p9)
}
  0x19   :  { %s5480_s25 = smov 896   ;;  %s5481_s26 = smov 56  }
  0x1a   :  { %71 = dma.hbm_to_vmem [thread:$0]  %s6335_s4, 7168, %s66_s20, [#allocation9], %s5480_s25, %s5480_s25, %s5481_s26  }
  0x1b   :  { %s5482_s29 = smov [#allocation11]  }
  0x1c   :  { %s89_s30 = sshll.u32 %s5482_s29, 4  ;;  %s90_s30 = int_to_ptr.vmem [resolvable:$true] %s89_s30 }
  0x1d   :  { %s5292_s12 = scalar_lea.vmem %s90_s30, 4096  ;;  %p5297_p11 = scmp.lt.s32.totalorder %s90_s30, %s90_s30 }
  0x1e   :  { %p5293_p10 = scmp.ne.s32.totalorder %s90_s30, %s5292_s12  ;;  %p5298_p12 = scmp.lt.s32.totalorder %s5292_s12, %s5292_s12 }
  0x20   :  { %p5299_p13 = por %p5298_p12, %p5297_p11 }
  0x22   :  { %p5300_p0 = pnand %p5299_p13, %p5293_p10 }
  0x24   :  { %5303 = shalt.err (!%p5300_p0)
}
  0x25   :  { %s5483_s1 = smov 512   ;;  %s5484_s13 = smov 32  }
  0x26   :  { %95 = dma.hbm_to_vmem [thread:$0]  %s6337_s6, 4096, %s90_s30, [#allocation12], %s5483_s1, %s5483_s1, %s5484_s13  }
  0x27   :  { %s5485_s16 = smov [#allocation14]   ;;  %s5486_s4 = smov [#allocation2]  }
  0x28   :  { %s113_s17 = sshll.u32 %s5485_s16, 4  ;;  %s29_s18 = sshll.u32 %s5486_s4, 4  ;;  %s114_s17 = int_to_ptr.vmem [resolvable:$true] %s113_s17  ;;  %s30_s18 = int_to_ptr.vmem [resolvable:$true] %s29_s18 }
  0x29   :  { %s5312_s19 = scalar_lea.vmem %s114_s17, 1024  ;;  %p5317_p2 = scmp.lt.s32.totalorder %s114_s17, %s114_s17 }
  0x2a   :  { %p5313_p1 = scmp.ne.s32.totalorder %s114_s17, %s5312_s19  ;;  %p5318_p3 = scmp.lt.s32.totalorder %s5312_s19, %s5312_s19 }
  0x2c   :  { %p5319_p4 = por %p5318_p3, %p5317_p2 }
  0x2e   :  { %p5320_p5 = pnand %p5319_p4, %p5313_p1 }
  0x30   :  { %5323 = shalt.err (!%p5320_p5)
}
  0x31   :  { %s5487_s20 = smov 128   ;;  %s5488_s21 = smov 8  }
  0x32   :  { %119 = dma.hbm_to_vmem [thread:$0]  %s6339_s8, 1024, %s114_s17, [#allocation15], %s5487_s20, %s5487_s20, %s5488_s21  }
  0x33   :  { %s5332_s6 = scalar_lea.vmem %s30_s18, 256  ;;  %p5337_p7 = scmp.lt.s32.totalorder %s30_s18, %s30_s18 }
  0x34   :  { %p5333_p6 = scmp.ne.s32.totalorder %s30_s18, %s5332_s6  ;;  %p5338_p8 = scmp.lt.s32.totalorder %s5332_s6, %s5332_s6 }
  0x36   :  { %p5339_p9 = por %p5338_p8, %p5337_p7 }
  0x38   :  { %p5340_p10 = pnand %p5339_p9, %p5333_p6 }
  0x3a   :  { %5343 = shalt.err (!%p5340_p10)
}
  0x3b   :  { %35 = dma.hbm_to_vmem [thread:$0]  %s6331_s0, 256, %s30_s18, [#allocation3], %s5487_s20, %s5487_s20, %s5488_s21  }
  0x3c   :  { %s5489_s26 = smov [#allocation7]  }
  0x3d   :  { %s53_s27 = sshll.u32 %s5489_s26, 4  ;;  %s54_s27 = int_to_ptr.vmem [resolvable:$true] %s53_s27 }
  0x3e   :  { %s5352_s28 = scalar_lea.vmem %s54_s27, 5120  ;;  %p5357_p12 = scmp.lt.s32.totalorder %s54_s27, %s54_s27 }
  0x3f   :  { %p5353_p11 = scmp.ne.s32.totalorder %s54_s27, %s5352_s28  ;;  %p5358_p13 = scmp.lt.s32.totalorder %s5352_s28, %s5352_s28 }
  0x41   :  { %p5359_p0 = por %p5358_p13, %p5357_p12 }
  0x43   :  { %p5360_p1 = pnand %p5359_p0, %p5353_p11 }
  0x45   :  { %5363 = shalt.err (!%p5360_p1)
}
  0x46   :  { %s5490_s8 = smov 640   ;;  %s5491_s29 = smov 40  }
  0x47   :  { %59 = dma.hbm_to_vmem [thread:$0]  %s6334_s3, 5120, %s54_s27, [#allocation6], %s5490_s8, %s5490_s8, %s5491_s29  }
  0x48   :  { %s5492_s1 = smov [#allocation10]  }
  0x49   :  { %s77_s14 = sshll.u32 %s5492_s1, 4  ;;  %s78_s14 = int_to_ptr.vmem [resolvable:$true] %s77_s14 }
  0x4a   :  { %s5372_s0 = scalar_lea.vmem %s78_s14, 448  ;;  %p5377_p3 = scmp.lt.s32.totalorder %s78_s14, %s78_s14 }
  0x4b   :  { %p5373_p2 = scmp.ne.s32.totalorder %s78_s14, %s5372_s0  ;;  %p5378_p4 = scmp.lt.s32.totalorder %s5372_s0, %s5372_s0 }
  0x4d   :  { %p5379_p5 = por %p5378_p4, %p5377_p3 }
  0x4f   :  { %p5380_p6 = pnand %p5379_p5, %p5373_p2 }
  0x51   :  { %5383 = shalt.err (!%p5380_p6)
}
  0x52   :  { %s5493_s15 = smov 224   ;;  %s5494_s16 = smov 14  }
  0x53   :  { %83 = dma.hbm_to_vmem [thread:$0]  %s6336_s5, 448, %s78_s14, [#allocation9], %s5493_s15, %s5493_s15, %s5494_s16  }
  0x54   :  { %s5495_s18 = smov [#allocation13]  }
  0x55   :  { %s101_s19 = sshll.u32 %s5495_s18, 4  ;;  %s102_s19 = int_to_ptr.vmem [resolvable:$true] %s101_s19 }
  0x56   :  { %s5392_s3 = scalar_lea.vmem %s102_s19, 512  ;;  %p5397_p8 = scmp.lt.s32.totalorder %s102_s19, %s102_s19 }
  0x57   :  { %p5393_p7 = scmp.ne.s32.totalorder %s102_s19, %s5392_s3  ;;  %p5398_p9 = scmp.lt.s32.totalorder %s5392_s3, %s5392_s3 }
  0x59   :  { %p5399_p10 = por %p5398_p9, %p5397_p8 }
  0x5b   :  { %p5400_p11 = pnand %p5399_p10, %p5393_p7 }
  0x5d   :  { %5403 = shalt.err (!%p5400_p11)
}
  0x5e   :  { %s5496_s22 = smov 256   ;;  %s5497_s23 = smov 16  }
  0x5f   :  { %107 = dma.hbm_to_vmem [thread:$0]  %s6338_s7, 512, %s102_s19, [#allocation12], %s5496_s22, %s5496_s22, %s5497_s23  }
  0x60   :  { %s5498_s25 = smov [#allocation16]  }
  0x61   :  { %s125_s26 = sshll.u32 %s5498_s25, 4  ;;  %s126_s26 = int_to_ptr.vmem [resolvable:$true] %s125_s26 }
  0x62   :  { %s5412_s5 = scalar_lea.vmem %s126_s26, 256  ;;  %p5417_p13 = scmp.lt.s32.totalorder %s126_s26, %s126_s26 }
  0x63   :  { %p5413_p12 = scmp.ne.s32.totalorder %s126_s26, %s5412_s5  ;;  %p5418_p0 = scmp.lt.s32.totalorder %s5412_s5, %s5412_s5 }
  0x65   :  { %p5419_p1 = por %p5418_p0, %p5417_p13 }
  0x67   :  { %p5420_p2 = pnand %p5419_p1, %p5413_p12 }
  0x69   :  { %5423 = shalt.err (!%p5420_p2)
}
  0x6a   :  { %131 = dma.hbm_to_vmem [thread:$0]  %s6340_s9, 256, %s126_s26, [#allocation15], %s5487_s20, %s5487_s20, %s5488_s21  }
  0x6b   :  { %5464 = dma.done.wait [#allocation3], 256  }
  0x6c   :  { %5465 = vsyncadd [#allocation3], 4294967040 }
  0x6d   :  { %5466 = dma.done.wait [#allocation6], 5248  }
  0x6e   :  { %5467 = vsyncadd [#allocation6], 4294962048 }
  0x6f   :  { %5468 = dma.done.wait [#allocation9], 7616  }
  0x70   :  { %5469 = vsyncadd [#allocation9], 4294959680 }
  0x71   :  { %5470 = dma.done.wait [#allocation12], 4608  }
  0x72   :  { %5471 = vsyncadd [#allocation12], 4294962688 }
  0x73   :  { %5472 = dma.done.wait [#allocation15], 1280  }
  0x74   :  { %5473 = vsyncadd [#allocation15], 4294966016  ;;  %v5499_v0 = vmov 0.0   ;;  %v282_v1 = vld [vmem:[#allocation7 + $0x80] sm:$0xff]  ;;  %v281_v2 = vld [vmem:[#allocation7 + $0x78] sm:$0xff]  ;;  %vm192_vm0 = vcmask 261120   ;;  %v222_v61 = vlaneseq }
  0x75   :  { %400 = vmatprep.mubr.f32.mxu0 %v5499_v0  ;;  %471 = vmatprep.mubr.f32.mxu1 %v5499_v0  ;;  %v277_v3 = vld [vmem:[#allocation7 + $0x58] sm:$0xff]  ;;  %v276_v4 = vld [vmem:[#allocation7 + $0x50] sm:$0xff]  ;;  %v271_v7 = vld [vmem:[#allocation7 + $0x28] sm:$0xff]  ;;  %vm5500_vm1 = vmmov 0   ;;  %s5501_s7 = smov 96   ;;  %s5502_s9 = smov 64  }
  0x76   :  { %360 = vmatprep.subr.mxu0 %v282_v1  ;;  %v272_v5 = vld [vmem:[#allocation7 + $0x30] sm:$0xff]  ;;  %v166_v6 = vld [vmem:[#allocation5] sm:$0xff]  ;;  %v267_v9 = vld [vmem:[#allocation7 + $0x8] sm:$0xff]  ;;  %v5615_v1 = vshrl.u32 %v222_v61, 7  ;;  %vm1006_vm2 = vcmask 523264   ;;  %vm1008_vm3 = vcmask 785408  }
  0x77   :  { %361 = vmatpush1.msra.mxu0 %v281_v2  ;;  %v234_v8 = vsel %vm192_vm0, %v166_v6, 0.0  ;;  %v266_v11 = vld [vmem:[#allocation7] sm:$0xff]  ;;  %v164_v13 = vld [vmem:[#allocation2] sm:$0xff]  ;;  %v165_v14 = vld [vmem:[#allocation2 + $0x8] sm:$0xff]  ;;  %vm1622_vm4 = vcmask 130048   ;;  %vm1826_vm5 = vcmask 64512  }
  0x78   :  { %362 = vmatprep.subr.mxu0 %v277_v3  ;;  %v235_v10 = vrot.slane %v234_v8, 4  ;;  %v193_v16 = vsel %vm192_vm0, %v164_v13, 0.0  ;;  %v194_v17 = vsel %vm192_vm0, %v165_v14, 0.0  ;;  %v284_v19 = vld [vmem:[#allocation7 + $0x90] sm:$0xff]  ;;  %v283_v20 = vld [vmem:[#allocation7 + $0x88] sm:$0xff]  ;;  %v278_v23 = vld [vmem:[#allocation7 + $0x60] sm:$0xff] }
  0x79   :  { %363 = vmatpush1.msra.mxu0 %v276_v4  ;;  %v195_v18 = vadd.f32 %v194_v17, %v193_v16  ;;  %431 = vmatprep.subr.mxu1 %v284_v19  ;;  %v279_v22 = vld [vmem:[#allocation7 + $0x68] sm:$0xff]  ;;  %v274_v25 = vld [vmem:[#allocation7 + $0x40] sm:$0xff]  ;;  %v273_v27 = vld [vmem:[#allocation7 + $0x38] sm:$0xff]  ;;  %v5618_v4 = vsub.s32 2, %v5615_v1  ;;  %s5504_s5 = smov [#allocation18]  }
  0x7a   :  { %364 = vmatprep.subr.mxu0 %v272_v5  ;;  %v236_v12 = vadd.f32 %v235_v10, %v234_v8  ;;  %432 = vmatpush1.msra.mxu1 %v283_v20  ;;  %v269_v29 = vld [vmem:[#allocation7 + $0x18] sm:$0xff]  ;;  %v268_v31 = vld [vmem:[#allocation7 + $0x10] sm:$0xff]  ;;  %v5637_v20 = vsub.s32 1, %v5615_v1  ;;  %s4694_s27 = sshll.u32 %s5504_s5, 4  ;;  %s4695_s27 = int_to_ptr.vmem [resolvable:$true] %s4694_s27 }
  0x7b   :  { %365 = vmatpush1.msra.mxu0 %v271_v7  ;;  %v196_v24 = vrot.slane %v195_v18, 4  ;;  %433 = vmatprep.subr.mxu1 %v279_v22  ;;  %v570_v33 = vld [vmem:[#allocation8 + $0xb0] sm:$0xff]  ;;  %v167_v5 = vld [vmem:[#allocation16] sm:$0xff] }
  0x7c   :  { %366 = vmatprep.subr.mxu0 %v267_v9  ;;  %v237_v15 = vrot.slane %v236_v12, 2  ;;  %434 = vmatpush1.msra.mxu1 %v278_v23  ;;  %v259_v7 = vrot.slane %v167_v5, %v5618_v4  ;;  %v280_v16 = vld [vmem:[#allocation7 + $0x70] sm:$0xff]  ;;  %v563_v17 = vld [vmem:[#allocation8 + $0x78] sm:$0xff]  ;;  %v556_v23 = vld [vmem:[#allocation8 + $0x40] sm:$0xff] }
  0x7d   :  { %367 = vmatpush1.msra.mxu0 %v266_v11  ;;  %v197_v28 = vadd.f32 %v196_v24, %v195_v18  ;;  %435 = vmatprep.subr.mxu1 %v274_v25  ;;  %v562_v18 = vld [vmem:[#allocation8 + $0x70] sm:$0xff]  ;;  %v555_v25 = vld [vmem:[#allocation8 + $0x38] sm:$0xff] }
  0x7e   :  { %4873 = vmatprep.subr.mxu0 %v5499_v0  ;;  %v238_v21 = vadd.f32 %v237_v15, %v236_v12  ;;  %436 = vmatpush1.msra.mxu1 %v273_v27  ;;  %v5626_v12 = vsub.s32 0, %v5615_v1  ;;  %v569_v15 = vld [vmem:[#allocation8 + $0xa8] sm:$0xff] }
  0x7f   :  { %v198_v32 = vrot.slane %v197_v28, 2  ;;  %437 = vmatprep.subr.mxu1 %v269_v29  ;;  %v549_v27 = vld [vmem:[#allocation8 + $0x8] sm:$0xff]  ;;  %v571_v29 = vld [vmem:[#allocation8 + $0xb8] sm:$0xff] }
  0x80   :  { %v239_v26 = vrot.slane %v238_v21, 1  ;;  %438 = vmatpush1.msra.mxu1 %v268_v31  ;;  %v225_v22 = vrot.slane %v167_v5, %v5626_v12  ;;  %v231_v31 = vrot.slane %v167_v5, %v5637_v20 }
  0x81   :  { %v199_v35 = vadd.f32 %v198_v32, %v197_v28  ;;  %669 = vmatprep.subr.mxu1 %v570_v33  ;;  %v572_v28 = vld [vmem:[#allocation8 + $0xc0] sm:$0xff]  ;;  %v565_v32 = vld [vmem:[#allocation8 + $0x88] sm:$0xff] }
  0x82   :  { %v240_v30 = vadd.f32 %v239_v26, %v238_v21  ;;  %v275_v21 = vld [vmem:[#allocation7 + $0x48] sm:$0xff]  ;;  %v270_v26 = vld [vmem:[#allocation7 + $0x20] sm:$0xff] }
  0x83   :  { %v200_v37 = vrot.slane %v199_v35, 1  ;;  %v548_v33 = vld [vmem:[#allocation8] sm:$0xff] }
  0x84   :  { %v242_v34 = vmul.f32 0.125, %v240_v30 }
  0x85   :  { %v201_v39 = vadd.f32 %v200_v37, %v199_v35  ;;  %v557_v37 = vld [vmem:[#allocation8 + $0x48] sm:$0xff] }
  0x86   :  { %v243_v36 = vsub.f32 %v166_v6, %v242_v34  ;;  %v5621_v6 = vsub.s32 3, %v5615_v1  ;;  %v564_v34 = vld [vmem:[#allocation8 + $0x80] sm:$0xff] }
  0x87   :  { %v203_v42 = vmul.f32 0.0625, %v201_v39  ;;  %v551_v39 = vld [vmem:[#allocation8 + $0x18] sm:$0xff] }
  0x88   :  { %v244_v38 = vmul.f32 %v243_v36, %v243_v36  ;;  %v264_v10 = vrot.slane %v167_v5, %v5621_v6 }
  0x89   :  { %v204_v44 = vsub.f32 %v164_v13, %v203_v42  ;;  %v5609_v45 = vsub.f32 %v165_v14, %v203_v42  ;;  %v285_v14 = vld [vmem:[#allocation7 + $0x98] sm:$0xff] }
  0x8a   :  { %v245_v40 = vsel %vm192_vm0, %v244_v38, 0.0 }
  0x8b   :  { %v246_v41 = vrot.slane %v245_v40, 4  ;;  %v206_v47 = vmul.f32 %v204_v44, %v204_v44  ;;  %v207_v48 = vmul.f32 %v5609_v45, %v5609_v45 }
  0x8d   :  { %v247_v43 = vadd.f32 %v246_v41, %v245_v40  ;;  %v208_v50 = vsel %vm192_vm0, %v206_v47, 0.0  ;;  %v209_v51 = vsel %vm192_vm0, %v207_v48, 0.0  ;;  %v574_v40 = vld [vmem:[#allocation8 + $0xd0] sm:$0xff]  ;;  %v567_v47 = vld [vmem:[#allocation8 + $0x98] sm:$0xff]  ;;  %v561_v48 = vld [vmem:[#allocation8 + $0x68] sm:$0xff] }
  0x8e   :  { %v210_v52 = vadd.f32 %v209_v51, %v208_v50  ;;  %v550_v41 = vld [vmem:[#allocation8 + $0x10] sm:$0xff]  ;;  %v560_v51 = vld [vmem:[#allocation8 + $0x60] sm:$0xff] }
  0x8f   :  { %v248_v46 = vrot.slane %v247_v43, 2  ;;  %v566_v50 = vld [vmem:[#allocation8 + $0x90] sm:$0xff] }
  0x90   :  { %v211_v54 = vrot.slane %v210_v52, 4 }
  0x91   :  { %v249_v49 = vadd.f32 %v248_v46, %v247_v43  ;;  %v573_v43 = vld [vmem:[#allocation8 + $0xc8] sm:$0xff] }
  0x92   :  { %v212_v56 = vadd.f32 %v211_v54, %v210_v52  ;;  %v559_v52 = vld [vmem:[#allocation8 + $0x58] sm:$0xff]  ;;  %v552_v54 = vld [vmem:[#allocation8 + $0x20] sm:$0xff] }
  0x93   :  { %v250_v53 = vrot.slane %v249_v49, 1 }
  0x94   :  { %v213_v58 = vrot.slane %v212_v56, 2 }
  0x95   :  { %v251_v55 = vadd.f32 %v250_v53, %v249_v49  ;;  %v554_v49 = vld [vmem:[#allocation8 + $0x30] sm:$0xff]  ;;  %v553_v53 = vld [vmem:[#allocation8 + $0x28] sm:$0xff] }
  0x96   :  { %v214_v60 = vadd.f32 %v213_v58, %v212_v56 }
  0x97   :  { %v252_v57 = vmul.f32 0.125, %v251_v55 }
  0x98   :  { %v215_v62 = vrot.slane %v214_v60, 1 }
  0x99   :  { %v253_v59 = vadd.f32 1e-05, %v252_v57 }
  0x9a   :  { %v216_v63 = vadd.f32 %v215_v62, %v214_v60  ;;  %v5680_v60 = vld [vmem:[#allocation10 + $0x8] sm:$0x3f] }
  0x9b   :  { %5070 = vrsqrt.f32 %v253_v59  ;;  %v5678_v59 = vsub.s32 5, %v5615_v1 }
  0x9c   :  { %v217_v2 = vmul.f32 0.0625, %v216_v63 }
  0x9d   :  { %v603_v62 = vrot.slane %v5680_v60, %v5678_v59 }
  0x9e   :  { %v218_v3 = vadd.f32 1e-05, %v217_v2 }
  0xa0   :  { %5072 = vrsqrt.f32 %v218_v3  ;;  %v638_v3 = vrot.slane %v603_v62, %v5637_v20 }
  0xa8   :  { %v5071_v8 = vpop.eup %5070 }
  0xa9   :  { %v255_v9 = vmul.f32 %v5071_v8, %v243_v36  ;;  %v558_v36 = vld [vmem:[#allocation8 + $0x50] sm:$0xff] }
  0xab   :  { %v260_v11 = vmul.f32 %v259_v7, %v255_v9 }
  0xad   :  { %v5628_v13 = vadd.f32 %v264_v10, %v260_v11  ;;  %v5073_v19 = vpop.eup %5072 }
  0xae   :  { %v220_v24 = vmul.f32 %v5073_v19, %v204_v44  ;;  %v221_v35 = vmul.f32 %v5073_v19, %v5609_v45  ;;  %v575_v44 = vld [vmem:[#allocation8 + $0xd8] sm:$0xff]  ;;  %v568_v45 = vld [vmem:[#allocation8 + $0xa0] sm:$0xff] }
  0xaf   :  { %4711 = vmatmul.mubr.msk.f32.vlgmr.msra.gmra.mxu0 %vm192_vm0, %v5628_v13  ;;  %4712 = vmatmul.mubr.msk.f32.vlgmr.msra.gmra.mxu1 %vm192_vm0, %v5628_v13 }
  0xb0   :  { %4874 = vmatpush3.msra.mxu0 %v285_v14  ;;  %4881 = vmatprep.mubr.msk.f32.mxu0 %vm5500_vm1, %v5499_v0  ;;  %v226_v30 = vmul.f32 %v225_v22, %v220_v24  ;;  %v227_v42 = vmul.f32 %v225_v22, %v221_v35  ;;  %v189_v35 = vld [vmem:[#allocation11 + $0x78] sm:$0xff] }
  0xb1   :  { %4875 = vmatprep.subr.mxu0 %v5499_v0  ;;  %670 = vmatpush1.msra.mxu1 %v569_v15 }
  0xb2   :  { %4876 = vmatpush3.msra.mxu0 %v280_v16  ;;  %671 = vmatprep.subr.mxu1 %v563_v17  ;;  %v5648_v38 = vadd.f32 %v231_v31, %v226_v30  ;;  %v5656_v46 = vadd.f32 %v231_v31, %v227_v42  ;;  %v177_v31 = vld [vmem:[#allocation11 + $0x18] sm:$0xff]  ;;  %v179_v42 = vld [vmem:[#allocation11 + $0x28] sm:$0xff] }
  0xb3   :  { %4877 = vmatprep.subr.mxu0 %v5499_v0  ;;  %672 = vmatpush1.msra.mxu1 %v562_v18 }
  0xb4   :  { %4878 = vmatpush3.msra.mxu0 %v275_v21  ;;  %673 = vmatprep.subr.mxu1 %v556_v23 }
  0xb5   :  { %4879 = vmatprep.subr.mxu0 %v5499_v0  ;;  %674 = vmatpush1.msra.mxu1 %v555_v25 }
  0xb6   :  { %4880 = vmatpush3.msra.mxu0 %v270_v26  ;;  %675 = vmatprep.subr.mxu1 %v549_v27  ;;  %v181_v26 = vld [vmem:[#allocation11 + $0x38] sm:$0xff]  ;;  %v180_v27 = vld [vmem:[#allocation11 + $0x30] sm:$0xff] }
  0xb7   :  { %4882 = vmatmul.mubr.msk.f32.vlgmr.msra.gmra.mxu0 %vm192_vm0, %v5628_v13  ;;  %746 = vmatprep.subr.mxu0 %v572_v28 }
  0xb8   :  { %747 = vmatpush1.msra.mxu0 %v571_v29  ;;  %786 = vmatprep.mubr.f32.mxu0 %v5499_v0  ;;  %v307_v29 = vrot.slane %v5680_v60, %v5626_v12 }
  0xb9   :  { %748 = vmatprep.subr.mxu0 %v565_v32  ;;  %676 = vmatpush1.msra.mxu1 %v548_v33  ;;  %v176_v32 = vld [vmem:[#allocation11 + $0x10] sm:$0xff] }
  0xba   :  { %749 = vmatpush1.msra.mxu0 %v564_v34  ;;  %709 = vmatprep.mubr.f32.mxu1 %v5499_v0  ;;  %v332_v33 = vrot.slane %v307_v29, %v5626_v12 }
  0xbb   :  { %750 = vmatprep.subr.mxu0 %v558_v36  ;;  %4714 = vmatmul.mubr.msk.f32.vlgmr.msra.gmra.mxu1 %vm192_vm0, %v5648_v38 }
  0xbc   :  { %751 = vmatpush1.msra.mxu0 %v557_v37  ;;  %715 = vmatprep.mubr.f32.mxu1 %v5499_v0 }
  0xbd   :  { %752 = vmatprep.subr.mxu0 %v551_v39  ;;  %823 = vmatprep.subr.mxu1 %v574_v40 }
  0xbe   :  { %753 = vmatpush1.msra.mxu0 %v550_v41  ;;  %824 = vmatpush1.msra.mxu1 %v573_v43  ;;  %v178_v43 = vld [vmem:[#allocation11 + $0x20] sm:$0xff] }
  0xbf   :  { %4716 = vmatmul.mubr.msk.f32.vlgmr.msra.gmra.mxu0 %vm192_vm0, %v5648_v38  ;;  %4884 = vmatprep.subr.mxu0 %v575_v44 }
  0xc0   :  { %4885 = vmatpush3.msra.mxu0 %v575_v44  ;;  %792 = vmatprep.mubr.f32.mxu0 %v5499_v0  ;;  %v175_v44 = vld [vmem:[#allocation11 + $0x8] sm:$0xff] }
  0xc1   :  { %4886 = vmatprep.subr.mxu0 %v568_v45  ;;  %4715 = vmatmul.mubr.msk.f32.gmra.mxu1 %vm192_vm0, %v5656_v46 }
  0xc2   :  { %4887 = vmatpush3.msra.mxu0 %v568_v45  ;;  %825 = vmatprep.subr.mxu1 %v567_v47  ;;  %v174_v45 = vld [vmem:[#allocation11] sm:$0xff]  ;;  %v187_v47 = vld [vmem:[#allocation11 + $0x68] sm:$0xff] }
  0xc3   :  { %4717 = vmatmul.mubr.msk.f32.gmra.mxu0 %vm192_vm0, %v5656_v46  ;;  %4888 = vmatprep.subr.mxu0 %v561_v48 }
  0xc4   :  { %4889 = vmatpush3.msra.mxu0 %v561_v48  ;;  %4892 = vmatprep.mubr.msk.f32.mxu0 %vm192_vm0, %v5648_v38  ;;  %v5775_v48 = vsub.s32 6, %v5615_v1 }
  0xc5   :  { %4890 = vmatprep.subr.mxu0 %v554_v49  ;;  %826 = vmatpush1.msra.mxu1 %v566_v50 }
  0xc6   :  { %4891 = vmatpush3.msra.mxu0 %v554_v49  ;;  %827 = vmatprep.subr.mxu1 %v560_v51  ;;  %v5777_v49 = vld [vmem:[#allocation10] sm:$0xff] }
  0xc7   :  { %4893 = vmatmul.mubr.msk.f32.vlgmr.msra.gmra.mxu0 %vm192_vm0, %v5656_v46  ;;  %828 = vmatpush1.msra.mxu1 %v559_v52  ;;  %v303_v50 = vrot.slane %v5777_v49, %v5775_v48 }
  0xc8   :  { %829 = vmatprep.subr.mxu1 %v553_v53  ;;  %863 = vmatprep.mubr.f32.mxu1 %v5499_v0  ;;  %v5784_v53 = vsub.s32 4, %v5615_v1 }
  0xc9   :  { %830 = vmatpush1.msra.mxu1 %v552_v54  ;;  %1355 = vmatprep.subr.mxu0 %v181_v26 }
  0xca   :  { %4718 = vmatmul.mubr.msk.f32.vlgmr.msra.gmra.mxu1 %vm192_vm0, %v5648_v38  ;;  %1356 = vmatpush1.xpose.msra.mxu0 %v180_v27  ;;  %v5797_v27 = vsub.s32 7, %v5615_v1 }
  0xcb   :  { %869 = vmatprep.mubr.f32.mxu1 %v5499_v0  ;;  %1357 = vmatprep.subr.mxu0 %v177_v31 }
  0xcc   :  { %1285 = vmatprep.subr.mxu1 %v179_v42 }
  0xcd   :  { %1286 = vmatpush1.xpose.msra.mxu1 %v178_v43 }
  0xce   :  { %4719 = vmatmul.mubr.msk.f32.gmra.mxu1 %vm192_vm0, %v5656_v46  ;;  %1358 = vmatpush1.xpose.msra.mxu0 %v176_v32 }
  0xcf   :  { %1500 = vmatprep.subr.mxu0 %v189_v35  ;;  %1287 = vmatprep.subr.mxu1 %v175_v44 }
  0xd1   :  { %1288 = vmatpush1.xpose.msra.mxu1 %v174_v45 }
  0xd2   :  { %1425 = vmatprep.subr.mxu1 %v187_v47 }
 0x16f   :  { %v5673_v55 = vpop.f32.mrf.mxu0  ;;  %v473_v51 = vpop.f32.mrf.mxu1 }
 0x171   :  { %v5675_v56 = vpop.f32.mrf.mxu0 }
 0x177   :  { %v544_v57 = vpop.f32.mrf.mxu0 }
 0x178   :  { %v5749_v34 = vadd.f32 %v544_v57, %v332_v33  ;;  %v328_v57 = vrot.slane %v303_v50, %v5626_v12 }
 0x179   :  { %v4883_v58 = vpop.f32.mrf.mxu0 }
 0x17a   :  { %v1201_v36 = vrot.slane %v5749_v34, 4  ;;  %v1207_v37 = vrot.slane %v5749_v34, 6  ;;  %v1193_v39 = vrot.slane %v5749_v34, 2  ;;  %v1211_v40 = vrot.slane %v5749_v34, 7  ;;  %v475_v58 = vpop.f32.mrf.mxu1 }
 0x17b   :  { %v1197_v41 = vrot.slane %v5749_v34, 3 }
 0x17f   :  { %v5682_v61 = vpop.f32.mrf.mxu0 }
 0x181   :  { %v5686_v63 = vpop.f32.mrf.mxu0 }
 0x183   :  { %v5688_v2 = vpop.f32.mrf.mxu0 }
 0x185   :  { %v5691_v5 = vpop.f32.mrf.mxu0 }
 0x187   :  { %v4894_v7 = vpop.f32.mrf.mxu0 }
 0x188   :  { %v5693_v8 = vadd.f32 %v4894_v7, %v638_v3  ;;  %v299_v7 = vrot.slane %v5777_v49, %v5784_v53 }
 0x189   :  { %v942_v17 = vpop.f32.mrf.mxu0 }
 0x18a   :  { %1083 = vrot.lane.b32.xlu0 %v5693_v8, %s5501_s7  ;;  %v997_v9 = vrot.slane %v5693_v8, 6  ;;  %v993_v10 = vrot.slane %v5693_v8, 5  ;;  %v1001_v11 = vrot.slane %v5693_v8, 7  ;;  %v979_v14 = vrot.slane %v5693_v8, 1 }
 0x18b   :  { %v987_v15 = vrot.slane %v5693_v8, 3  ;;  %v983_v16 = vrot.slane %v5693_v8, 2  ;;  %v991_v18 = vrot.slane %v5693_v8, 4  ;;  %v5714_v19 = vadd.f32 %v942_v17, %v638_v3 }
 0x18c   :  { %998 = vrot.lane.b32.xlu1 %v997_v9, %s5502_s9 }
 0x18d   :  { %v966_v21 = vrot.slane %v5714_v19, 5  ;;  %v952_v22 = vrot.slane %v5714_v19, 1  ;;  %v956_v23 = vrot.slane %v5714_v19, 2  ;;  %v970_v24 = vrot.slane %v5714_v19, 6 }
 0x18e   :  { %994 = vrot.lane.b32.xlu0 %v993_v10, %s5484_s13  ;;  %v960_v25 = vrot.slane %v5714_v19, 3  ;;  %v974_v28 = vrot.slane %v5714_v19, 7  ;;  %v964_v30 = vrot.slane %v5714_v19, 4 }
 0x190   :  { %1002 = vrot.lane.b32.xlu1 %v1001_v11, %s5501_s7 }
 0x192   :  { %980 = vrot.lane.b32.xlu0 %v979_v14, %s5484_s13 }
 0x194   :  { %988 = vrot.lane.b32.xlu1 %v987_v15, %s5501_s7 }
 0x196   :  { %984 = vrot.lane.b32.xlu0 %v983_v16, %s5502_s9 }
 0x198   :  { %1093 = vrot.lane.b32.xlu1 %v991_v18, %s5501_s7 }
 0x19a   :  { %1063 = vrot.lane.b32.xlu0 %v5714_v19, %s5501_s7 }
 0x19c   :  { %1097 = vrot.lane.b32.xlu1 %v997_v9, %s5484_s13 }
 0x19e   :  { %1087 = vrot.lane.b32.xlu0 %v983_v16, %s5484_s13 }
 0x1a0   :  { %1100 = vrot.lane.b32.xlu1 %v1001_v11, %s5502_s9 }
 0x1a2   :  { %967 = vrot.lane.b32.xlu0 %v966_v21, %s5484_s13 }
 0x1a4   :  { %953 = vrot.lane.b32.xlu1 %v952_v22, %s5484_s13 }
 0x1a6   :  { %957 = vrot.lane.b32.xlu0 %v956_v23, %s5502_s9 }
 0x1a8   :  { %971 = vrot.lane.b32.xlu1 %v970_v24, %s5502_s9 }
 0x1aa   :  { %961 = vrot.lane.b32.xlu0 %v960_v25, %s5501_s7 }
 0x1ac   :  { %975 = vrot.lane.b32.xlu1 %v974_v28, %s5501_s7 }
 0x1ae   :  { %1073 = vrot.lane.b32.xlu0 %v964_v30, %s5501_s7 }
 0x1b0   :  { %1077 = vrot.lane.b32.xlu1 %v970_v24, %s5484_s13  ;;  %v324_v24 = vrot.slane %v299_v7, %v5626_v12 }
 0x1b2   :  { %1067 = vrot.lane.b32.xlu0 %v956_v23, %s5484_s13  ;;  %v474_v31 = vadd.f32 %v473_v51, %v324_v24 }
 0x1b4   :  { %1080 = vrot.lane.b32.xlu1 %v974_v28, %s5502_s9 }
 0x1b6   :  { %1070 = vrot.lane.b32.xlu0 %v960_v25, %s5502_s9 }
 0x1b8   :  { %1090 = vrot.lane.b32.xlu1 %v987_v15, %s5502_s9  ;;  %v476_v15 = vadd.f32 %v475_v58, %v328_v57  ;;  %v291_v58 = vrot.slane %v5777_v49, %v5626_v12 }
 0x1ba   :  { %1202 = vrot.lane.b32.xlu0 %v1201_v36, %s5501_s7 }
 0x1bc   :  { %1188 = vrot.lane.b32.xlu1 %v5749_v34, %s5501_s7 }
 0x1be   :  { %1208 = vrot.lane.b32.xlu0 %v1207_v37, %s5484_s13  ;;  %v591_v37 = vrot.slane %v5777_v49, %v5797_v27 }
 0x1c0   :  { %1194 = vrot.lane.b32.xlu1 %v1193_v39, %s5484_s13  ;;  %v626_v42 = vrot.slane %v591_v37, %v5637_v20  ;;  %v583_v37 = vrot.slane %v5777_v49, %v5621_v6 }
 0x1c2   :  { %1212 = vrot.lane.b32.xlu0 %v1211_v40, %s5502_s9  ;;  %v791_v51 = vadd.f32 %v5686_v63, %v626_v42  ;;  %v316_v63 = vrot.slane %v291_v58, %v5626_v12 }
 0x1c4   :  { %1198 = vrot.lane.b32.xlu1 %v1197_v41, %s5502_s9 }
 0x1c6   :  { %1709 = vrot.lane.b32.xlu0 %v5693_v8, %s5502_s9 }
 0x1c8   :  { %1707 = vrot.lane.b32.xlu1 %v5714_v19, %s5502_s9 }
 0x1ca   :  { %1973 = vrot.lane.b32.xlu0 %v5693_v8, %s5484_s13 }
 0x1cc   :  { %1971 = vrot.lane.b32.xlu1 %v5714_v19, %s5484_s13 }
 0x1fc   :  { %v5781_v52 = vpop.permute.xlu0 %1083 }
 0x1fe   :  { %v999_v54 = vpop.permute.xlu1 %998 }
 0x200   :  { %v995_v62 = vpop.permute.xlu0 %994 }
 0x201   :  { %v1016_v3 = vsel %vm192_vm0, %v991_v18, %v995_v62 }
 0x202   :  { %v1003_v9 = vpop.permute.xlu1 %1002  ;;  %v1017_v11 = vsel %vm1006_vm2, %v1016_v3, %v999_v54 }
 0x203   :  { %v1018_v16 = vsel %vm1008_vm3, %v1017_v11, %v1003_v9  ;;  %v711_v9 = vpop.f32.mrf.mxu1 }
 0x204   :  { %v1034_v17 = vrot.slane %v1018_v16, %v5626_v12  ;;  %v981_v23 = vpop.permute.xlu0 %980 }
 0x205   :  { %v1013_v28 = vsel %vm192_vm0, %v5693_v8, %v981_v23  ;;  %v713_v24 = vpop.f32.mrf.mxu1 }
 0x206   :  { %v1038_v25 = vadd.f32 %v1034_v17, %v476_v15  ;;  %v989_v26 = vpop.permute.xlu1 %988 }
 0x208   :  { %v4725_v18 = vmul.f32 -1.442695, %v1038_v25  ;;  %v985_v29 = vpop.permute.xlu0 %984 }
 0x209   :  { %v1014_v32 = vsel %vm1006_vm2, %v1013_v28, %v985_v29 }
 0x20a   :  { %5074 = vpow2.f32 %v4725_v18  ;;  %v1015_v33 = vsel %vm1008_vm3, %v1014_v32, %v989_v26  ;;  %v1094_v35 = vpop.permute.xlu1 %1093  ;;  %v403_v32 = vadd.f32 %v5673_v55, %v316_v63 }
 0x20b   :  { %v1030_v36 = vrot.slane %v1015_v33, %v5626_v12  ;;  %v1112_v44 = vsel %vm192_vm0, %v1094_v35, %v993_v10  ;;  %v295_v10 = vrot.slane %v5777_v49, %v5618_v4 }
 0x20c   :  { %v5806_v39 = vpop.permute.xlu0 %1063 }
 0x20d   :  { %v1037_v1 = vadd.f32 %v1030_v36, %v474_v31  ;;  %v320_v25 = vrot.slane %v295_v10, %v5626_v12 }
 0x20e   :  { %v1098_v40 = vpop.permute.xlu1 %1097 }
 0x20f   :  { %v4724_v41 = vmul.f32 -1.442695, %v1037_v1  ;;  %v1113_v45 = vsel %vm1006_vm2, %v1112_v44, %v1098_v40  ;;  %v797_v1 = vadd.f32 %v5691_v5, %v626_v42  ;;  %v717_v44 = vpop.f32.mrf.mxu1  ;;  %v618_v5 = vrot.slane %v583_v37, %v5637_v20 }
 0x210   :  { %v5809_v43 = vpop.permute.xlu0 %1087  ;;  %v587_v42 = vrot.slane %v5777_v49, %v5678_v59 }
 0x211   :  { %5076 = vpow2.f32 %v4724_v41 }
 0x212   :  { %v1101_v47 = vpop.permute.xlu1 %1100 }
 0x213   :  { %v1114_v50 = vsel %vm1008_vm3, %v1113_v45, %v1101_v47 }
 0x214   :  { %v1130_v54 = vrot.slane %v1114_v50, %v5626_v12  ;;  %v968_v57 = vpop.permute.xlu0 %967  ;;  %v579_v50 = vrot.slane %v5777_v49, %v5637_v20 }
 0x215   :  { %v1010_v28 = vsel %vm192_vm0, %v964_v30, %v968_v57  ;;  %v405_v30 = vadd.f32 %v5675_v56, %v320_v25  ;;  %v622_v25 = vrot.slane %v587_v42, %v5637_v20 }
 0x216   :  { %v1134_v62 = vadd.f32 %v1130_v54, %v791_v51  ;;  %v954_v3 = vpop.permute.xlu1 %953  ;;  %v1138_v51 = vadd.f32 %v1130_v54, %v797_v1  ;;  %v614_v10 = vrot.slane %v579_v50, %v5637_v20  ;;  %v188_v50 = vld [vmem:[#allocation11 + $0x70] sm:$0xff] }
 0x217   :  { %v5075_v7 = vpop.eup %5074  ;;  %v1005_v17 = vsel %vm192_vm0, %v5714_v19, %v954_v3  ;;  %v719_v3 = vpop.f32.mrf.mxu1 }
 0x218   :  { %v1054_v11 = vadd.f32 1.0, %v5075_v7  ;;  %v4729_v15 = vmul.f32 -1.442695, %v1134_v62  ;;  %v958_v16 = vpop.permute.xlu0 %957 }
 0x219   :  { %v1007_v26 = vsel %vm1006_vm2, %v1005_v17, %v958_v16  ;;  %v5849_v54 = vpop.f32.mrf.mxu1  ;;  %v714_v17 = vadd.f32 %v713_v24, %v618_v5 }
 0x21a   :  { %5078 = vrcp.f32 %v1054_v11  ;;  %v972_v23 = vpop.permute.xlu1 %971 }
 0x21b   :  { %5080 = vpow2.f32 %v4729_v15  ;;  %v1011_v33 = vsel %vm1006_vm2, %v1010_v28, %v972_v23  ;;  %v4733_v15 = vmul.f32 -1.442695, %v1138_v51  ;;  %v720_v23 = vadd.f32 %v719_v3, %v618_v5  ;;  %v185_v5 = vld [vmem:[#allocation11 + $0x58] sm:$0xff] }
 0x21c   :  { %v962_v18 = vpop.permute.xlu0 %961  ;;  %v712_v28 = vadd.f32 %v711_v9, %v614_v10 }
 0x21d   :  { %v1009_v29 = vsel %vm1008_vm3, %v1007_v26, %v962_v18 }
 0x21e   :  { %v5077_v31 = vpop.eup %5076  ;;  %v1022_v35 = vrot.slane %v1009_v29, %v5626_v12  ;;  %v976_v36 = vpop.permute.xlu1 %975 }
 0x21f   :  { %v1053_v40 = vadd.f32 1.0, %v5077_v31  ;;  %v1012_v41 = vsel %vm1008_vm3, %v1011_v33, %v976_v36  ;;  %v718_v31 = vadd.f32 %v717_v44, %v614_v10  ;;  %v1109_v33 = vsel %vm192_vm0, %v5781_v52, %v979_v14 }
 0x220   :  { %v1035_v45 = vadd.f32 %v1022_v35, %v403_v32  ;;  %v1026_v47 = vrot.slane %v1012_v41, %v5626_v12  ;;  %v1074_v55 = vpop.permute.xlu0 %1073  ;;  %v1110_v9 = vsel %vm1006_vm2, %v1109_v33, %v5809_v43  ;;  %v599_v52 = vrot.slane %v5680_v60, %v5621_v6 }
 0x221   :  { %5082 = vrcp.f32 %v1053_v40  ;;  %v1106_v56 = vsel %vm192_vm0, %v1074_v55, %v966_v21  ;;  %v1103_v21 = vsel %vm192_vm0, %v5806_v39, %v952_v22  ;;  %v867_v39 = vpop.f32.mrf.mxu1 }
 0x222   :  { %v4722_v57 = vmul.f32 -1.442695, %v1035_v45  ;;  %v1036_v58 = vadd.f32 %v1026_v47, %v405_v30  ;;  %v1078_v62 = vpop.permute.xlu1 %1077  ;;  %v789_v30 = vadd.f32 %v5682_v61, %v622_v25  ;;  %v795_v45 = vadd.f32 %v5688_v2, %v622_v25 }
 0x223   :  { %v1107_v16 = vsel %vm1006_vm2, %v1106_v56, %v1078_v62  ;;  %v871_v55 = vpop.f32.mrf.mxu1  ;;  %v595_v62 = vrot.slane %v5680_v60, %v5637_v20  ;;  %v634_v2 = vrot.slane %v599_v52, %v5637_v20  ;;  %v184_v60 = vld [vmem:[#allocation11 + $0x50] sm:$0xff] }
 0x224   :  { %5084 = vpow2.f32 %v4722_v57  ;;  %v4723_v7 = vmul.f32 -1.442695, %v1036_v58  ;;  %v1068_v11 = vpop.permute.xlu0 %1067 }
 0x225   :  { %v1104_v29 = vsel %vm1006_vm2, %v1103_v21, %v1068_v11  ;;  %v1191_v21 = vrot.slane %v5749_v34, 1 }
 0x226   :  { %5086 = vpow2.f32 %v4723_v7  ;;  %v1081_v63 = vpop.permute.xlu1 %1080 }
 0x227   :  { %v5079_v49 = vpop.eup %5078  ;;  %v1108_v26 = vsel %vm1008_vm3, %v1107_v16, %v1081_v63  ;;  %5088 = vpow2.f32 %v4733_v15  ;;  %v1205_v15 = vrot.slane %v5749_v34, 5  ;;  %v873_v16 = vpop.f32.mrf.mxu1 }
 0x228   :  { %v5081_v18 = vpop.eup %5080  ;;  %v1122_v32 = vrot.slane %v1108_v26, %v5626_v12  ;;  %1391 = vmatprep.mubr.f32.mxu0 %v5079_v49  ;;  %v1071_v24 = vpop.permute.xlu0 %1070 }
 0x229   :  { %v1166_v19 = vadd.f32 1.0, %v5081_v18  ;;  %v1105_v22 = vsel %vm1008_vm3, %v1104_v29, %v1071_v24 }
 0x22a   :  { %v1132_v35 = vadd.f32 %v1122_v32, %v714_v17  ;;  %v1136_v36 = vadd.f32 %v1122_v32, %v720_v23  ;;  %v1118_v37 = vrot.slane %v1105_v22, %v5626_v12  ;;  %v1091_v1 = vpop.permute.xlu1 %1090  ;;  %v630_v17 = vrot.slane %v595_v62, %v5637_v20 }
 0x22b   :  { %5090 = vrcp.f32 %v1166_v19  ;;  %v1111_v40 = vsel %vm1008_vm3, %v1110_v9, %v1091_v1 }
 0x22c   :  { %v4727_v8 = vmul.f32 -1.442695, %v1132_v35  ;;  %v4731_v41 = vmul.f32 -1.442695, %v1136_v36  ;;  %v1131_v44 = vadd.f32 %v1118_v37, %v712_v28  ;;  %v1203_v14 = vpop.permute.xlu0 %1202  ;;  %v1135_v43 = vadd.f32 %v1118_v37, %v718_v31 }
 0x22d   :  { %v1126_v47 = vrot.slane %v1111_v40, %v5626_v12  ;;  %v1218_v25 = vsel %vm192_vm0, %v1203_v14, %v1205_v15  ;;  %v868_v28 = vadd.f32 %v867_v39, %v634_v2  ;;  %v874_v31 = vadd.f32 %v873_v16, %v634_v2  ;;  %v182_v15 = vld [vmem:[#allocation11 + $0x40] sm:$0xff]  ;;  %v191_v16 = vld [vmem:[#allocation13 + $0x8] sm:$0xff] }
 0x22e   :  { %v5083_v51 = vpop.eup %5082  ;;  %5092 = vpow2.f32 %v4727_v8  ;;  %v4726_v57 = vmul.f32 -1.442695, %v1131_v44  ;;  %v1189_v58 = vpop.permute.xlu1 %1188  ;;  %v4730_v42 = vmul.f32 -1.442695, %v1135_v43  ;;  %v866_v19 = vadd.f32 %v5849_v54, %v630_v17 }
 0x22f   :  { %5094 = vpow2.f32 %v4731_v41  ;;  %v1133_v56 = vadd.f32 %v1126_v47, %v789_v30  ;;  %v1137_v3 = vadd.f32 %v1126_v47, %v795_v45  ;;  %1392 = vmatmul.mubr.f32.vlgmr.msra.gmra.mxu0 %v5083_v51  ;;  %v1215_v32 = vsel %vm192_vm0, %v1189_v58, %v1191_v21 }
 0x230   :  { %5096 = vpow2.f32 %v4726_v57  ;;  %v1209_v61 = vpop.permute.xlu0 %1208  ;;  %1501 = vmatpush1.xpose.msra.mxu0 %v188_v50  ;;  %v872_v37 = vadd.f32 %v871_v55, %v630_v17 }
 0x231   :  { %v5085_v7 = vpop.eup %5084  ;;  %5098 = vpow2.f32 %v4730_v42  ;;  %v4728_v10 = vmul.f32 -1.442695, %v1133_v56  ;;  %v4732_v11 = vmul.f32 -1.442695, %v1137_v3  ;;  %1502 = vmatprep.subr.mxu0 %v185_v5  ;;  %v1219_v18 = vsel %vm1006_vm2, %v1218_v25, %v1209_v61  ;;  %v190_v25 = vld [vmem:[#allocation13] sm:$0xff] }
 0x232   :  { %v1195_v63 = vpop.permute.xlu1 %1194  ;;  %v1051_v49 = vadd.f32 1.0, %v5085_v7  ;;  %v186_v7 = vld [vmem:[#allocation11 + $0x60] sm:$0xff] }
 0x233   :  { %v5087_v23 = vpop.eup %5086  ;;  %5100 = vpow2.f32 %v4728_v10  ;;  %v1216_v22 = vsel %vm1006_vm2, %v1215_v32, %v1195_v63 }
 0x234   :  { %v1052_v26 = vadd.f32 1.0, %v5087_v23  ;;  %v1213_v29 = vpop.permute.xlu0 %1212  ;;  %1503 = vmatpush1.xpose.msra.mxu0 %v184_v60  ;;  %5102 = vpow2.f32 %v4732_v11  ;;  %v5089_v33 = vpop.eup %5088  ;;  %v183_v11 = vld [vmem:[#allocation11 + $0x48] sm:$0xff] }
 0x235   :  { %v1220_v24 = vsel %vm1008_vm3, %v1219_v18, %v1213_v29  ;;  %v1170_v44 = vadd.f32 1.0, %v5089_v33 }
 0x236   :  { %5104 = vrcp.f32 %v1052_v26  ;;  %v1228_v9 = vrot.slane %v1220_v24, %v5626_v12  ;;  %v1199_v35 = vpop.permute.xlu1 %1198 }
 0x237   :  { %5106 = vrcp.f32 %v1051_v49  ;;  %v1217_v39 = vsel %vm1008_vm3, %v1216_v22, %v1199_v35 }
 0x238   :  { %v5091_v36 = vpop.eup %5090  ;;  %v1230_v1 = vadd.f32 %v1228_v9, %v868_v28  ;;  %v1232_v40 = vadd.f32 %v1228_v9, %v874_v31  ;;  %v1224_v8 = vrot.slane %v1217_v39, %v5626_v12  ;;  %v5889_v41 = vpop.permute.xlu0 %1709 }
 0x239   :  { %1536 = vmatprep.mubr.f32.mxu0 %v5091_v36  ;;  %4895 = vmatprep.subr.mxu0 %v5889_v41 }
 0x23a   :  { %v4735_v54 = vmul.f32 -1.442695, %v1230_v1  ;;  %v1229_v14 = vadd.f32 %v1224_v8, %v866_v19  ;;  %v4737_v30 = vmul.f32 -1.442695, %v1232_v40  ;;  %v1231_v47 = vadd.f32 %v1224_v8, %v872_v37  ;;  %v1708_v19 = vpop.permute.xlu1 %1707 }
 0x23b   :  { %v5093_v52 = vpop.eup %5092 }
 0x23c   :  { %v5095_v45 = vpop.eup %5094  ;;  %v1164_v43 = vadd.f32 1.0, %v5093_v52  ;;  %5108 = vpow2.f32 %v4735_v54  ;;  %v4734_v58 = vmul.f32 -1.442695, %v1229_v14  ;;  %v4736_v5 = vmul.f32 -1.442695, %v1231_v47 }
 0x23d   :  { %v5097_v50 = vpop.eup %5096  ;;  %5110 = vrcp.f32 %v1170_v44  ;;  %v1168_v55 = vadd.f32 1.0, %v5095_v45 }
 0x23e   :  { %v5099_v51 = vpop.eup %5098  ;;  %5112 = vrcp.f32 %v1164_v43  ;;  %v1163_v57 = vadd.f32 1.0, %v5097_v50 }
 0x23f   :  { %5114 = vpow2.f32 %v4737_v30  ;;  %v1167_v42 = vadd.f32 1.0, %v5099_v51 }
 0x240   :  { %v5101_v62 = vpop.eup %5100  ;;  %5116 = vrcp.f32 %v1163_v57 }
 0x241   :  { %5118 = vrcp.f32 %v1168_v55  ;;  %v1165_v56 = vadd.f32 1.0, %v5101_v62  ;;  %v5103_v3 = vpop.eup %5102 }
 0x242   :  { %5120 = vpow2.f32 %v4734_v58  ;;  %v1169_v2 = vadd.f32 1.0, %v5103_v3 }
 0x243   :  { %v5105_v61 = vpop.eup %5104  ;;  %5122 = vrcp.f32 %v1165_v56 }
 0x244   :  { %v5107_v10 = vpop.eup %5106  ;;  %5124 = vpow2.f32 %v4736_v5  ;;  %1321 = vmatprep.mubr.f32.mxu1 %v5105_v61 }
 0x245   :  { %5126 = vrcp.f32 %v1167_v42  ;;  %1322 = vmatmul.mubr.f32.vlgmr.msra.gmra.mxu1 %v5107_v10 }
 0x246   :  { %1426 = vmatpush1.xpose.msra.mxu1 %v186_v7  ;;  %5128 = vrcp.f32 %v1169_v2 }
 0x247   :  { %1427 = vmatprep.subr.mxu1 %v183_v11 }
 0x249   :  { %v5109_v60 = vpop.eup %5108 }
 0x24a   :  { %v5111_v17 = vpop.eup %5110  ;;  %v1246_v63 = vadd.f32 1.0, %v5109_v60  ;;  %1428 = vmatpush1.xpose.msra.mxu1 %v182_v15 }
 0x24b   :  { %v5113_v23 = vpop.eup %5112  ;;  %1577 = vmatprep.subr.mxu1 %v191_v16 }
 0x24c   :  { %v5115_v49 = vpop.eup %5114  ;;  %5130 = vrcp.f32 %v1246_v63  ;;  %1461 = vmatprep.mubr.f32.mxu1 %v5113_v23 }
 0x24d   :  { %v5117_v21 = vpop.eup %5116  ;;  %v1248_v28 = vadd.f32 1.0, %v5115_v49 }
 0x24e   :  { %v5119_v26 = vpop.eup %5118  ;;  %1462 = vmatmul.mubr.f32.vlgmr.msra.gmra.mxu1 %v5117_v21 }
 0x24f   :  { %v5121_v18 = vpop.eup %5120  ;;  %1578 = vmatpush1.xpose.msra.mxu1 %v190_v25  ;;  %1466 = vmatprep.mubr.f32.mxu1 %v5119_v26 }
 0x250   :  { %v5123_v29 = vpop.eup %5122  ;;  %v1245_v31 = vadd.f32 1.0, %v5121_v18  ;;  %4902 = vmatprep.subr.mxu1 %v5749_v34 }
 0x251   :  { %v5125_v32 = vpop.eup %5124  ;;  %1537 = vmatmul.mubr.f32.vlgmr.msra.gmra.mxu0 %v5123_v29 }
 0x252   :  { %v5127_v24 = vpop.eup %5126  ;;  %v1247_v33 = vadd.f32 1.0, %v5125_v32  ;;  %5132 = vrcp.f32 %v1245_v31  ;;  %4896 = vmatpush3.msra.mxu0 %v5889_v41  ;;  %1541 = vmatprep.mubr.f32.mxu0 %v5111_v17 }
 0x253   :  { %5134 = vrcp.f32 %v1248_v28  ;;  %4897 = vmatprep.subr.mxu0 %v1708_v19  ;;  %1467 = vmatmul.mubr.f32.gmra.mxu1 %v5127_v24  ;;  %v5129_v22 = vpop.eup %5128 }
 0x254   :  { %4898 = vmatpush3.msra.mxu0 %v1708_v19  ;;  %5136 = vrcp.f32 %v1247_v33 }
 0x255   :  { %1542 = vmatmul.mubr.f32.gmra.mxu0 %v5129_v22  ;;  %4907 = vmatprep.subr.mxu0 %v5499_v0 }
 0x259   :  { %v5131_v9 = vpop.eup %5130 }
 0x25a   :  { %1611 = vmatprep.mubr.f32.mxu1 %v5131_v9 }
 0x25f   :  { %v5133_v35 = vpop.eup %5132 }
 0x260   :  { %v5135_v39 = vpop.eup %5134  ;;  %1612 = vmatmul.mubr.f32.vlgmr.msra.gmra.mxu1 %v5133_v35 }
 0x261   :  { %4903 = vmatpush3.msra.mxu1 %v5749_v34  ;;  %1616 = vmatprep.mubr.f32.mxu1 %v5135_v39  ;;  %v5137_v36 = vpop.eup %5136 }
 0x264   :  { %1617 = vmatmul.mubr.f32.gmra.mxu1 %v5137_v36 }
 0x2ef   :  { %v1393_v37 = vpop.f32.mrf.mxu0 }
 0x2f1   :  { %v1395_v1 = vpop.f32.mrf.mxu0 }
 0x305   :  { %v1323_v40 = vpop.f32.mrf.mxu1 }
 0x306   :  { %v1394_v41 = vadd.f32 %v1393_v37, %v1323_v40 }
 0x307   :  { %v1325_v8 = vpop.f32.mrf.mxu1 }
 0x308   :  { %v1623_v44 = vsel %vm1622_vm4, %v1394_v41, -inf  ;;  %v159_v8 = vld [vmem:[%s6333_s2] sm:$0xff] }
 0x309   :  { %v1624_v52 = vrot.slane %v1623_v44, 4 }
 0x30b   :  { %v1625_v50 = vmax.f32 %v1623_v44, %v1624_v52 }
 0x30d   :  { %v1626_v5 = vrot.slane %v1625_v50, 2 }
 0x30e   :  { %v1463_v54 = vpop.f32.mrf.mxu1 }
 0x30f   :  { %v1627_v3 = vmax.f32 %v1625_v50, %v1626_v5  ;;  %v162_v5 = vld [vmem:[%s6333_s2 + $0x20] sm:$0xff] }
 0x310   :  { %v1465_v14 = vpop.f32.mrf.mxu1 }
 0x311   :  { %v1538_v30 = vpop.f32.mrf.mxu0  ;;  %v1628_v10 = vrot.slane %v1627_v3, 1 }
 0x312   :  { %v1539_v47 = vadd.f32 %v1538_v30, %v1463_v54  ;;  %v161_v54 = vld [vmem:[%s6333_s2 + $0x18] sm:$0xff] }
 0x313   :  { %v1468_v45 = vpop.f32.mrf.mxu1  ;;  %v1540_v43 = vpop.f32.mrf.mxu0  ;;  %v1629_v17 = vmax.f32 %v1627_v3, %v1628_v10  ;;  %v163_v3 = vld [vmem:[%s6333_s2 + $0x28] sm:$0xff] }
 0x314   :  { %v1630_v58 = vsel %vm1622_vm4, %v1539_v47, -inf }
 0x315   :  { %v1470_v34 = vpop.f32.mrf.mxu1  ;;  %v1543_v55 = vpop.f32.mrf.mxu0 }
 0x316   :  { %v1544_v51 = vadd.f32 %v1543_v55, %v1468_v45 }
 0x317   :  { %v1545_v57 = vpop.f32.mrf.mxu0 }
 0x318   :  { %v1631_v62 = vsel %vm1622_vm4, %v1544_v51, -inf }
 0x319   :  { %v1632_v42 = vmax.f32 %v1630_v58, %v1631_v62 }
 0x31b   :  { %v1633_v56 = vrot.slane %v1632_v42, 4 }
 0x31d   :  { %v1634_v61 = vmax.f32 %v1632_v42, %v1633_v56 }
 0x31f   :  { %v1635_v2 = vrot.slane %v1634_v61, 2 }
 0x320   :  { %v1613_v7 = vpop.f32.mrf.mxu1 }
 0x321   :  { %v1636_v11 = vmax.f32 %v1634_v61, %v1635_v2  ;;  %v1908_v23 = vsel %vm1826_vm5, %v1613_v7, -inf }
 0x322   :  { %v1615_v15 = vpop.f32.mrf.mxu1 }
 0x323   :  { %v1637_v16 = vrot.slane %v1636_v11, 1 }
 0x324   :  { %v1618_v60 = vpop.f32.mrf.mxu1 }
 0x325   :  { %v1638_v63 = vmax.f32 %v1636_v11, %v1637_v16  ;;  %v1909_v49 = vsel %vm1826_vm5, %v1618_v60, -inf }
 0x326   :  { %v1910_v25 = vmax.f32 %v1908_v23, %v1909_v49  ;;  %v1620_v21 = vpop.f32.mrf.mxu1 }
 0x327   :  { %v1639_v26 = vmax.f32 %v1629_v17, %v1638_v63 }
 0x328   :  { %v1911_v18 = vrot.slane %v1910_v25, 4 }
 0x329   :  { %v1640_v28 = vsub.f32 %v1394_v41, %v1639_v26  ;;  %v1644_v29 = vsub.f32 %v1539_v47, %v1639_v26  ;;  %v1645_v31 = vsub.f32 %v1544_v51, %v1639_v26  ;;  %v160_v41 = vld [vmem:[%s6333_s2 + $0x10] sm:$0xff] }
 0x32a   :  { %v1912_v32 = vmax.f32 %v1910_v25, %v1911_v18 }
 0x32b   :  { %v1641_v24 = vmul.f32 1.442695, %v1640_v28  ;;  %v1646_v33 = vmul.f32 1.442695, %v1644_v29  ;;  %v1648_v19 = vmul.f32 1.442695, %v1645_v31 }
 0x32c   :  { %v1913_v22 = vrot.slane %v1912_v32, 2 }
 0x32d   :  { %5138 = vpow2.f32 %v1641_v24 }
 0x32e   :  { %5140 = vpow2.f32 %v1646_v33  ;;  %v1914_v9 = vmax.f32 %v1912_v32, %v1913_v22 }
 0x32f   :  { %5142 = vpow2.f32 %v1648_v19 }
 0x330   :  { %v1915_v35 = vrot.slane %v1914_v9, 1 }
 0x332   :  { %v1916_v39 = vmax.f32 %v1914_v9, %v1915_v35 }
 0x334   :  { %v1917_v36 = vsub.f32 %v1613_v7, %v1916_v39  ;;  %v1918_v37 = vsub.f32 %v1618_v60, %v1916_v39 }
 0x336   :  { %v1919_v1 = vmul.f32 1.442695, %v1917_v36  ;;  %v1921_v40 = vmul.f32 1.442695, %v1918_v37 }
 0x338   :  { %5144 = vpow2.f32 %v1919_v1  ;;  %v173_v1 = vld [vmem:[#allocation14 + $0x18] sm:$0xff] }
 0x339   :  { %5146 = vpow2.f32 %v1921_v40  ;;  %v171_v40 = vld [vmem:[#allocation14 + $0x8] sm:$0xff] }
 0x33a   :  { %v5139_v44 = vpop.eup %5138 }
 0x33b   :  { %v5141_v14 = vpop.eup %5140  ;;  %v1643_v52 = vmul.f32 %v5139_v44, %v159_v8  ;;  %v170_v8 = vld [vmem:[#allocation14] sm:$0xff]  ;;  %v1974_v44 = vpop.permute.xlu0 %1973 }
 0x33c   :  { %v5143_v30 = vpop.eup %5142  ;;  %v1650_v45 = vmul.f32 %v5141_v14, %v160_v41  ;;  %v172_v41 = vld [vmem:[#allocation14 + $0x10] sm:$0xff] }
 0x33d   :  { %v1651_v43 = vmul.f32 %v5143_v30, %v161_v54  ;;  %v1652_v47 = vsel %vm1622_vm4, %v1643_v52, 0.0  ;;  %v1972_v54 = vpop.permute.xlu1 %1971 }
 0x33e   :  { %v1653_v50 = vrot.slane %v1652_v47, 4  ;;  %v1659_v34 = vsel %vm1622_vm4, %v1650_v45, 0.0 }
 0x33f   :  { %v1660_v55 = vsel %vm1622_vm4, %v1651_v43, 0.0 }
 0x340   :  { %v1654_v51 = vadd.f32 %v1653_v50, %v1652_v47  ;;  %v1661_v57 = vadd.f32 %v1660_v55, %v1659_v34 }
 0x342   :  { %v1655_v58 = vrot.slane %v1654_v51, 2  ;;  %v1662_v62 = vrot.slane %v1661_v57, 4 }
 0x344   :  { %v1656_v42 = vadd.f32 %v1655_v58, %v1654_v51  ;;  %v1663_v56 = vadd.f32 %v1662_v62, %v1661_v57 }
 0x345   :  { %v5145_v61 = vpop.eup %5144 }
 0x346   :  { %v5147_v2 = vpop.eup %5146  ;;  %v1664_v7 = vrot.slane %v1663_v56, 2  ;;  %v1923_v10 = vmul.f32 %v5145_v61, %v162_v5  ;;  %v1657_v15 = vrot.slane %v1656_v42, 1 }
 0x347   :  { %v1924_v11 = vmul.f32 %v5147_v2, %v163_v3 }
 0x348   :  { %v1665_v16 = vadd.f32 %v1664_v7, %v1663_v56  ;;  %v1925_v60 = vsel %vm1826_vm5, %v1923_v10, 0.0  ;;  %v1658_v49 = vadd.f32 %v1657_v15, %v1656_v42 }
 0x349   :  { %v1926_v17 = vsel %vm1826_vm5, %v1924_v11, 0.0 }
 0x34a   :  { %v1666_v63 = vrot.slane %v1665_v16, 1  ;;  %v1927_v23 = vadd.f32 %v1926_v17, %v1925_v60 }
 0x34c   :  { %v1667_v25 = vadd.f32 %v1666_v63, %v1665_v16  ;;  %v1928_v21 = vrot.slane %v1927_v23, 4  ;;  %v2538_v63 = vld [vmem:[#allocation7 + $0x120] sm:$0xff] }
 0x34e   :  { %v1668_v26 = vadd.f32 %v1667_v25, %v1658_v49  ;;  %v1929_v18 = vadd.f32 %v1928_v21, %v1927_v23  ;;  %v2540_v23 = vld [vmem:[#allocation7 + $0x130] sm:$0xff]  ;;  %v2537_v49 = vld [vmem:[#allocation7 + $0x118] sm:$0xff]  ;;  %v2539_v25 = vld [vmem:[#allocation7 + $0x128] sm:$0xff] }
 0x34f   :  { %v2533_v21 = vld [vmem:[#allocation7 + $0xf8] sm:$0xff] }
 0x350   :  { %vm1669_vm6 = vcmp.gt.f32.partialorder %v1668_v26, 0.0  ;;  %v1930_v28 = vrot.slane %v1929_v18, 2 }
 0x351   :  { %v1670_v29 = vsel %vm1669_vm6, %v1668_v26, 1.0  ;;  %v2535_v26 = vld [vmem:[#allocation7 + $0x108] sm:$0xff] }
 0x352   :  { %5148 = vrcp.f32 %v1670_v29  ;;  %v1931_v31 = vadd.f32 %v1930_v28, %v1929_v18  ;;  %v2532_v18 = vld [vmem:[#allocation7 + $0xf0] sm:$0xff]  ;;  %v2534_v28 = vld [vmem:[#allocation7 + $0x100] sm:$0xff] }
 0x353   :  { %v2528_v29 = vld [vmem:[#allocation7 + $0xd0] sm:$0xff] }
 0x354   :  { %v1932_v32 = vrot.slane %v1931_v31, 1 }
 0x356   :  { %v1933_v24 = vadd.f32 %v1932_v32, %v1931_v31  ;;  %v2530_v31 = vld [vmem:[#allocation7 + $0xe0] sm:$0xff]  ;;  %v2527_v32 = vld [vmem:[#allocation7 + $0xc8] sm:$0xff] }
 0x358   :  { %vm1934_vm7 = vcmp.gt.f32.partialorder %v1933_v24, 0.0 }
 0x359   :  { %v1935_v33 = vsel %vm1934_vm7, %v1933_v24, 1.0  ;;  %v2529_v24 = vld [vmem:[#allocation7 + $0xd8] sm:$0xff] }
 0x35a   :  { %5150 = vrcp.f32 %v1935_v33  ;;  %v2523_v33 = vld [vmem:[#allocation7 + $0xa8] sm:$0xff] }
 0x35f   :  { %v5149_v19 = vpop.eup %5148 }
 0x360   :  { %v1673_v22 = vmul.f32 %v5149_v19, %v1650_v45  ;;  %v1672_v9 = vmul.f32 %v5149_v19, %v1643_v52  ;;  %v1674_v35 = vmul.f32 %v5149_v19, %v1651_v43  ;;  %v2525_v19 = vld [vmem:[#allocation7 + $0xb8] sm:$0xff] }
 0x362   :  { %1675 = vxpose.xlu0.b32.start [1/2] (short) (narrow) %v1673_v22, 16  ;;  %1794 = vxpose.xlu1.b32.start.end [1/1] (short) (narrow) %v1672_v9, 16  ;;  %v2522_v22 = vld [vmem:[#allocation7 + $0xa0] sm:$0xff]  ;;  %v2524_v9 = vld [vmem:[#allocation7 + $0xb0] sm:$0xff] }
 0x366   :  { %1676 = vxpose.xlu0.b32.end [2/2] (short) (narrow) %v1674_v35, 16  ;;  %v2827_v35 = vld [vmem:[#allocation8 + $0x190] sm:$0xff] }
 0x367   :  { %v5151_v39 = vpop.eup %5150 }
 0x368   :  { %v1937_v36 = vmul.f32 %v5151_v39, %v1923_v10  ;;  %v1938_v37 = vmul.f32 %v5151_v39, %v1924_v11  ;;  %v5234_v39 = vld [vmem:[#allocation16] sm:$0xff] }
 0x36a   :  { %1939 = vxpose.xlu0.b32.start [1/2] (short) (narrow) %v1937_v36, 8  ;;  %v2225_v36 = vrot.slane %v5234_v39, %v5784_v53 }
 0x36e   :  { %1940 = vxpose.xlu0.b32.end [2/2] (short) (narrow) %v1938_v37, 8 }
 0x384   :  { %2060 = vrot.lane.b32.xlu1 %v173_v1, %s5501_s7 }
 0x388   :  { %2056 = vrot.lane.b32.xlu1 %v171_v40, %s5501_s7 }
 0x38c   :  { %2054 = vrot.lane.b32.xlu1 %v170_v8, %s5501_s7 }
 0x390   :  { %2326 = vrot.lane.b32.xlu1 %v173_v1, %s5502_s9 }
 0x394   :  { %2324 = vrot.lane.b32.xlu1 %v172_v41, %s5502_s9 }
 0x397   :  { %2058 = vrot.lane.b32.xlu0 %v172_v41, %s5501_s7 }
 0x398   :  { %2322 = vrot.lane.b32.xlu1 %v171_v40, %s5502_s9 }
 0x39b   :  { %2244 = vrot.lane.b32.xlu0 %v173_v1, %s5484_s13 }
 0x39c   :  { %2320 = vrot.lane.b32.xlu1 %v170_v8, %s5502_s9 }
 0x39f   :  { %2242 = vrot.lane.b32.xlu0 %v172_v41, %s5484_s13 }
 0x3a3   :  { %2240 = vrot.lane.b32.xlu0 %v171_v40, %s5484_s13 }
 0x3a7   :  { %2238 = vrot.lane.b32.xlu0 %v170_v8, %s5484_s13 }
 0x3de   :  { %v1691_v14 = vpop.trf.xlu0  ;;  %v1810_v52 = vpop.trf.xlu1 }
 0x3df   :  { %4899 = vmatprep.mubr.msk.f32.mxu0 %vm1622_vm4, %v1691_v14  ;;  %4904 = vmatprep.mubr.msk.f32.mxu1 %vm1826_vm5, %v1810_v52 }
 0x3e2   :  { %v1692_v30 = vpop.trf.xlu0  ;;  %v1811_v45 = vpop.trf.xlu1 }
 0x3e3   :  { %4900 = vmatmul.mubr.msk.f32.vlgmr.msra.gmra.mxu0 %vm1622_vm4, %v1692_v30  ;;  %4905 = vmatmul.mubr.msk.f32.vlgmr.msra.gmra.mxu1 %vm1826_vm5, %v1811_v45  ;;  %v2408_v45 = vrot.slane %v5234_v39, %v5678_v59 }
 0x3e4   :  { %4908 = vmatpush3.msra.mxu0 %v1974_v44  ;;  %4911 = vmatprep.mubr.msk.f32.mxu0 %vm5500_vm1, %v5499_v0 }
 0x3e5   :  { %4909 = vmatprep.subr.mxu0 %v5499_v0  ;;  %4922 = vmatprep.mubr.msk.f32.mxu1 %vm192_vm0, %v5648_v38 }
 0x3e6   :  { %4910 = vmatpush3.msra.mxu0 %v1972_v54  ;;  %v1955_v43 = vpop.trf.xlu0 }
 0x3e7   :  { %4912 = vmatmul.mubr.msk.f32.vlgmr.msra.gmra.mxu0 %vm1622_vm4, %v1955_v43  ;;  %4925 = vmatprep.subr.mxu0 %v173_v1  ;;  %v5235_v43 = vld [vmem:[#allocation2 + $0x8] sm:$0xff] }
 0x3e8   :  { %4926 = vmatpush3.msra.mxu0 %v173_v1 }
 0x3e9   :  { %4927 = vmatprep.subr.mxu0 %v172_v41 }
 0x3ea   :  { %4928 = vmatpush3.msra.mxu0 %v172_v41 }
 0x3eb   :  { %4929 = vmatprep.subr.mxu0 %v171_v40 }
 0x3ec   :  { %4930 = vmatpush3.msra.mxu0 %v171_v40  ;;  %v2233_v40 = vrot.slane %v5234_v39, %v5775_v48 }
 0x3ed   :  { %4931 = vmatprep.subr.mxu0 %v170_v8 }
 0x3ee   :  { %4932 = vmatpush3.msra.mxu0 %v170_v8 }
 0x3ef   :  { %4947 = vmatprep.subr.mxu0 %v5499_v0 }
 0x3f6   :  { %v2061_v47 = vpop.permute.xlu1 %2060 }
 0x3f7   :  { %4914 = vmatprep.subr.mxu1 %v2061_v47 }
 0x3f8   :  { %4915 = vmatpush3.msra.mxu1 %v2061_v47 }
 0x3fa   :  { %v2057_v50 = vpop.permute.xlu1 %2056 }
 0x3fe   :  { %v2055_v38 = vpop.permute.xlu1 %2054 }
 0x409   :  { %v2059_v34 = vpop.permute.xlu0 %2058 }
 0x40a   :  { %4916 = vmatprep.subr.mxu1 %v2059_v34 }
 0x40b   :  { %4917 = vmatpush3.msra.mxu1 %v2059_v34 }
 0x40c   :  { %4918 = vmatprep.subr.mxu1 %v2057_v50 }
 0x40d   :  { %4919 = vmatpush3.msra.mxu1 %v2057_v50  ;;  %v2245_v55 = vpop.permute.xlu0 %2244 }
 0x40e   :  { %4920 = vmatprep.subr.mxu1 %v2055_v38 }
 0x40f   :  { %4921 = vmatpush3.msra.mxu1 %v2055_v38 }
 0x410   :  { %4936 = vmatprep.subr.mxu1 %v5499_v0  ;;  %4923 = vmatmul.mubr.msk.f32.vlgmr.msra.gmra.mxu1 %vm192_vm0, %v5656_v46  ;;  %v2327_v46 = vpop.permute.xlu1 %2326 }
 0x411   :  { %4937 = vmatpush3.msra.mxu1 %v2245_v55  ;;  %4944 = vmatprep.mubr.msk.f32.mxu1 %vm5500_vm1, %v5499_v0  ;;  %v2243_v51 = vpop.permute.xlu0 %2242  ;;  %v2414_v55 = vrot.slane %v5234_v39, %v5797_v27 }
 0x412   :  { %4938 = vmatprep.subr.mxu1 %v5499_v0 }
 0x413   :  { %4939 = vmatpush3.msra.mxu1 %v2243_v51  ;;  %v5236_v51 = vld [vmem:[#allocation2] sm:$0xff] }
 0x414   :  { %4940 = vmatprep.subr.mxu1 %v5499_v0  ;;  %v2325_v62 = vpop.permute.xlu1 %2324 }
 0x415   :  { %v2241_v57 = vpop.permute.xlu0 %2240 }
 0x416   :  { %4941 = vmatpush3.msra.mxu1 %v2241_v57 }
 0x417   :  { %4942 = vmatprep.subr.mxu1 %v5499_v0 }
 0x418   :  { %v2323_v7 = vpop.permute.xlu1 %2322 }
 0x419   :  { %v2239_v58 = vpop.permute.xlu0 %2238 }
 0x41a   :  { %4943 = vmatpush3.msra.mxu1 %v2239_v58 }
 0x41b   :  { %4945 = vmatmul.mubr.msk.f32.vlgmr.msra.gmra.mxu1 %vm192_vm0, %v5628_v13  ;;  %2616 = vmatprep.subr.mxu1 %v2538_v63 }
 0x41c   :  { %2656 = vmatprep.mubr.f32.mxu1 %v5499_v0  ;;  %v2321_v13 = vpop.permute.xlu1 %2320  ;;  %2617 = vmatpush1.msra.mxu1 %v2537_v49 }
 0x41d   :  { %2618 = vmatprep.subr.mxu1 %v2533_v21 }
 0x41e   :  { %2619 = vmatpush1.msra.mxu1 %v2532_v18 }
 0x41f   :  { %2620 = vmatprep.subr.mxu1 %v2528_v29 }
 0x420   :  { %2621 = vmatpush1.msra.mxu1 %v2527_v32 }
 0x421   :  { %2622 = vmatprep.subr.mxu1 %v2523_v33 }
 0x422   :  { %2623 = vmatpush1.msra.mxu1 %v2522_v22 }
 0x423   :  { %4958 = vmatprep.subr.mxu1 %v5499_v0 }
 0x4a3   :  { %v4901_v5 = vpop.f32.mrf.mxu0  ;;  %v4906_v42 = vpop.f32.mrf.mxu1 }
 0x4a4   :  { %v1905_v2 = vadd.f32 %v4906_v42, %v4901_v5 }
 0x4a5   :  { %v1785_v56 = vpop.f32.mrf.mxu0  ;;  %v1899_v3 = vpop.f32.mrf.mxu1 }
 0x4a6   :  { %v1900_v61 = vadd.f32 %v1899_v3, %v1785_v56 }
 0x4a7   :  { %v2046_v10 = vpop.f32.mrf.mxu0 }
 0x4a8   :  { %4933 = vmatprep.mubr.msk.f32.mxu0 %vm192_vm0, %v1900_v61 }
 0x4a9   :  { %4934 = vmatmul.mubr.msk.f32.vlgmr.msra.gmra.mxu0 %vm192_vm0, %v1905_v2  ;;  %v4913_v11 = vpop.f32.mrf.mxu0  ;;  %v5237_v2 = vld [vmem:[#allocation5] sm:$0xff] }
 0x4aa   :  { %4948 = vmatpush3.msra.mxu0 %v2327_v46  ;;  %4955 = vmatprep.mubr.msk.f32.mxu0 %vm5500_vm1, %v5499_v0 }
 0x4ab   :  { %4949 = vmatprep.subr.mxu0 %v5499_v0 }
 0x4ac   :  { %4950 = vmatpush3.msra.mxu0 %v2325_v62 }
 0x4ad   :  { %4951 = vmatprep.subr.mxu0 %v5499_v0 }
 0x4ae   :  { %4952 = vmatpush3.msra.mxu0 %v2323_v7 }
 0x4af   :  { %4953 = vmatprep.subr.mxu0 %v5499_v0 }
 0x4b0   :  { %4954 = vmatpush3.msra.mxu0 %v2321_v13 }
 0x4b1   :  { %4956 = vmatmul.mubr.msk.f32.vlgmr.msra.gmra.mxu0 %vm192_vm0, %v2046_v10  ;;  %2687 = vmatprep.subr.mxu0 %v2540_v23 }
 0x4b2   :  { %2727 = vmatprep.mubr.f32.mxu0 %v5499_v0  ;;  %2688 = vmatpush1.msra.mxu0 %v2539_v25 }
 0x4b3   :  { %2689 = vmatprep.subr.mxu0 %v2535_v26 }
 0x4b4   :  { %2690 = vmatpush1.msra.mxu0 %v2534_v28 }
 0x4b5   :  { %2691 = vmatprep.subr.mxu0 %v2530_v31 }
 0x4b6   :  { %2692 = vmatpush1.msra.mxu0 %v2529_v24 }
 0x4b7   :  { %2693 = vmatprep.subr.mxu0 %v2525_v19 }
 0x4b8   :  { %2694 = vmatpush1.msra.mxu0 %v2524_v9 }
 0x4b9   :  { %2926 = vmatprep.subr.mxu0 %v2827_v35 }
 0x4d0   :  { %v4924_v15 = vpop.f32.mrf.mxu1 }
 0x4d2   :  { %v2132_v16 = vpop.f32.mrf.mxu1 }
 0x4db   :  { %v2316_v60 = vpop.f32.mrf.mxu1 }
 0x4dd   :  { %v4946_v17 = vpop.f32.mrf.mxu1 }
 0x569   :  { %v4935_v37 = vpop.f32.mrf.mxu0 }
 0x56a   :  { %v2219_v1 = vadd.f32 %v4935_v37, %v4924_v15 }
 0x56b   :  { %v2213_v8 = vpop.f32.mrf.mxu0 }
 0x56c   :  { %v2227_v41 = vadd.f32 %v2225_v36, %v2219_v1  ;;  %v2214_v44 = vadd.f32 %v2213_v8, %v2132_v16 }
 0x56e   :  { %vm2229_vm8 = vcmp.ge.f32.partialorder %v2227_v41, 0.0  ;;  %v2235_v54 = vmul.f32 %v2233_v40, %v2227_v41  ;;  %v2226_v14 = vadd.f32 %v2225_v36, %v2214_v44 }
 0x570   :  { %v2237_v52 = vsel %vm2229_vm8, %v2227_v41, %v2235_v54  ;;  %vm2228_vm9 = vcmp.ge.f32.partialorder %v2226_v14, 0.0  ;;  %v2234_v30 = vmul.f32 %v2233_v40, %v2226_v14 }
 0x571   :  { %v5968_v47 = vadd.f32 %v5235_v43, %v2237_v52  ;;  %v2401_v50 = vpop.f32.mrf.mxu0 }
 0x572   :  { %v2236_v34 = vsel %vm2228_vm9, %v2226_v14, %v2234_v30  ;;  %v2402_v38 = vadd.f32 %v2401_v50, %v2316_v60 }
 0x573   :  { %v5971_v57 = vadd.f32 %v5236_v51, %v2236_v34  ;;  %v4957_v58 = vpop.f32.mrf.mxu0  ;;  %v2451_v62 = vsel %vm192_vm0, %v5968_v47, 0.0 }
 0x574   :  { %v2409_v46 = vadd.f32 %v2408_v45, %v2402_v38  ;;  %v2421_v38 = vld [vmem:[#allocation16 + $0x8] sm:$0xff] }
 0x575   :  { %v2450_v5 = vsel %vm192_vm0, %v5971_v57, 0.0 }
 0x576   :  { %v2452_v42 = vadd.f32 %v2451_v62, %v2450_v5  ;;  %vm2410_vm10 = vcmp.ge.f32.partialorder %v2409_v46, 0.0  ;;  %v2415_v56 = vmul.f32 %v2414_v55, %v2409_v46  ;;  %v2514_v55 = vrot.slane %v2421_v38, %v5618_v4 }
 0x578   :  { %v2453_v3 = vrot.slane %v2452_v42, 4  ;;  %v2416_v61 = vsel %vm2410_vm10, %v2409_v46, %v2415_v56  ;;  %v2519_v46 = vrot.slane %v2421_v38, %v5621_v6  ;;  %v2541_v56 = vld [vmem:[#allocation7 + $0x138] sm:$0xff] }
 0x579   :  { %v5977_v7 = vadd.f32 %v5237_v2, %v2416_v61  ;;  %v2820_v2 = vld [vmem:[#allocation8 + $0x158] sm:$0xff] }
 0x57a   :  { %v2454_v10 = vadd.f32 %v2453_v3, %v2452_v42  ;;  %v2826_v3 = vld [vmem:[#allocation8 + $0x188] sm:$0xff] }
 0x57b   :  { %v2490_v11 = vsel %vm192_vm0, %v5977_v7, 0.0 }
 0x57c   :  { %v2455_v13 = vrot.slane %v2454_v10, 2  ;;  %v2491_v15 = vrot.slane %v2490_v11, 4 }
 0x57e   :  { %v2456_v16 = vadd.f32 %v2455_v13, %v2454_v10  ;;  %v2492_v60 = vadd.f32 %v2491_v15, %v2490_v11  ;;  %v2481_v10 = vrot.slane %v2421_v38, %v5626_v12  ;;  %v2536_v11 = vld [vmem:[#allocation7 + $0x110] sm:$0xff]  ;;  %v2813_v15 = vld [vmem:[#allocation8 + $0x120] sm:$0xff] }
 0x57f   :  { %v2819_v13 = vld [vmem:[#allocation8 + $0x150] sm:$0xff] }
 0x580   :  { %v2457_v17 = vrot.slane %v2456_v16, 1  ;;  %v2493_v63 = vrot.slane %v2492_v60, 2 }
 0x582   :  { %v2458_v23 = vadd.f32 %v2457_v17, %v2456_v16  ;;  %v2494_v49 = vadd.f32 %v2493_v63, %v2492_v60  ;;  %v2531_v16 = vld [vmem:[#allocation7 + $0xe8] sm:$0xff]  ;;  %v2812_v60 = vld [vmem:[#allocation8 + $0x118] sm:$0xff] }
 0x583   :  { %v2806_v17 = vld [vmem:[#allocation8 + $0xe8] sm:$0xff] }
 0x584   :  { %v2459_v25 = vmul.f32 0.0625, %v2458_v23  ;;  %v2495_v21 = vrot.slane %v2494_v49, 1  ;;  %v2487_v23 = vrot.slane %v2421_v38, %v5637_v20  ;;  %v6041_v38 = vld [vmem:[#allocation10 + $0x16] sm:$0x3f] }
 0x586   :  { %v2460_v26 = vsub.f32 %v5971_v57, %v2459_v25  ;;  %v5983_v18 = vsub.f32 %v5968_v47, %v2459_v25  ;;  %v2496_v28 = vadd.f32 %v2495_v21, %v2494_v49  ;;  %v2526_v49 = vld [vmem:[#allocation7 + $0xc0] sm:$0xff] }
 0x587   :  { %v2805_v25 = vld [vmem:[#allocation8 + $0xe0] sm:$0xff] }
 0x588   :  { %v2462_v29 = vmul.f32 %v2460_v26, %v2460_v26  ;;  %v2463_v31 = vmul.f32 %v5983_v18, %v5983_v18  ;;  %v2497_v32 = vmul.f32 0.125, %v2496_v28  ;;  %v2829_v28 = vld [vmem:[#allocation8 + $0x1a0] sm:$0xff] }
 0x58a   :  { %v2464_v24 = vsel %vm192_vm0, %v2462_v29, 0.0  ;;  %v2465_v33 = vsel %vm192_vm0, %v2463_v31, 0.0  ;;  %v2498_v19 = vsub.f32 %v5977_v7, %v2497_v32  ;;  %v2831_v29 = vld [vmem:[#allocation8 + $0x1b0] sm:$0xff]  ;;  %v2828_v31 = vld [vmem:[#allocation8 + $0x198] sm:$0xff]  ;;  %v2830_v32 = vld [vmem:[#allocation8 + $0x1a8] sm:$0xff] }
 0x58b   :  { %v2466_v22 = vadd.f32 %v2465_v33, %v2464_v24  ;;  %v2824_v24 = vld [vmem:[#allocation8 + $0x178] sm:$0xff] }
 0x58c   :  { %v2499_v9 = vmul.f32 %v2498_v19, %v2498_v19 }
 0x58d   :  { %v2467_v35 = vrot.slane %v2466_v22, 4 }
 0x58e   :  { %v2500_v39 = vsel %vm192_vm0, %v2499_v9, 0.0  ;;  %v2815_v9 = vld [vmem:[#allocation8 + $0x130] sm:$0xff] }
 0x58f   :  { %v2468_v36 = vadd.f32 %v2467_v35, %v2466_v22  ;;  %v2501_v37 = vrot.slane %v2500_v39, 4  ;;  %v2823_v22 = vld [vmem:[#allocation8 + $0x170] sm:$0xff]  ;;  %v2817_v35 = vld [vmem:[#allocation8 + $0x140] sm:$0xff] }
 0x591   :  { %v2469_v1 = vrot.slane %v2468_v36, 2  ;;  %v2502_v40 = vadd.f32 %v2501_v37, %v2500_v39  ;;  %v2816_v37 = vld [vmem:[#allocation8 + $0x138] sm:$0xff] }
 0x593   :  { %v2470_v8 = vadd.f32 %v2469_v1, %v2468_v36  ;;  %v2503_v41 = vrot.slane %v2502_v40, 2  ;;  %v2814_v36 = vld [vmem:[#allocation8 + $0x128] sm:$0xff]  ;;  %v2808_v1 = vld [vmem:[#allocation8 + $0xf8] sm:$0xff] }
 0x595   :  { %v2471_v44 = vrot.slane %v2470_v8, 1  ;;  %v2504_v54 = vadd.f32 %v2503_v41, %v2502_v40  ;;  %v2810_v40 = vld [vmem:[#allocation8 + $0x108] sm:$0xff]  ;;  %v2809_v41 = vld [vmem:[#allocation8 + $0x100] sm:$0xff] }
 0x597   :  { %v2472_v14 = vadd.f32 %v2471_v44, %v2470_v8  ;;  %v2505_v52 = vrot.slane %v2504_v54, 1  ;;  %v2807_v8 = vld [vmem:[#allocation8 + $0xf0] sm:$0xff]  ;;  %v2832_v44 = vld [vmem:[#allocation8 + $0x1b8] sm:$0xff] }
 0x599   :  { %v2506_v30 = vadd.f32 %v2505_v52, %v2504_v54  ;;  %v2473_v45 = vmul.f32 0.0625, %v2472_v14  ;;  %v2825_v54 = vld [vmem:[#allocation8 + $0x180] sm:$0xff]  ;;  %v2818_v14 = vld [vmem:[#allocation8 + $0x148] sm:$0xff]  ;;  %v2811_v52 = vld [vmem:[#allocation8 + $0x110] sm:$0xff] }
 0x59b   :  { %v2507_v43 = vmul.f32 0.125, %v2506_v30  ;;  %v2474_v34 = vadd.f32 1e-05, %v2473_v45 }
 0x59d   :  { %v2508_v50 = vadd.f32 1e-05, %v2507_v43 }
 0x59f   :  { %5152 = vrsqrt.f32 %v2508_v50 }
 0x5a0   :  { %5154 = vrsqrt.f32 %v2474_v34 }
 0x5ac   :  { %v5153_v51 = vpop.eup %5152 }
 0x5ad   :  { %v2510_v58 = vmul.f32 %v5153_v51, %v2498_v19  ;;  %v5155_v62 = vpop.eup %5154  ;;  %v2821_v19 = vld [vmem:[#allocation8 + $0x160] sm:$0xff]  ;;  %v2860_v51 = vrot.slane %v6041_v38, %v5678_v59 }
 0x5ae   :  { %v2476_v61 = vmul.f32 %v5155_v62, %v2460_v26  ;;  %v2477_v21 = vmul.f32 %v5155_v62, %v5983_v18  ;;  %v2822_v18 = vld [vmem:[#allocation8 + $0x168] sm:$0xff] }
 0x5af   :  { %v2515_v5 = vmul.f32 %v2514_v55, %v2510_v58 }
 0x5b0   :  { %v2482_v63 = vmul.f32 %v2481_v10, %v2476_v61  ;;  %v2483_v33 = vmul.f32 %v2481_v10, %v2477_v21 }
 0x5b1   :  { %v5993_v42 = vadd.f32 %v2519_v46, %v2515_v5  ;;  %v2895_v46 = vrot.slane %v2860_v51, %v5637_v20 }
 0x5b2   :  { %v6007_v26 = vadd.f32 %v2487_v23, %v2482_v63  ;;  %v6015_v39 = vadd.f32 %v2487_v23, %v2483_v33  ;;  %v2433_v33 = vld [vmem:[#allocation11 + $0x90] sm:$0xff] }
 0x5b3   :  { %4749 = vmatmul.mubr.msk.f32.vlgmr.msra.gmra.mxu1 %vm192_vm0, %v5993_v42  ;;  %4750 = vmatmul.mubr.msk.f32.vlgmr.msra.gmra.mxu0 %vm192_vm0, %v5993_v42 }
 0x5b4   :  { %4959 = vmatpush3.msra.mxu1 %v2541_v56  ;;  %2927 = vmatpush1.msra.mxu0 %v2826_v3 }
 0x5b5   :  { %4960 = vmatprep.subr.mxu1 %v5499_v0  ;;  %2928 = vmatprep.subr.mxu0 %v2820_v2 }
 0x5b6   :  { %4961 = vmatpush3.msra.mxu1 %v2536_v11  ;;  %2929 = vmatpush1.msra.mxu0 %v2819_v13 }
 0x5b7   :  { %4962 = vmatprep.subr.mxu1 %v5499_v0  ;;  %2930 = vmatprep.subr.mxu0 %v2813_v15 }
 0x5b8   :  { %4963 = vmatpush3.msra.mxu1 %v2531_v16  ;;  %2931 = vmatpush1.msra.mxu0 %v2812_v60 }
 0x5b9   :  { %4964 = vmatprep.subr.mxu1 %v5499_v0  ;;  %2932 = vmatprep.subr.mxu0 %v2806_v17 }
 0x5ba   :  { %4965 = vmatpush3.msra.mxu1 %v2526_v49  ;;  %4966 = vmatprep.mubr.msk.f32.mxu1 %vm5500_vm1, %v5499_v0 }
 0x5bb   :  { %2933 = vmatpush1.msra.mxu0 %v2805_v25  ;;  %2966 = vmatprep.mubr.f32.mxu0 %v5499_v0 }
 0x5bc   :  { %4967 = vmatmul.mubr.msk.f32.vlgmr.msra.gmra.mxu1 %vm192_vm0, %v5993_v42  ;;  %4752 = vmatmul.mubr.msk.f32.vlgmr.msra.gmra.mxu0 %vm192_vm0, %v6007_v26 }
 0x5bd   :  { %3003 = vmatprep.subr.mxu1 %v2829_v28  ;;  %3080 = vmatprep.subr.mxu0 %v2831_v29  ;;  %v2438_v28 = vld [vmem:[#allocation11 + $0xb8] sm:$0xff]  ;;  %v2437_v29 = vld [vmem:[#allocation11 + $0xb0] sm:$0xff] }
 0x5be   :  { %3004 = vmatpush1.msra.mxu1 %v2828_v31  ;;  %3081 = vmatpush1.msra.mxu0 %v2830_v32  ;;  %v2563_v31 = vrot.slane %v6041_v38, %v5626_v12 }
 0x5bf   :  { %3005 = vmatprep.subr.mxu1 %v2822_v18  ;;  %3082 = vmatprep.subr.mxu0 %v2824_v24  ;;  %v2434_v24 = vld [vmem:[#allocation11 + $0x98] sm:$0xff] }
 0x5c0   :  { %2972 = vmatprep.mubr.f32.mxu0 %v5499_v0  ;;  %3006 = vmatpush1.msra.mxu1 %v2821_v19  ;;  %v2588_v18 = vrot.slane %v2563_v31, %v5626_v12 }
 0x5c1   :  { %3083 = vmatpush1.msra.mxu0 %v2823_v22  ;;  %3007 = vmatprep.subr.mxu1 %v2815_v9  ;;  %v2446_v22 = vld [vmem:[#allocation11 + $0xf8] sm:$0xff] }
 0x5c2   :  { %4753 = vmatmul.mubr.msk.f32.gmra.mxu0 %vm192_vm0, %v6015_v39  ;;  %3084 = vmatprep.subr.mxu0 %v2817_v35 }
 0x5c3   :  { %3008 = vmatpush1.msra.mxu1 %v2814_v36  ;;  %3085 = vmatpush1.msra.mxu0 %v2816_v37 }
 0x5c4   :  { %3009 = vmatprep.subr.mxu1 %v2808_v1  ;;  %3086 = vmatprep.subr.mxu0 %v2810_v40  ;;  %v2436_v1 = vld [vmem:[#allocation11 + $0xa8] sm:$0xff] }
 0x5c5   :  { %3010 = vmatpush1.msra.mxu1 %v2807_v8  ;;  %3043 = vmatprep.mubr.f32.mxu1 %v5499_v0  ;;  %v2435_v8 = vld [vmem:[#allocation11 + $0xa0] sm:$0xff] }
 0x5c6   :  { %3087 = vmatpush1.msra.mxu0 %v2809_v41  ;;  %3120 = vmatprep.mubr.f32.mxu0 %v5499_v0  ;;  %v2432_v41 = vld [vmem:[#allocation11 + $0x88] sm:$0xff] }
 0x5c7   :  { %4754 = vmatmul.mubr.msk.f32.vlgmr.msra.gmra.mxu1 %vm192_vm0, %v6007_v26  ;;  %4756 = vmatmul.mubr.msk.f32.vlgmr.msra.gmra.mxu0 %vm192_vm0, %v6007_v26 }
 0x5c8   :  { %4969 = vmatprep.subr.mxu1 %v2832_v44  ;;  %3049 = vmatprep.mubr.f32.mxu1 %v5499_v0 }
 0x5c9   :  { %4970 = vmatpush3.msra.mxu1 %v2832_v44  ;;  %3126 = vmatprep.mubr.f32.mxu0 %v5499_v0  ;;  %v2431_v44 = vld [vmem:[#allocation11 + $0x80] sm:$0xff] }
 0x5ca   :  { %4971 = vmatprep.subr.mxu1 %v2825_v54  ;;  %3540 = vmatprep.subr.mxu0 %v2436_v1 }
 0x5cb   :  { %4972 = vmatpush3.msra.mxu1 %v2825_v54  ;;  %4757 = vmatmul.mubr.msk.f32.gmra.mxu0 %vm192_vm0, %v6015_v39  ;;  %v2444_v54 = vld [vmem:[#allocation11 + $0xe8] sm:$0xff] }
 0x5cc   :  { %4755 = vmatmul.mubr.msk.f32.gmra.mxu1 %vm192_vm0, %v6015_v39  ;;  %4973 = vmatprep.subr.mxu1 %v2818_v14 }
 0x5cd   :  { %4974 = vmatpush3.msra.mxu1 %v2818_v14  ;;  %4977 = vmatprep.mubr.msk.f32.mxu1 %vm192_vm0, %v6007_v26 }
 0x5ce   :  { %4975 = vmatprep.subr.mxu1 %v2811_v52  ;;  %3541 = vmatpush1.xpose.msra.mxu0 %v2435_v8 }
 0x5cf   :  { %4976 = vmatpush3.msra.mxu1 %v2811_v52  ;;  %3542 = vmatprep.subr.mxu0 %v2432_v41 }
 0x5d0   :  { %4978 = vmatmul.mubr.msk.f32.vlgmr.msra.gmra.mxu1 %vm192_vm0, %v6015_v39  ;;  %3610 = vmatprep.subr.mxu1 %v2438_v28 }
 0x5d1   :  { %3611 = vmatpush1.xpose.msra.mxu1 %v2437_v29 }
 0x5d2   :  { %3612 = vmatprep.subr.mxu1 %v2434_v24  ;;  %3543 = vmatpush1.xpose.msra.mxu0 %v2431_v44 }
 0x5d3   :  { %3680 = vmatprep.subr.mxu0 %v2444_v54 }
 0x5d5   :  { %3613 = vmatpush1.xpose.msra.mxu1 %v2433_v33 }
 0x5d6   :  { %3755 = vmatprep.subr.mxu1 %v2446_v22 }
 0x673   :  { %v6035_v30 = vpop.f32.mrf.mxu1 }
 0x675   :  { %v6037_v45 = vpop.f32.mrf.mxu1 }
 0x67c   :  { %v2800_v43 = vpop.f32.mrf.mxu1 }
 0x67d   :  { %v6108_v19 = vadd.f32 %v2800_v43, %v2588_v18  ;;  %v6135_v43 = vld [vmem:[#allocation10 + $0xe] sm:$0xff] }
 0x67e   :  { %v4968_v50 = vpop.f32.mrf.mxu1  ;;  %v2848_v8 = vrot.slane %v6135_v43, %v5797_v27 }
 0x67f   :  { %v3456_v9 = vrot.slane %v6108_v19, 4  ;;  %v3462_v35 = vrot.slane %v6108_v19, 6  ;;  %v3448_v36 = vrot.slane %v6108_v19, 2  ;;  %v3466_v37 = vrot.slane %v6108_v19, 7 }
 0x680   :  { %v3452_v40 = vrot.slane %v6108_v19, 3  ;;  %v2559_v50 = vrot.slane %v6135_v43, %v5775_v48 }
 0x687   :  { %v6039_v34 = vpop.f32.mrf.mxu1 }
 0x689   :  { %v6043_v55 = vpop.f32.mrf.mxu1 }
 0x68c   :  { %v6047_v58 = vpop.f32.mrf.mxu1 }
 0x68e   :  { %v6050_v62 = vpop.f32.mrf.mxu1 }
 0x690   :  { %v4979_v5 = vpop.f32.mrf.mxu1 }
 0x691   :  { %v6052_v56 = vadd.f32 %v4979_v5, %v2895_v46 }
 0x692   :  { %v3199_v11 = vpop.f32.mrf.mxu1 }
 0x693   :  { %3338 = vrot.lane.b32.xlu0 %v6052_v56, %s5501_s7  ;;  %v3250_v3 = vrot.slane %v6052_v56, 5  ;;  %v3236_v61 = vrot.slane %v6052_v56, 1  ;;  %v3254_v2 = vrot.slane %v6052_v56, 6  ;;  %v3240_v10 = vrot.slane %v6052_v56, 2 }
 0x694   :  { %v3258_v13 = vrot.slane %v6052_v56, 7  ;;  %v6069_v15 = vadd.f32 %v3199_v11, %v2895_v46  ;;  %v3244_v16 = vrot.slane %v6052_v56, 3  ;;  %v3248_v60 = vrot.slane %v6052_v56, 4  ;;  %v2729_v46 = vpop.f32.mrf.mxu0 }
 0x695   :  { %3251 = vrot.lane.b32.xlu1 %v3250_v3, %s5484_s13 }
 0x696   :  { %v3223_v17 = vrot.slane %v6069_v15, 5  ;;  %v3209_v63 = vrot.slane %v6069_v15, 1  ;;  %v3213_v23 = vrot.slane %v6069_v15, 2  ;;  %v3227_v49 = vrot.slane %v6069_v15, 6 }
 0x697   :  { %3237 = vrot.lane.b32.xlu0 %v3236_v61, %s5484_s13  ;;  %v3217_v25 = vrot.slane %v6069_v15, 3  ;;  %v3231_v21 = vrot.slane %v6069_v15, 7  ;;  %v3221_v32 = vrot.slane %v6069_v15, 4 }
 0x699   :  { %3255 = vrot.lane.b32.xlu1 %v3254_v2, %s5502_s9 }
 0x69b   :  { %3241 = vrot.lane.b32.xlu0 %v3240_v10, %s5502_s9 }
 0x69d   :  { %3259 = vrot.lane.b32.xlu1 %v3258_v13, %s5501_s7 }
 0x69f   :  { %3318 = vrot.lane.b32.xlu0 %v6069_v15, %s5501_s7 }
 0x6a1   :  { %3245 = vrot.lane.b32.xlu1 %v3244_v16, %s5501_s7 }
 0x6a3   :  { %3342 = vrot.lane.b32.xlu0 %v3240_v10, %s5484_s13  ;;  %v2584_v10 = vrot.slane %v2559_v50, %v5626_v12 }
 0x6a5   :  { %3348 = vrot.lane.b32.xlu1 %v3248_v60, %s5501_s7 }
 0x6a7   :  { %3224 = vrot.lane.b32.xlu0 %v3223_v17, %s5484_s13 }
 0x6a9   :  { %3352 = vrot.lane.b32.xlu1 %v3254_v2, %s5484_s13  ;;  %v2555_v2 = vrot.slane %v6135_v43, %v5784_v53 }
 0x6ab   :  { %3210 = vrot.lane.b32.xlu0 %v3209_v63, %s5484_s13 }
 0x6ad   :  { %3355 = vrot.lane.b32.xlu1 %v3258_v13, %s5502_s9  ;;  %v2731_v13 = vpop.f32.mrf.mxu0 }
 0x6ae   :  { %v2732_v28 = vadd.f32 %v2731_v13, %v2584_v10  ;;  %v2551_v13 = vrot.slane %v6135_v43, %v5618_v4 }
 0x6af   :  { %3214 = vrot.lane.b32.xlu0 %v3213_v23, %s5502_s9  ;;  %v2968_v10 = vpop.f32.mrf.mxu0 }
 0x6b1   :  { %3228 = vrot.lane.b32.xlu1 %v3227_v49, %s5502_s9 }
 0x6b3   :  { %3218 = vrot.lane.b32.xlu0 %v3217_v25, %s5501_s7 }
 0x6b5   :  { %3232 = vrot.lane.b32.xlu1 %v3231_v21, %s5501_s7 }
 0x6b7   :  { %3328 = vrot.lane.b32.xlu0 %v3221_v32, %s5501_s7 }
 0x6b9   :  { %3332 = vrot.lane.b32.xlu1 %v3227_v49, %s5484_s13 }
 0x6bb   :  { %3322 = vrot.lane.b32.xlu0 %v3213_v23, %s5484_s13 }
 0x6bd   :  { %3335 = vrot.lane.b32.xlu1 %v3231_v21, %s5502_s9  ;;  %v2580_v21 = vrot.slane %v2555_v2, %v5626_v12 }
 0x6bf   :  { %3325 = vrot.lane.b32.xlu0 %v3217_v25, %s5502_s9 }
 0x6c1   :  { %3345 = vrot.lane.b32.xlu1 %v3244_v16, %s5502_s9 }
 0x6c3   :  { %3457 = vrot.lane.b32.xlu0 %v3456_v9, %s5501_s7  ;;  %v2730_v9 = vadd.f32 %v2729_v46, %v2580_v21  ;;  %v2547_v46 = vrot.slane %v6135_v43, %v5626_v12 }
 0x6c5   :  { %3443 = vrot.lane.b32.xlu1 %v6108_v19, %s5501_s7 }
 0x6c7   :  { %3463 = vrot.lane.b32.xlu0 %v3462_v35, %s5484_s13 }
 0x6c9   :  { %3449 = vrot.lane.b32.xlu1 %v3448_v36, %s5484_s13 }
 0x6cb   :  { %3467 = vrot.lane.b32.xlu0 %v3466_v37, %s5502_s9 }
 0x6cd   :  { %3453 = vrot.lane.b32.xlu1 %v3452_v40, %s5502_s9 }
 0x6cf   :  { %3963 = vrot.lane.b32.xlu0 %v6052_v56, %s5502_s9 }
 0x6d1   :  { %3961 = vrot.lane.b32.xlu1 %v6069_v15, %s5502_s9 }
 0x6d3   :  { %4226 = vrot.lane.b32.xlu0 %v6052_v56, %s5484_s13 }
 0x6d5   :  { %4224 = vrot.lane.b32.xlu1 %v6069_v15, %s5484_s13 }
 0x705   :  { %v6133_v14 = vpop.permute.xlu0 %3338 }
 0x707   :  { %v3252_v52 = vpop.permute.xlu1 %3251 }
 0x708   :  { %v3271_v16 = vsel %vm192_vm0, %v3248_v60, %v3252_v52  ;;  %v2883_v52 = vrot.slane %v2848_v8, %v5637_v20 }
 0x709   :  { %v3238_v51 = vpop.permute.xlu0 %3237 }
 0x70a   :  { %v3268_v18 = vsel %vm192_vm0, %v6052_v56, %v3238_v51 }
 0x70b   :  { %v3256_v5 = vpop.permute.xlu1 %3255 }
 0x70c   :  { %v3272_v23 = vsel %vm1006_vm2, %v3271_v16, %v3256_v5  ;;  %v3048_v16 = vadd.f32 %v6043_v55, %v2883_v52 }
 0x70d   :  { %v3242_v11 = vpop.permute.xlu0 %3241 }
 0x70e   :  { %v3269_v24 = vsel %vm1006_vm2, %v3268_v18, %v3242_v11 }
 0x70f   :  { %v3260_v49 = vpop.permute.xlu1 %3259 }
 0x710   :  { %v3273_v25 = vsel %vm1008_vm3, %v3272_v23, %v3260_v49 }
 0x711   :  { %v3289_v29 = vrot.slane %v3273_v25, %v5626_v12  ;;  %v6149_v31 = vpop.permute.xlu0 %3318  ;;  %v2572_v25 = vrot.slane %v2547_v46, %v5626_v12 }
 0x713   :  { %v3293_v33 = vadd.f32 %v3289_v29, %v2732_v28  ;;  %v3246_v22 = vpop.permute.xlu1 %3245  ;;  %v2970_v29 = vpop.f32.mrf.mxu0 }
 0x714   :  { %v3270_v60 = vsel %vm1008_vm3, %v3269_v24, %v3246_v22  ;;  %v2576_v24 = vrot.slane %v2551_v13, %v5626_v12 }
 0x715   :  { %v4763_v35 = vmul.f32 -1.442695, %v3293_v33  ;;  %v3285_v36 = vrot.slane %v3270_v60, %v5626_v12  ;;  %v6156_v37 = vpop.permute.xlu0 %3342 }
 0x717   :  { %5156 = vpow2.f32 %v4763_v35  ;;  %v3292_v1 = vadd.f32 %v3285_v36, %v2730_v9  ;;  %v3349_v40 = vpop.permute.xlu1 %3348  ;;  %v2659_v35 = vadd.f32 %v6035_v30, %v2572_v25  ;;  %v2844_v25 = vrot.slane %v6135_v43, %v5678_v59 }
 0x718   :  { %v3367_v51 = vsel %vm192_vm0, %v3349_v40, %v3250_v3 }
 0x719   :  { %v4762_v41 = vmul.f32 -1.442695, %v3292_v1  ;;  %v3225_v44 = vpop.permute.xlu0 %3224 }
 0x71a   :  { %v3265_v55 = vsel %vm192_vm0, %v3221_v32, %v3225_v44  ;;  %v2661_v32 = vadd.f32 %v6037_v45, %v2576_v24 }
 0x71b   :  { %5158 = vpow2.f32 %v4762_v41  ;;  %v3353_v54 = vpop.permute.xlu1 %3352  ;;  %v2840_v41 = vrot.slane %v6135_v43, %v5621_v6 }
 0x71c   :  { %v3368_v5 = vsel %vm1006_vm2, %v3367_v51, %v3353_v54  ;;  %v2974_v54 = vpop.f32.mrf.mxu0 }
 0x71d   :  { %v3211_v50 = vpop.permute.xlu0 %3210 }
 0x71e   :  { %v3262_v18 = vsel %vm192_vm0, %v6069_v15, %v3211_v50 }
 0x71f   :  { %v3356_v2 = vpop.permute.xlu1 %3355 }
 0x720   :  { %v3369_v11 = vsel %vm1008_vm3, %v3368_v5, %v3356_v2  ;;  %v2836_v5 = vrot.slane %v6135_v43, %v5637_v20 }
 0x721   :  { %v3385_v23 = vrot.slane %v3369_v11, %v5626_v12  ;;  %v3215_v49 = vpop.permute.xlu0 %3214 }
 0x722   :  { %v3263_v4 = vsel %vm1006_vm2, %v3262_v18, %v3215_v49  ;;  %v2976_v49 = vpop.f32.mrf.mxu0  ;;  %v3054_v18 = vadd.f32 %v6050_v62, %v2883_v52 }
 0x723   :  { %v3389_v3 = vadd.f32 %v3385_v23, %v3048_v16  ;;  %v3229_v21 = vpop.permute.xlu1 %3228  ;;  %v2875_v16 = vrot.slane %v2840_v41, %v5637_v20 }
 0x724   :  { %v5157_v28 = vpop.eup %5156  ;;  %v3266_v36 = vsel %vm1006_vm2, %v3265_v55, %v3229_v21 }
 0x725   :  { %v3309_v33 = vadd.f32 1.0, %v5157_v28  ;;  %v4767_v22 = vmul.f32 -1.442695, %v3389_v3  ;;  %v3219_v60 = vpop.permute.xlu0 %3218  ;;  %v2871_v28 = vrot.slane %v2836_v5, %v5637_v20  ;;  %v2977_v55 = vadd.f32 %v2976_v49, %v2875_v16 }
 0x726   :  { %v3264_v9 = vsel %vm1008_vm3, %v3263_v4, %v3219_v60  ;;  %v2879_v4 = vrot.slane %v2844_v25, %v5637_v20  ;;  %v6201_v60 = vpop.f32.mrf.mxu0 }
 0x727   :  { %5160 = vrcp.f32 %v3309_v33  ;;  %v3277_v1 = vrot.slane %v3264_v9, %v5626_v12  ;;  %v3233_v40 = vpop.permute.xlu1 %3232  ;;  %v3393_v9 = vadd.f32 %v3385_v23, %v3054_v18 }
 0x728   :  { %v5159_v8 = vpop.eup %5158  ;;  %5162 = vpow2.f32 %v4767_v22  ;;  %v3267_v50 = vsel %vm1008_vm3, %v3266_v36, %v3233_v40  ;;  %v2971_v22 = vadd.f32 %v2970_v29, %v2875_v16  ;;  %v2969_v36 = vadd.f32 %v2968_v10, %v2871_v28  ;;  %v3124_v56 = vpop.f32.mrf.mxu0 }
 0x729   :  { %v3308_v44 = vadd.f32 1.0, %v5159_v8  ;;  %v3290_v51 = vadd.f32 %v3277_v1, %v2659_v35  ;;  %v3281_v30 = vrot.slane %v3267_v50, %v5626_v12  ;;  %v3329_v46 = vpop.permute.xlu0 %3328  ;;  %v2975_v29 = vadd.f32 %v2974_v54, %v2871_v28 }
 0x72a   :  { %v3361_v45 = vsel %vm192_vm0, %v3329_v46, %v3223_v17  ;;  %v3358_v17 = vsel %vm192_vm0, %v6149_v31, %v3209_v63  ;;  %v3364_v1 = vsel %vm192_vm0, %v6133_v14, %v3236_v61  ;;  %v3046_v50 = vadd.f32 %v6039_v34, %v2879_v4  ;;  %v3128_v49 = vpop.f32.mrf.mxu0 }
 0x72b   :  { %5164 = vrcp.f32 %v3308_v44  ;;  %v4760_v2 = vmul.f32 -1.442695, %v3290_v51  ;;  %v3291_v11 = vadd.f32 %v3281_v30, %v2661_v32  ;;  %v3333_v13 = vpop.permute.xlu1 %3332  ;;  %v3365_v63 = vsel %vm1006_vm2, %v3364_v1, %v6156_v37 }
 0x72c   :  { %v3362_v24 = vsel %vm1006_vm2, %v3361_v45, %v3333_v13  ;;  %v2856_v10 = vrot.slane %v6041_v38, %v5621_v6  ;;  %v4771_v14 = vmul.f32 -1.442695, %v3393_v9  ;;  %v3052_v30 = vadd.f32 %v6047_v58, %v2879_v4  ;;  %v2445_v13 = vld [vmem:[#allocation11 + $0xf0] sm:$0xff] }
 0x72d   :  { %5166 = vpow2.f32 %v4760_v2  ;;  %v4761_v3 = vmul.f32 -1.442695, %v3291_v11  ;;  %v3323_v21 = vpop.permute.xlu0 %3322  ;;  %v2852_v34 = vrot.slane %v6041_v38, %v5637_v20  ;;  %v3460_v38 = vrot.slane %v6108_v19, 5 }
 0x72e   :  { %v3359_v62 = vsel %vm1006_vm2, %v3358_v17, %v3323_v21  ;;  %v2442_v21 = vld [vmem:[#allocation11 + $0xd8] sm:$0xff]  ;;  %v2891_v18 = vrot.slane %v2856_v10, %v5637_v20  ;;  %v2441_v17 = vld [vmem:[#allocation11 + $0xd0] sm:$0xff] }
 0x72f   :  { %5168 = vpow2.f32 %v4761_v3  ;;  %v3336_v33 = vpop.permute.xlu1 %3335 }
 0x730   :  { %v3363_v43 = vsel %vm1008_vm3, %v3362_v24, %v3336_v33  ;;  %v2887_v33 = vrot.slane %v2852_v34, %v5637_v20  ;;  %v3125_v1 = vadd.f32 %v3124_v56, %v2891_v18 }
 0x731   :  { %v3377_v52 = vrot.slane %v3363_v43, %v5626_v12  ;;  %v3326_v35 = vpop.permute.xlu0 %3325 }
 0x732   :  { %v3360_v15 = vsel %vm1008_vm3, %v3359_v62, %v3326_v35 }
 0x733   :  { %v3387_v31 = vadd.f32 %v3377_v52, %v2971_v22  ;;  %v3391_v40 = vadd.f32 %v3377_v52, %v2977_v55  ;;  %v3373_v23 = vrot.slane %v3360_v15, %v5626_v12  ;;  %v3346_v8 = vpop.permute.xlu1 %3345  ;;  %v3130_v55 = vpop.f32.mrf.mxu0  ;;  %v3446_v52 = vrot.slane %v6108_v19, 1 }
 0x734   :  { %v5161_v41 = vpop.eup %5160  ;;  %v3366_v54 = vsel %vm1008_vm3, %v3365_v63, %v3346_v8  ;;  %v3131_v63 = vadd.f32 %v3130_v55, %v2891_v18  ;;  %v3123_v8 = vadd.f32 %v6201_v60, %v2887_v33  ;;  %v2440_v18 = vld [vmem:[#allocation11 + $0xc8] sm:$0xff] }
 0x735   :  { %v5163_v61 = vpop.eup %5162  ;;  %v4765_v32 = vmul.f32 -1.442695, %v3387_v31  ;;  %v3386_v44 = vadd.f32 %v3373_v23, %v2969_v36  ;;  %v3390_v51 = vadd.f32 %v3373_v23, %v2975_v29  ;;  %v3458_v37 = vpop.permute.xlu0 %3457  ;;  %3646 = vmatprep.mubr.f32.mxu1 %v5161_v41  ;;  %v4769_v5 = vmul.f32 -1.442695, %v3391_v40 }
 0x736   :  { %v3421_v46 = vadd.f32 1.0, %v5163_v61  ;;  %v3381_v2 = vrot.slane %v3366_v54, %v5626_v12  ;;  %v3473_v62 = vsel %vm192_vm0, %v3458_v37, %v3460_v38  ;;  %v2439_v38 = vld [vmem:[#allocation11 + $0xc0] sm:$0xff] }
 0x737   :  { %5170 = vpow2.f32 %v4765_v32  ;;  %v4764_v6 = vmul.f32 -1.442695, %v3386_v44  ;;  %v3444_v11 = vpop.permute.xlu1 %3443  ;;  %v4768_v25 = vmul.f32 -1.442695, %v3390_v51 }
 0x738   :  { %v5165_v16 = vpop.eup %5164  ;;  %5172 = vrcp.f32 %v3421_v46  ;;  %v3388_v45 = vadd.f32 %v3381_v2, %v3046_v50  ;;  %v3392_v3 = vadd.f32 %v3381_v2, %v3052_v30  ;;  %v3470_v20 = vsel %vm192_vm0, %v3444_v11, %v3446_v52 }
 0x739   :  { %5174 = vpow2.f32 %v4771_v14  ;;  %v3464_v58 = vpop.permute.xlu0 %3463  ;;  %3647 = vmatmul.mubr.f32.vlgmr.msra.gmra.mxu1 %v5165_v16  ;;  %v3129_v50 = vadd.f32 %v3128_v49, %v2887_v33  ;;  %v2449_v33 = vld [vmem:[#allocation13 + $0x18] sm:$0xff] }
 0x73a   :  { %v5167_v28 = vpop.eup %5166  ;;  %5176 = vpow2.f32 %v4769_v5  ;;  %v4766_v24 = vmul.f32 -1.442695, %v3388_v45  ;;  %3756 = vmatpush1.xpose.msra.mxu1 %v2445_v13  ;;  %v4770_v9 = vmul.f32 -1.442695, %v3392_v3  ;;  %v3474_v36 = vsel %vm1006_vm2, %v3473_v62, %v3464_v58  ;;  %v2443_v58 = vld [vmem:[#allocation11 + $0xe0] sm:$0xff] }
 0x73b   :  { %v3306_v22 = vadd.f32 1.0, %v5167_v28  ;;  %5178 = vpow2.f32 %v4764_v6  ;;  %v3450_v4 = vpop.permute.xlu1 %3449  ;;  %3757 = vmatprep.subr.mxu1 %v2442_v21 }
 0x73c   :  { %v5169_v43 = vpop.eup %5168  ;;  %5180 = vpow2.f32 %v4768_v25  ;;  %v3471_v31 = vsel %vm1006_vm2, %v3470_v20, %v3450_v4 }
 0x73d   :  { %5182 = vrcp.f32 %v3306_v22  ;;  %v3307_v35 = vadd.f32 1.0, %v5169_v43  ;;  %v3468_v29 = vpop.permute.xlu0 %3467 }
 0x73e   :  { %5184 = vpow2.f32 %v4766_v24  ;;  %v3475_v15 = vsel %vm1008_vm3, %v3474_v36, %v3468_v29  ;;  %3758 = vmatpush1.xpose.msra.mxu1 %v2441_v17 }
 0x73f   :  { %5186 = vrcp.f32 %v3307_v35  ;;  %v3483_v40 = vrot.slane %v3475_v15, %v5626_v12  ;;  %v3454_v23 = vpop.permute.xlu1 %3453  ;;  %v2448_v35 = vld [vmem:[#allocation13 + $0x10] sm:$0xff] }
 0x740   :  { %5188 = vpow2.f32 %v4770_v9  ;;  %v3472_v41 = vsel %vm1008_vm3, %v3471_v31, %v3454_v23 }
 0x741   :  { %v3485_v10 = vadd.f32 %v3483_v40, %v3125_v1  ;;  %v3487_v56 = vadd.f32 %v3483_v40, %v3131_v63  ;;  %v3479_v54 = vrot.slane %v3472_v41, %v5626_v12  ;;  %v6239_v61 = vpop.permute.xlu0 %3963 }
 0x742   :  { %4980 = vmatprep.subr.mxu1 %v6239_v61 }
 0x743   :  { %v4773_v14 = vmul.f32 -1.442695, %v3485_v10  ;;  %v4775_v32 = vmul.f32 -1.442695, %v3487_v56  ;;  %v3484_v44 = vadd.f32 %v3479_v54, %v3123_v8  ;;  %v3486_v51 = vadd.f32 %v3479_v54, %v3129_v50  ;;  %v3962_v31 = vpop.permute.xlu1 %3961 }
 0x744   :  { %v5171_v37 = vpop.eup %5170 }
 0x745   :  { %v5173_v30 = vpop.eup %5172  ;;  %v3419_v46 = vadd.f32 1.0, %v5171_v37  ;;  %5190 = vpow2.f32 %v4773_v14  ;;  %v4772_v60 = vmul.f32 -1.442695, %v3484_v44  ;;  %v4774_v5 = vmul.f32 -1.442695, %v3486_v51 }
 0x746   :  { %v5175_v2 = vpop.eup %5174  ;;  %5192 = vpow2.f32 %v4775_v32  ;;  %3791 = vmatprep.mubr.f32.mxu1 %v5173_v30 }
 0x747   :  { %v5177_v34 = vpop.eup %5176  ;;  %5194 = vrcp.f32 %v3419_v46  ;;  %v3425_v25 = vadd.f32 1.0, %v5175_v2 }
 0x748   :  { %v5179_v12 = vpop.eup %5178  ;;  %v3423_v6 = vadd.f32 1.0, %v5177_v34  ;;  %5196 = vpow2.f32 %v4772_v60 }
 0x749   :  { %v5181_v11 = vpop.eup %5180  ;;  %v3418_v13 = vadd.f32 1.0, %v5179_v12  ;;  %5198 = vpow2.f32 %v4774_v5 }
 0x74a   :  { %v5183_v16 = vpop.eup %5182  ;;  %v3422_v3 = vadd.f32 1.0, %v5181_v11 }
 0x74b   :  { %v5185_v49 = vpop.eup %5184  ;;  %5200 = vrcp.f32 %v3418_v13 }
 0x74c   :  { %v5187_v45 = vpop.eup %5186  ;;  %5202 = vrcp.f32 %v3423_v6  ;;  %v3420_v21 = vadd.f32 1.0, %v5185_v49 }
 0x74d   :  { %v5189_v28 = vpop.eup %5188  ;;  %3576 = vmatprep.mubr.f32.mxu0 %v5187_v45 }
 0x74e   :  { %v3424_v24 = vadd.f32 1.0, %v5189_v28  ;;  %5204 = vrcp.f32 %v3420_v21  ;;  %3577 = vmatmul.mubr.f32.vlgmr.msra.gmra.mxu0 %v5183_v16 }
 0x74f   :  { %5206 = vrcp.f32 %v3425_v25  ;;  %3681 = vmatpush1.xpose.msra.mxu0 %v2443_v58 }
 0x750   :  { %5208 = vrcp.f32 %v3422_v3  ;;  %3682 = vmatprep.subr.mxu0 %v2440_v18 }
 0x751   :  { %5210 = vrcp.f32 %v3424_v24 }
 0x752   :  { %v5191_v22 = vpop.eup %5190 }
 0x753   :  { %v5193_v4 = vpop.eup %5192  ;;  %v3501_v17 = vadd.f32 1.0, %v5191_v22  ;;  %3683 = vmatpush1.xpose.msra.mxu0 %v2439_v38 }
 0x754   :  { %v5195_v43 = vpop.eup %5194  ;;  %3832 = vmatprep.subr.mxu0 %v2449_v33  ;;  %v3503_v9 = vadd.f32 1.0, %v5193_v4 }
 0x755   :  { %v5197_v55 = vpop.eup %5196  ;;  %5212 = vrcp.f32 %v3501_v17  ;;  %3716 = vmatprep.mubr.f32.mxu0 %v5195_v43 }
 0x756   :  { %v5199_v62 = vpop.eup %5198  ;;  %v3500_v52 = vadd.f32 1.0, %v5197_v55 }
 0x757   :  { %v3502_v29 = vadd.f32 1.0, %v5199_v62 }
 0x758   :  { %v5201_v36 = vpop.eup %5200  ;;  %5214 = vrcp.f32 %v3500_v52 }
 0x759   :  { %v5203_v1 = vpop.eup %5202  ;;  %5216 = vrcp.f32 %v3503_v9  ;;  %3717 = vmatmul.mubr.f32.vlgmr.msra.gmra.mxu0 %v5201_v36 }
 0x75a   :  { %3833 = vmatpush1.xpose.msra.mxu0 %v2448_v35  ;;  %3721 = vmatprep.mubr.f32.mxu0 %v5203_v1  ;;  %5218 = vrcp.f32 %v3502_v29 }
 0x75b   :  { %v5205_v20 = vpop.eup %5204  ;;  %4987 = vmatprep.subr.mxu0 %v6108_v19 }
 0x75c   :  { %v5207_v15 = vpop.eup %5206  ;;  %3792 = vmatmul.mubr.f32.vlgmr.msra.gmra.mxu1 %v5205_v20 }
 0x75d   :  { %v5209_v63 = vpop.eup %5208  ;;  %4981 = vmatpush3.msra.mxu1 %v6239_v61  ;;  %3796 = vmatprep.mubr.f32.mxu1 %v5207_v15 }
 0x75e   :  { %4982 = vmatprep.subr.mxu1 %v3962_v31  ;;  %3722 = vmatmul.mubr.f32.gmra.mxu0 %v5209_v63  ;;  %v5211_v40 = vpop.eup %5210 }
 0x75f   :  { %4983 = vmatpush3.msra.mxu1 %v3962_v31 }
 0x760   :  { %3797 = vmatmul.mubr.f32.gmra.mxu1 %v5211_v40  ;;  %4992 = vmatprep.subr.mxu1 %v5499_v0 }
 0x762   :  { %v5213_v23 = vpop.eup %5212 }
 0x763   :  { %3866 = vmatprep.mubr.f32.mxu0 %v5213_v23 }
 0x765   :  { %v5215_v8 = vpop.eup %5214 }
 0x766   :  { %v5217_v41 = vpop.eup %5216  ;;  %3867 = vmatmul.mubr.f32.vlgmr.msra.gmra.mxu0 %v5215_v8 }
 0x767   :  { %4988 = vmatpush3.msra.mxu0 %v6108_v19  ;;  %3871 = vmatprep.mubr.f32.mxu0 %v5217_v41  ;;  %v5219_v50 = vpop.eup %5218 }
 0x76a   :  { %3872 = vmatmul.mubr.f32.gmra.mxu0 %v5219_v50 }
 0x7f9   :  { %v3648_v10 = vpop.f32.mrf.mxu1 }
 0x7fb   :  { %v3650_v56 = vpop.f32.mrf.mxu1 }
 0x80e   :  { %v3578_v54 = vpop.f32.mrf.mxu0 }
 0x80f   :  { %v3649_v14 = vadd.f32 %v3648_v10, %v3578_v54 }
 0x810   :  { %v3580_v61 = vpop.f32.mrf.mxu0 }
 0x811   :  { %v3877_v32 = vsel %vm1622_vm4, %v3649_v14, -inf }
 0x812   :  { %v3878_v37 = vrot.slane %v3877_v32, 4 }
 0x814   :  { %v3879_v2 = vmax.f32 %v3877_v32, %v3878_v37 }
 0x816   :  { %v3880_v16 = vrot.slane %v3879_v2, 2 }
 0x818   :  { %v3881_v3 = vmax.f32 %v3879_v2, %v3880_v16 }
 0x819   :  { %v3718_v44 = vpop.f32.mrf.mxu0 }
 0x81a   :  { %v3882_v33 = vrot.slane %v3881_v3, 1 }
 0x81b   :  { %v3720_v51 = vpop.f32.mrf.mxu0 }
 0x81c   :  { %v3793_v30 = vpop.f32.mrf.mxu1  ;;  %v3883_v9 = vmax.f32 %v3881_v3, %v3882_v33  ;;  %v5239_v51 = vld [vmem:[%s6333_s2 + $0x10] sm:$0xff] }
 0x81d   :  { %v3794_v5 = vadd.f32 %v3793_v30, %v3718_v44  ;;  %v5240_v30 = vld [vmem:[%s6333_s2 + $0x18] sm:$0xff] }
 0x81e   :  { %v3723_v46 = vpop.f32.mrf.mxu0  ;;  %v3795_v60 = vpop.f32.mrf.mxu1 }
 0x81f   :  { %v3884_v11 = vsel %vm1622_vm4, %v3794_v5, -inf }
 0x820   :  { %v3725_v34 = vpop.f32.mrf.mxu0  ;;  %v3798_v19 = vpop.f32.mrf.mxu1 }
 0x821   :  { %v3799_v12 = vadd.f32 %v3798_v19, %v3723_v46 }
 0x822   :  { %v3800_v6 = vpop.f32.mrf.mxu1 }
 0x823   :  { %v3885_v13 = vsel %vm1622_vm4, %v3799_v12, -inf }
 0x824   :  { %v3886_v49 = vmax.f32 %v3884_v11, %v3885_v13 }
 0x826   :  { %v3887_v25 = vrot.slane %v3886_v49, 4  ;;  %v3868_v45 = vpop.f32.mrf.mxu0 }
 0x827   :  { %v4161_v24 = vsel %vm1826_vm5, %v3868_v45, -inf }
 0x828   :  { %v3888_v21 = vmax.f32 %v3886_v49, %v3887_v25  ;;  %v3870_v58 = vpop.f32.mrf.mxu0  ;;  %v5241_v49 = vld [vmem:[%s6333_s2 + $0x20] sm:$0xff] }
 0x82a   :  { %v3889_v28 = vrot.slane %v3888_v21, 2  ;;  %v3873_v18 = vpop.f32.mrf.mxu0 }
 0x82b   :  { %v4162_v38 = vsel %vm1826_vm5, %v3873_v18, -inf }
 0x82c   :  { %v3890_v22 = vmax.f32 %v3888_v21, %v3889_v28  ;;  %v4163_v4 = vmax.f32 %v4161_v24, %v4162_v38  ;;  %v3875_v17 = vpop.f32.mrf.mxu0 }
 0x82e   :  { %v3891_v43 = vrot.slane %v3890_v22, 1  ;;  %v4164_v55 = vrot.slane %v4163_v4, 4 }
 0x830   :  { %v3892_v62 = vmax.f32 %v3890_v22, %v3891_v43  ;;  %v4165_v52 = vmax.f32 %v4163_v4, %v4164_v55 }
 0x832   :  { %v3893_v35 = vmax.f32 %v3883_v9, %v3892_v62  ;;  %v4166_v36 = vrot.slane %v4165_v52, 2 }
 0x834   :  { %v3894_v29 = vsub.f32 %v3649_v14, %v3893_v35  ;;  %v3898_v1 = vsub.f32 %v3794_v5, %v3893_v35  ;;  %v3899_v20 = vsub.f32 %v3799_v12, %v3893_v35  ;;  %v4167_v15 = vmax.f32 %v4165_v52, %v4166_v36  ;;  %v5238_v14 = vld [vmem:[%s6333_s2] sm:$0xff] }
 0x836   :  { %v3895_v63 = vmul.f32 1.442695, %v3894_v29  ;;  %v3900_v31 = vmul.f32 1.442695, %v3898_v1  ;;  %v3902_v40 = vmul.f32 1.442695, %v3899_v20 }
 0x837   :  { %v4168_v23 = vrot.slane %v4167_v15, 1 }
 0x838   :  { %5220 = vpow2.f32 %v3895_v63 }
 0x839   :  { %5222 = vpow2.f32 %v3900_v31  ;;  %v4169_v8 = vmax.f32 %v4167_v15, %v4168_v23 }
 0x83a   :  { %5224 = vpow2.f32 %v3902_v40 }
 0x83b   :  { %v4170_v41 = vsub.f32 %v3868_v45, %v4169_v8  ;;  %v4171_v50 = vsub.f32 %v3873_v18, %v4169_v8  ;;  %v5242_v45 = vld [vmem:[%s6333_s2 + $0x28] sm:$0xff]  ;;  %s5503_s2 = smov [#allocation17]  }
 0x83d   :  { %v4172_v10 = vmul.f32 1.442695, %v4170_v41  ;;  %v4174_v56 = vmul.f32 1.442695, %v4171_v50  ;;  %v2429_v50 = vld [vmem:[#allocation14 + $0x38] sm:$0xff] }
 0x83f   :  { %5226 = vpow2.f32 %v4172_v10  ;;  %v2427_v10 = vld [vmem:[#allocation14 + $0x28] sm:$0xff] }
 0x840   :  { %5228 = vpow2.f32 %v4174_v56  ;;  %v2426_v56 = vld [vmem:[#allocation14 + $0x20] sm:$0xff] }
 0x845   :  { %v5221_v54 = vpop.eup %5220 }
 0x846   :  { %v5223_v61 = vpop.eup %5222  ;;  %v3897_v32 = vmul.f32 %v5238_v14, %v5221_v54  ;;  %v2428_v54 = vld [vmem:[#allocation14 + $0x30] sm:$0xff]  ;;  %v4225_v14 = vpop.permute.xlu1 %4224 }
 0x847   :  { %v5225_v44 = vpop.eup %5224  ;;  %v3904_v37 = vmul.f32 %v5239_v51, %v5223_v61  ;;  %v4227_v61 = vpop.permute.xlu0 %4226 }
 0x848   :  { %v3905_v46 = vmul.f32 %v5240_v30, %v5225_v44  ;;  %v3906_v60 = vsel %vm1622_vm4, %v3897_v32, 0.0 }
 0x849   :  { %v3907_v5 = vrot.slane %v3906_v60, 4  ;;  %v3913_v2 = vsel %vm1622_vm4, %v3904_v37, 0.0 }
 0x84a   :  { %v3914_v34 = vsel %vm1622_vm4, %v3905_v46, 0.0 }
 0x84b   :  { %v3908_v19 = vadd.f32 %v3907_v5, %v3906_v60  ;;  %v3915_v12 = vadd.f32 %v3914_v34, %v3913_v2 }
 0x84c   :  { %v5227_v6 = vpop.eup %5226 }
 0x84d   :  { %v5229_v11 = vpop.eup %5228  ;;  %v3909_v13 = vrot.slane %v3908_v19, 2  ;;  %v3916_v16 = vrot.slane %v3915_v12, 4  ;;  %v4176_v25 = vmul.f32 %v5241_v49, %v5227_v6 }
 0x84e   :  { %v4177_v3 = vmul.f32 %v5242_v45, %v5229_v11 }
 0x84f   :  { %v3910_v21 = vadd.f32 %v3909_v13, %v3908_v19  ;;  %v3917_v58 = vadd.f32 %v3916_v16, %v3915_v12  ;;  %v4178_v28 = vsel %vm1826_vm5, %v4176_v25, 0.0 }
 0x850   :  { %v4179_v18 = vsel %vm1826_vm5, %v4177_v3, 0.0 }
 0x851   :  { %v3918_v24 = vrot.slane %v3917_v58, 2  ;;  %v4180_v38 = vadd.f32 %v4179_v18, %v4178_v28  ;;  %v3911_v33 = vrot.slane %v3910_v21, 1 }
 0x853   :  { %v3919_v22 = vadd.f32 %v3918_v24, %v3917_v58  ;;  %v4181_v4 = vrot.slane %v4180_v38, 4  ;;  %v3912_v55 = vadd.f32 %v3911_v33, %v3910_v21  ;;  %v5243_v33 = vld [vmem:[#allocation16 + $0x8] sm:$0xff] }
 0x855   :  { %v3920_v17 = vrot.slane %v3919_v22, 1  ;;  %v4182_v43 = vadd.f32 %v4181_v4, %v4180_v38 }
 0x857   :  { %v3921_v9 = vadd.f32 %v3920_v17, %v3919_v22  ;;  %v4183_v62 = vrot.slane %v4182_v43, 2  ;;  %v4478_v22 = vrot.slane %v5243_v33, %v5784_v53 }
 0x859   :  { %v3922_v52 = vadd.f32 %v3921_v9, %v3912_v55  ;;  %v4184_v35 = vadd.f32 %v4183_v62, %v4182_v43  ;;  %v4486_v43 = vrot.slane %v5243_v33, %v5775_v48  ;;  %v4667_v48 = vrot.slane %v5243_v33, %v5797_v27 }
 0x85b   :  { %vm3923_vm11 = vcmp.gt.f32.partialorder %v3922_v52, 0.0  ;;  %v4185_v36 = vrot.slane %v4184_v35, 1 }
 0x85c   :  { %v3924_v29 = vsel %vm3923_vm11, %v3922_v52, 1.0 }
 0x85d   :  { %5230 = vrcp.f32 %v3924_v29  ;;  %v4186_v1 = vadd.f32 %v4185_v36, %v4184_v35  ;;  %v4661_v29 = vrot.slane %v5243_v33, %v5678_v59 }
 0x85f   :  { %vm4187_vm12 = vcmp.gt.f32.partialorder %v4186_v1, 0.0 }
 0x860   :  { %v4188_v20 = vsel %vm4187_vm12, %v4186_v1, 1.0 }
 0x861   :  { %5232 = vrcp.f32 %v4188_v20 }
 0x86a   :  { %v5231_v15 = vpop.eup %5230 }
 0x86b   :  { %v3927_v63 = vmul.f32 %v5231_v15, %v3904_v37  ;;  %v3926_v31 = vmul.f32 %v5231_v15, %v3897_v32  ;;  %v3928_v40 = vmul.f32 %v5231_v15, %v3905_v46 }
 0x86d   :  { %3929 = vxpose.xlu0.b32.start [1/2] (short) (narrow) %v3927_v63, 16  ;;  %4048 = vxpose.xlu1.b32.start.end [1/1] (short) (narrow) %v3926_v31, 16 }
 0x86e   :  { %v5233_v23 = vpop.eup %5232 }
 0x86f   :  { %v4190_v8 = vmul.f32 %v5233_v23, %v4176_v25  ;;  %v4191_v41 = vmul.f32 %v5233_v23, %v4177_v3 }
 0x871   :  { %3930 = vxpose.xlu0.b32.end [2/2] (short) (narrow) %v3928_v40, 16 }
 0x875   :  { %4192 = vxpose.xlu0.b32.start [1/2] (short) (narrow) %v4190_v8, 8 }
 0x879   :  { %4193 = vxpose.xlu0.b32.end [2/2] (short) (narrow) %v4191_v41, 8 }
 0x88f   :  { %4313 = vrot.lane.b32.xlu1 %v2429_v50, %s5501_s7 }
 0x893   :  { %4309 = vrot.lane.b32.xlu1 %v2427_v10, %s5501_s7 }
 0x897   :  { %4307 = vrot.lane.b32.xlu1 %v2426_v56, %s5501_s7 }
 0x89b   :  { %4579 = vrot.lane.b32.xlu1 %v2429_v50, %s5502_s9 }
 0x89f   :  { %4577 = vrot.lane.b32.xlu1 %v2428_v54, %s5502_s9 }
 0x8a2   :  { %4311 = vrot.lane.b32.xlu0 %v2428_v54, %s5501_s7 }
 0x8a3   :  { %4575 = vrot.lane.b32.xlu1 %v2427_v10, %s5502_s9 }
 0x8a6   :  { %4497 = vrot.lane.b32.xlu0 %v2429_v50, %s5484_s13 }
 0x8a7   :  { %4573 = vrot.lane.b32.xlu1 %v2426_v56, %s5502_s9 }
 0x8aa   :  { %4495 = vrot.lane.b32.xlu0 %v2428_v54, %s5484_s13 }
 0x8ae   :  { %4493 = vrot.lane.b32.xlu0 %v2427_v10, %s5484_s13 }
 0x8b2   :  { %4491 = vrot.lane.b32.xlu0 %v2426_v56, %s5484_s13  ;;  %s4681_s13 = sshll.u32 %s5503_s2, 4  ;;  %s4682_s13 = int_to_ptr.vmem [resolvable:$true] %s4681_s13 }
 0x8b3   :  { %s5424_s28 = scalar_lea.vmem %s4682_s13, 256  ;;  %p5429_p4 = scmp.lt.s32.totalorder %s4682_s13, %s4682_s13 }
 0x8b4   :  { %p5425_p3 = scmp.ne.s32.totalorder %s4682_s13, %s5424_s28  ;;  %p5430_p5 = scmp.lt.s32.totalorder %s5424_s28, %s5424_s28 }
 0x8b6   :  { %p5431_p6 = por %p5430_p5, %p5429_p4 }
 0x8b8   :  { %p5432_p7 = pnand %p5431_p6, %p5425_p3 }
 0x8e9   :  { %v3945_v32 = vpop.trf.xlu0  ;;  %v4064_v44 = vpop.trf.xlu1 }
 0x8ea   :  { %4984 = vmatprep.mubr.msk.f32.mxu1 %vm1622_vm4, %v3945_v32  ;;  %4989 = vmatprep.mubr.msk.f32.mxu0 %vm1826_vm5, %v4064_v44 }
 0x8ed   :  { %v3946_v51 = vpop.trf.xlu0  ;;  %v4065_v37 = vpop.trf.xlu1 }
 0x8ee   :  { %4985 = vmatmul.mubr.msk.f32.vlgmr.msra.gmra.mxu1 %vm1622_vm4, %v3946_v51  ;;  %4990 = vmatmul.mubr.msk.f32.vlgmr.msra.gmra.mxu0 %vm1826_vm5, %v4065_v37 }
 0x8ef   :  { %4993 = vmatpush3.msra.mxu1 %v4227_v61  ;;  %5007 = vmatprep.mubr.msk.f32.mxu0 %vm192_vm0, %v6007_v26 }
 0x8f0   :  { %4994 = vmatprep.subr.mxu1 %v5499_v0  ;;  %4996 = vmatprep.mubr.msk.f32.mxu1 %vm5500_vm1, %v5499_v0 }
 0x8f1   :  { %4995 = vmatpush3.msra.mxu1 %v4225_v14  ;;  %v4208_v30 = vpop.trf.xlu0 }
 0x8f2   :  { %4997 = vmatmul.mubr.msk.f32.vlgmr.msra.gmra.mxu1 %vm1622_vm4, %v4208_v30  ;;  %5010 = vmatprep.subr.mxu1 %v2429_v50 }
 0x8f3   :  { %5011 = vmatpush3.msra.mxu1 %v2429_v50 }
 0x8f4   :  { %5012 = vmatprep.subr.mxu1 %v2428_v54 }
 0x8f5   :  { %5013 = vmatpush3.msra.mxu1 %v2428_v54 }
 0x8f6   :  { %5014 = vmatprep.subr.mxu1 %v2427_v10 }
 0x8f7   :  { %5015 = vmatpush3.msra.mxu1 %v2427_v10 }
 0x8f8   :  { %5016 = vmatprep.subr.mxu1 %v2426_v56 }
 0x8f9   :  { %5017 = vmatpush3.msra.mxu1 %v2426_v56 }
 0x8fa   :  { %5032 = vmatprep.subr.mxu1 %v5499_v0 }
 0x901   :  { %v4314_v26 = vpop.permute.xlu1 %4313 }
 0x902   :  { %4999 = vmatprep.subr.mxu0 %v4314_v26 }
 0x903   :  { %5000 = vmatpush3.msra.mxu0 %v4314_v26 }
 0x905   :  { %v4310_v46 = vpop.permute.xlu1 %4309 }
 0x909   :  { %v4308_v5 = vpop.permute.xlu1 %4307 }
 0x914   :  { %v4312_v60 = vpop.permute.xlu0 %4311 }
 0x915   :  { %5001 = vmatprep.subr.mxu0 %v4312_v60 }
 0x916   :  { %5002 = vmatpush3.msra.mxu0 %v4312_v60 }
 0x917   :  { %5003 = vmatprep.subr.mxu0 %v4310_v46 }
 0x918   :  { %v4498_v2 = vpop.permute.xlu0 %4497  ;;  %5004 = vmatpush3.msra.mxu0 %v4310_v46 }
 0x919   :  { %5005 = vmatprep.subr.mxu0 %v4308_v5 }
 0x91a   :  { %5006 = vmatpush3.msra.mxu0 %v4308_v5 }
 0x91b   :  { %5008 = vmatmul.mubr.msk.f32.vlgmr.msra.gmra.mxu0 %vm192_vm0, %v6015_v39  ;;  %5021 = vmatprep.subr.mxu0 %v5499_v0  ;;  %v4580_v39 = vpop.permute.xlu1 %4579 }
 0x91c   :  { %v4496_v34 = vpop.permute.xlu0 %4495  ;;  %5022 = vmatpush3.msra.mxu0 %v4498_v2  ;;  %5029 = vmatprep.mubr.msk.f32.mxu0 %vm5500_vm1, %v5499_v0 }
 0x91d   :  { %5023 = vmatprep.subr.mxu0 %v5499_v0 }
 0x91e   :  { %5024 = vmatpush3.msra.mxu0 %v4496_v34 }
 0x91f   :  { %5025 = vmatprep.subr.mxu0 %v5499_v0  ;;  %v4578_v6 = vpop.permute.xlu1 %4577 }
 0x920   :  { %v4494_v19 = vpop.permute.xlu0 %4493 }
 0x921   :  { %5026 = vmatpush3.msra.mxu0 %v4494_v19 }
 0x922   :  { %5027 = vmatprep.subr.mxu0 %v5499_v0 }
 0x923   :  { %v4576_v3 = vpop.permute.xlu1 %4575 }
 0x924   :  { %v4492_v12 = vpop.permute.xlu0 %4491 }
 0x925   :  { %5028 = vmatpush3.msra.mxu0 %v4492_v12 }
 0x926   :  { %5030 = vmatmul.mubr.msk.f32.vlgmr.msra.gmra.mxu0 %vm192_vm0, %v5993_v42 }
 0x927   :  { %v4574_v42 = vpop.permute.xlu1 %4573 }
 0x9ae   :  { %v4986_v11 = vpop.f32.mrf.mxu1  ;;  %v4991_v13 = vpop.f32.mrf.mxu0 }
 0x9af   :  { %v4158_v45 = vadd.f32 %v4991_v13, %v4986_v11 }
 0x9b0   :  { %v4039_v16 = vpop.f32.mrf.mxu1  ;;  %v4152_v49 = vpop.f32.mrf.mxu0 }
 0x9b1   :  { %v4153_v25 = vadd.f32 %v4152_v49, %v4039_v16 }
 0x9b2   :  { %v4299_v21 = vpop.f32.mrf.mxu1 }
 0x9b3   :  { %5018 = vmatprep.mubr.msk.f32.mxu1 %vm192_vm0, %v4153_v25 }
 0x9b4   :  { %5019 = vmatmul.mubr.msk.f32.vlgmr.msra.gmra.mxu1 %vm192_vm0, %v4158_v45  ;;  %v4998_v58 = vpop.f32.mrf.mxu1 }
 0x9b5   :  { %5033 = vmatpush3.msra.mxu1 %v4580_v39  ;;  %5040 = vmatprep.mubr.msk.f32.mxu1 %vm5500_vm1, %v5499_v0 }
 0x9b6   :  { %5034 = vmatprep.subr.mxu1 %v5499_v0 }
 0x9b7   :  { %5035 = vmatpush3.msra.mxu1 %v4578_v6 }
 0x9b8   :  { %5036 = vmatprep.subr.mxu1 %v5499_v0 }
 0x9b9   :  { %5037 = vmatpush3.msra.mxu1 %v4576_v3 }
 0x9ba   :  { %5038 = vmatprep.subr.mxu1 %v5499_v0 }
 0x9bb   :  { %5039 = vmatpush3.msra.mxu1 %v4574_v42 }
 0x9bc   :  { %5041 = vmatmul.mubr.msk.f32.vlgmr.msra.gmra.mxu1 %vm192_vm0, %v4299_v21 }
 0x9db   :  { %v5009_v28 = vpop.f32.mrf.mxu0 }
 0x9dd   :  { %v4385_v18 = vpop.f32.mrf.mxu0 }
 0x9e6   :  { %v4569_v24 = vpop.f32.mrf.mxu0 }
 0x9e8   :  { %v5031_v38 = vpop.f32.mrf.mxu0 }
 0xa74   :  { %v5020_v4 = vpop.f32.mrf.mxu1 }
 0xa75   :  { %v4472_v17 = vadd.f32 %v5020_v4, %v5009_v28 }
 0xa76   :  { %v4466_v55 = vpop.f32.mrf.mxu1 }
 0xa77   :  { %v4480_v9 = vadd.f32 %v4478_v22, %v4472_v17  ;;  %v4467_v62 = vadd.f32 %v4466_v55, %v4385_v18 }
 0xa79   :  { %vm4482_vm13 = vcmp.ge.f32.partialorder %v4480_v9, 0.0  ;;  %v4488_v52 = vmul.f32 %v4486_v43, %v4480_v9  ;;  %v4479_v0 = vadd.f32 %v4478_v22, %v4467_v62 }
 0xa7b   :  { %v4490_v35 = vsel %vm4482_vm13, %v4480_v9, %v4488_v52  ;;  %vm4481_vm14 = vcmp.ge.f32.partialorder %v4479_v0, 0.0  ;;  %v4487_v36 = vmul.f32 %v4486_v43, %v4479_v0 }
 0xa7c   :  { %v4654_v1 = vpop.f32.mrf.mxu1  ;;  %v4671_v53 = vadd.f32 %v4490_v35, %v5968_v47 }
 0xa7d   :  { %v4489_v20 = vsel %vm4481_vm14, %v4479_v0, %v4487_v36  ;;  %v4655_v15 = vadd.f32 %v4654_v1, %v4569_v24 }
 0xa7e   :  { %v5042_v63 = vpop.f32.mrf.mxu1  ;;  %v4670_v31 = vadd.f32 %v4489_v20, %v5971_v57  ;;  %4674 = vst.msk [vmem:[#allocation17 + $0x8] sm:$0xff] %vm192_vm0, %v4671_v53 }
 0xa7f   :  { %v4662_v40 = vadd.f32 %v4661_v29, %v4655_v15 }
 0xa80   :  { %4673 = vst.msk [vmem:[#allocation17] sm:$0xff] %vm192_vm0, %v4670_v31 }
 0xa81   :  { %vm4663_vm15 = vcmp.ge.f32.partialorder %v4662_v40, 0.0  ;;  %v4668_v59 = vmul.f32 %v4667_v48, %v4662_v40 }
 0xa82   :  { %5435 = shalt.err (!%p5432_p7)
}
 0xa83   :  { %4687 = dma.vmem_to_hbm [thread:$0]  %s4682_s13, 256, %s6341_s10, [#allocation4], %s5487_s20, %s5487_s20, %s5488_s21   ;;  %v4669_v27 = vsel %vm4663_vm15, %v4662_v40, %v4668_v59 }
 0xa84   :  { %v4672_v47 = vadd.f32 %v4669_v27, %v5977_v7  ;;  %s5444_s8 = scalar_lea.vmem %s4695_s27, 128  ;;  %p5449_p9 = scmp.lt.s32.totalorder %s4695_s27, %s4695_s27 }
 0xa85   :  { %p5445_p8 = scmp.ne.s32.totalorder %s4695_s27, %s5444_s8  ;;  %p5450_p10 = scmp.lt.s32.totalorder %s5444_s8, %s5444_s8 }
 0xa86   :  { %4675 = vst.msk [vmem:[#allocation18] sm:$0xff] %vm192_vm0, %v4672_v47 }
 0xa87   :  { %p5451_p11 = por %p5450_p10, %p5449_p9 }
 0xa89   :  { %p5452_p12 = pnand %p5451_p11, %p5445_p8 }
 0xa8b   :  { %5455 = shalt.err (!%p5452_p12)
}
 0xa8c   :  { %4697 = dma.vmem_to_hbm [thread:$0]  %s4695_s27, 128, %s6342_s11, [#allocation19]  }
 0xa8d   :  { %5474 = dma.done.wait [#allocation4], 256  }
 0xa8e   :  { %5475 = vsyncadd [#allocation4], 4294967040 }
 0xa8f   :  { %5476 = dma.done.wait [#allocation19], 128  }
 0xa90   :  { %5477 = vsyncadd [#allocation19], 4294967168 }
 0xa91   :  { %4704 = vsyncpa [#allocation3], 1 }
 0xa92   :  { %4705 = vsyncpa [#allocation6], 1 }
 0xa93   :  { %4706 = vsyncpa [#allocation9], 1 }
 0xa94   :  { %4707 = vsyncpa [#allocation12], 1 }
 0xa95   :  { %4708 = vsyncpa [#allocation15], 1 }
 0xa96   :  { %4709 = vsyncpa [#allocation4], 1 }
 0xa97   :  { %4710 = vsyncpa [#allocation19], 1 }

</bundles_post_ra>
